<compile_context>
chip_gen: v7x
topology: tpu7x:2x2x1
jax: 0.10.0
libtpu: 0.0.40
codegen_flags: <defaults>
</compile_context>

<pallas_src>
import functools

import jax
import jax.numpy as jnp
import numpy as np
from jax.experimental import pallas as pl
from jax.experimental.pallas import tpu as pltpu


# ---------------------------------------------------------------------------
# Fully fused encoder kernel (all stride-1 conv layers in one pallas_call).
# ---------------------------------------------------------------------------
def _fused_encoder_kernel(*refs, cfg, n_layers, compute_dtype):
    # refs = x_ref, (w_ref, b_ref) * n_layers, o_ref, act_scratch * (n_layers - 1)
    x_ref = refs[0]
    w_refs = [refs[1 + 2 * l] for l in range(n_layers)]
    b_refs = [refs[2 + 2 * l] for l in range(n_layers)]
    o_ref = refs[1 + 2 * n_layers]
    act_refs = list(refs[2 + 2 * n_layers:])

    for l in range(n_layers):
        ksz, pad, hp, wp, h_out, w_out, L, cin, cout = cfg[l]
        src = x_ref if l == 0 else act_refs[l - 1]     # (Hp*Wp, Cin), zero padded

        # Bias-initialized f32 accumulator.
        acc = jnp.broadcast_to(b_refs[l][...].astype(jnp.float32), (L, cout))
        for kh in range(ksz):                           # fused im2col: KH*KW slab matmuls
            for kw in range(ksz):
                d = kh * wp + kw
                patch = src[d:d + L, :]                 # (L, Cin) static slice, stays in VMEM
                slab = w_refs[l][kh * ksz + kw]         # (Cin, Cout)
                acc = acc + jnp.dot(patch.astype(compute_dtype),
                                    slab.astype(compute_dtype),
                                    preferred_element_type=jnp.float32)

        if l < n_layers - 1:
            acc = jnp.maximum(acc, 0.0)                 # ReLU (dropped after last layer)
            # Hand off: write the valid W_out-wide runs into the next layer's
            # zero-padded flattened buffer (everything else stays zero = padding).
            nxt = act_refs[l]
            _, npad, _, nwp, _, _, _, _, _ = cfg[l + 1]
            nxt[...] = jnp.zeros_like(nxt)              # re-zero: safe under core-parallel grid
            for h in range(h_out):
                dst = (h + npad) * nwp + npad
                nxt[dst:dst + w_out, :] = acc[h * wp:h * wp + w_out, :]
        else:
            for h in range(h_out):
                o_ref[h * w_out:(h + 1) * w_out, :] = (
                    acc[h * wp:h * wp + w_out, :].astype(o_ref.dtype))


def _fused_encoder_forward(x_nchw, w_slabs, b_rows, *, cfg, out_hw, compute_dtype):
    """x_nchw: (Nb, C0, H, W).  All layers stride 1.  Returns NCHW output."""
    n_layers = len(w_slabs)
    nb = x_nchw.shape[0]
    _, pad0, hp0, wp0, _, _, _, c0, _ = cfg[0]
    h_last, w_last = out_hw
    c_last = cfg[-1][8]

    # NCHW -> NHWC, spatial zero-pad once, flatten spatial dims (tiny, one-time glue).
    x = jnp.transpose(x_nchw, (0, 2, 3, 1))
    x = jnp.pad(x, ((0, 0), (pad0, pad0), (pad0, pad0), (0, 0)))
    x = x.reshape(nb, hp0 * wp0, c0)

    in_specs = [pl.BlockSpec((None, hp0 * wp0, c0), lambda b: (b, 0, 0))]
    inputs = [x]
    for l in range(n_layers):
        kk, cin, cout = w_slabs[l].shape
        # Constant index maps -> weights/bias are DMA'd into VMEM once for the call.
        in_specs.append(pl.BlockSpec((kk, cin, cout), lambda b: (0, 0, 0)))
        in_specs.append(pl.BlockSpec((1, cout), lambda b: (0, 0)))
        inputs.append(w_slabs[l])
        inputs.append(b_rows[l])

    scratch = []
    for l in range(1, n_layers):
        _, _, hp, wp, _, _, _, cin, _ = cfg[l]
        scratch.append(pltpu.VMEM((hp * wp, cin), jnp.float32))

    out = pl.pallas_call(
        functools.partial(_fused_encoder_kernel, cfg=cfg, n_layers=n_layers,
                          compute_dtype=compute_dtype),
        out_shape=jax.ShapeDtypeStruct((nb, h_last * w_last, c_last), x_nchw.dtype),
        grid_spec=pltpu.PrefetchScalarGridSpec(
            num_scalar_prefetch=0,
            grid=(nb,),   # batch >= 2 keeps both v7x TensorCores busy
            in_specs=in_specs,
            out_specs=pl.BlockSpec((None, h_last * w_last, c_last),
                                   lambda b: (b, 0, 0)),
            scratch_shapes=scratch,
        ),
        compiler_params=pltpu.CompilerParams(dimension_semantics=("parallel",)),
    )(*inputs)

    out = out.reshape(nb, h_last, w_last, c_last)
    return jnp.transpose(out, (0, 3, 1, 2))          # back to NCHW


# ---------------------------------------------------------------------------
# Fallback path for stride > 1 layers: per-layer im2col (JAX glue) + Pallas matmul
# with fused bias + ReLU.  Correct for the general config; not the hot path here.
# TODO(synk): stride>1 layers still materialize the HBM im2col matrix; extend the
#             fused VMEM path with strided in-kernel slicing if that config gets hot.
# ---------------------------------------------------------------------------
def _matmul_bias_act_kernel(x_ref, w_ref, b_ref, o_ref, *, apply_relu):
    acc = jnp.dot(x_ref[...], w_ref[...], preferred_element_type=jnp.float32)
    acc = acc + b_ref[...]
    if apply_relu:
        acc = jnp.maximum(acc, 0.0)
    o_ref[...] = acc.astype(o_ref.dtype)


def _matmul_bias_act(x, w, b2, apply_relu, tm=512):
    M, K = x.shape
    _, N = w.shape
    tm = min(tm, ((M + 7) // 8) * 8)
    M_pad = ((M + tm - 1) // tm) * tm
    if M_pad != M:
        x = jnp.pad(x, ((0, M_pad - M), (0, 0)))
    out = pl.pallas_call(
        functools.partial(_matmul_bias_act_kernel, apply_relu=apply_relu),
        out_shape=jax.ShapeDtypeStruct((M_pad, N), x.dtype),
        grid_spec=pltpu.PrefetchScalarGridSpec(
            num_scalar_prefetch=0,
            grid=(M_pad // tm,),
            in_specs=[
                pl.BlockSpec((tm, K), lambda i: (i, 0)),
                pl.BlockSpec((K, N), lambda i: (0, 0)),
                pl.BlockSpec((1, N), lambda i: (0, 0)),
            ],
            out_specs=pl.BlockSpec((tm, N), lambda i: (i, 0)),
        ),
        compiler_params=pltpu.CompilerParams(dimension_semantics=("parallel",)),
    )(x, w, b2)
    return out[:M] if M_pad != M else out


def _conv2d_im2col_pallas(x_nhwc, w_oihw, bias, stride, padding, apply_relu):
    cout, cin, kh, kw = w_oihw.shape
    xp = jnp.pad(x_nhwc, ((0, 0), (padding, padding), (padding, padding), (0, 0)))
    nb, hp, wp, _ = xp.shape
    h_out = (hp - kh) // stride + 1
    w_out = (wp - kw) // stride + 1
    patches = []
    for i in range(kh):
        for j in range(kw):
            patches.append(xp[:, i:i + stride * (h_out - 1) + 1:stride,
                                 j:j + stride * (w_out - 1) + 1:stride, :])
    pat = jnp.concatenate(patches, axis=-1)
    x2 = pat.reshape(nb * h_out * w_out, kh * kw * cin)
    w2 = jnp.transpose(w_oihw, (2, 3, 1, 0)).reshape(kh * kw * cin, cout)
    y2 = _matmul_bias_act(x2, w2, bias.reshape(1, cout), apply_relu)
    return y2.reshape(nb, h_out, w_out, cout)


# ---------------------------------------------------------------------------
# BFSConvEncoder: sequence of Conv2d + ReLU, with the trailing ReLU dropped.
# ---------------------------------------------------------------------------
class BFSConvEncoderPallas:

    def __init__(self, obs_shape, hidden_size_list=(32, 64, 64, 128),
                 kernel_size=(8, 4, 3), stride=(4, 2, 1), padding=None,
                 compute_dtype=jnp.float32, key=None):
        if padding is None:
            padding = [0 for _ in range(len(kernel_size))]
        if key is None:
            key = jax.random.PRNGKey(0)
        self.obs_shape = tuple(obs_shape)
        self.kernel_size = list(kernel_size)
        self.stride = list(stride)
        self.padding = list(padding)
        self.compute_dtype = compute_dtype

        # Deterministic init matching nn.Conv2d's default U(-1/sqrt(fan_in), +bound).
        self.params = []    # raw (w_oihw f32, b f32): used by the reference & fallback
        self.w_slabs = []   # (KH*KW, Cin, Cout) in compute_dtype: fused-kernel layout
        self.b_rows = []    # (1, Cout) f32
        in_ch = obs_shape[0]
        for i, k in enumerate(kernel_size):
            out_ch = hidden_size_list[i]
            key, wk, bk = jax.random.split(key, 3)
            bound = 1.0 / np.sqrt(in_ch * k * k)
            w = jax.random.uniform(wk, (out_ch, in_ch, k, k), jnp.float32, -bound, bound)
            b = jax.random.uniform(bk, (out_ch,), jnp.float32, -bound, bound)
            self.params.append((w, b))
            self.w_slabs.append(
                jnp.transpose(w, (2, 3, 1, 0)).reshape(k * k, in_ch, out_ch)
                .astype(compute_dtype))
            self.b_rows.append(b.reshape(1, out_ch))
            in_ch = out_ch

        # Static per-layer geometry for the fused stride-1 path.
        self._fusable = all(s == 1 for s in self.stride)
        if self._fusable:
            cfg = []
            h, w = obs_shape[1], obs_shape[2]
            cin = obs_shape[0]
            for i, k in enumerate(kernel_size):
                p = self.padding[i]
                hp, wp = h + 2 * p, w + 2 * p
                h_out, w_out = hp - k + 1, wp - k + 1
                L = (h_out - 1) * wp + w_out
                cout = hidden_size_list[i]
                cfg.append((k, p, hp, wp, h_out, w_out, L, cin, cout))
                h, w, cin = h_out, w_out, cout
            self._cfg = tuple(cfg)
            self._out_hw = (h, w)
            self._jit_fused = jax.jit(functools.partial(
                _fused_encoder_forward, cfg=self._cfg, out_hw=self._out_hw,
                compute_dtype=compute_dtype))

    def __call__(self, x_nchw):
        if self._fusable:
            return self._jit_fused(x_nchw, self.w_slabs, self.b_rows)
        # Stride > 1: per-layer fallback (NCHW -> NHWC -> convs -> NCHW).
        y = jnp.transpose(x_nchw, (0, 2, 3, 1))
        n_layers = len(self.params)
        for li, (w, b) in enumerate(self.params):
            y = _conv2d_im2col_pallas(y, w, b, self.stride[li], self.padding[li],
                                      apply_relu=li < n_layers - 1)
        return jnp.transpose(y, (0, 3, 1, 2))


# ---------------------------------------------------------------------------
# Pure-JAX reference (lax.conv) for correctness check.
# ---------------------------------------------------------------------------
def _ref_forward(x_nchw, params, strides, paddings):
    y = x_nchw
    n_layers = len(params)
    for li, (w, b) in enumerate(params):
        y = jax.lax.conv_general_dilated(
            y, w, (strides[li], strides[li]),
            [(paddings[li], paddings[li])] * 2,
            dimension_numbers=("NCHW", "OIHW", "NCHW"),
        ) + b[None, :, None, None]
        if li < n_layers - 1:
            y = jnp.maximum(y, 0.0)
    return y


if __name__ == "__main__":
    # Config mirrors the docstring example: obs [3,16,16] -> hidden [32,32,4],
    # 3x3 convs, stride 1, padding 1 => output spatial size preserved.
    obs_shape = [3, 16, 16]
    hidden_size_list = [32, 32, 4]
    kernel_size = [3, 3, 3]
    stride = [1, 1, 1]
    padding = [1, 1, 1]
    batch = 2

    root = jax.random.PRNGKey(0)
    xk, pk = jax.random.split(root)
    x = jax.random.normal(xk, (batch, *obs_shape), jnp.float32)   # NCHW, like PyTorch

    enc = BFSConvEncoderPallas(obs_shape, hidden_size_list, kernel_size, stride,
                               padding, key=pk)

    out = jax.block_until_ready(enc(x))
    assert out.shape == (batch, hidden_size_list[-1], obs_shape[1], obs_shape[2]), out.shape

    ref = jax.block_until_ready(_ref_forward(x, enc.params, stride, padding))
    np.testing.assert_allclose(np.asarray(out), np.asarray(ref), atol=2e-4, rtol=2e-4)

    print("KERNEL_OK")
</pallas_src>

<mosaic_0001>
module attributes {stable_mosaic.version = 11 : i64} {
  func.func @_fused_encoder_kernel(%arg0: i32, %arg1: memref<1x324x3xf32, #tpu.memory_space<vmem>>, %arg2: memref<9x3x32xf32, #tpu.memory_space<vmem>>, %arg3: memref<1x32xf32, #tpu.memory_space<vmem>>, %arg4: memref<9x32x32xf32, #tpu.memory_space<vmem>>, %arg5: memref<1x32xf32, #tpu.memory_space<vmem>>, %arg6: memref<9x32x4xf32, #tpu.memory_space<vmem>>, %arg7: memref<1x4xf32, #tpu.memory_space<vmem>>, %arg8: memref<1x256x4xf32, #tpu.memory_space<vmem>>, %arg9: memref<324x32xf32, #tpu.memory_space<vmem>>, %arg10: memref<324x32xf32, #tpu.memory_space<vmem>>) attributes {dimension_semantics = [#tpu.dimension_semantics<parallel>], iteration_bounds = array<i64: 2>, scalar_prefetch = 0 : i64, scratch_operands = 2 : i64, tpu.core_type = #tpu.core_type<tc>, window_params = [{transform_indices = @transform_0, window_bounds = array<i64: 1, 324, 3>}, {pipeline_mode = #tpu.pipeline_mode<synchronous>, transform_indices = @transform_1, window_bounds = array<i64: 9, 3, 32>}, {pipeline_mode = #tpu.pipeline_mode<synchronous>, transform_indices = @transform_2, window_bounds = array<i64: 1, 32>}, {pipeline_mode = #tpu.pipeline_mode<synchronous>, transform_indices = @transform_3, window_bounds = array<i64: 9, 32, 32>}, {pipeline_mode = #tpu.pipeline_mode<synchronous>, transform_indices = @transform_4, window_bounds = array<i64: 1, 32>}, {pipeline_mode = #tpu.pipeline_mode<synchronous>, transform_indices = @transform_5, window_bounds = array<i64: 9, 32, 4>}, {pipeline_mode = #tpu.pipeline_mode<synchronous>, transform_indices = @transform_6, window_bounds = array<i64: 1, 4>}, {transform_indices = @transform_7, window_bounds = array<i64: 1, 256, 4>}]} {
    %c0 = arith.constant 0 : index
    %c0_0 = arith.constant 0 : index
    %0 = vector.load %arg3[%c0, %c0_0] : memref<1x32xf32, #tpu.memory_space<vmem>>, vector<1x32xf32>
    %1 = vector.shape_cast %0 : vector<1x32xf32> to vector<1x32xf32>
    %2 = vector.broadcast %1 : vector<1x32xf32> to vector<286x32xf32>
    %c0_1 = arith.constant 0 : index
    %c0_2 = arith.constant 0 : index
    %c0_3 = arith.constant 0 : index
    %3 = vector.load %arg1[%c0_1, %c0_2, %c0_3] : memref<1x324x3xf32, #tpu.memory_space<vmem>>, vector<1x286x3xf32>
    %4 = vector.shape_cast %3 : vector<1x286x3xf32> to vector<286x3xf32>
    %c0_4 = arith.constant 0 : index
    %c0_5 = arith.constant 0 : index
    %c0_6 = arith.constant 0 : index
    %5 = vector.load %arg2[%c0_4, %c0_5, %c0_6] : memref<9x3x32xf32, #tpu.memory_space<vmem>>, vector<1x3x32xf32>
    %6 = vector.shape_cast %5 : vector<1x3x32xf32> to vector<3x32xf32>
    %cst = arith.constant dense<0.000000e+00> : vector<286x32xf32>
    %7 = tpu.matmul %4, %6, %cst {dimension_numbers = #tpu.dot_dimension_numbers<[1], [0], [0], [1], [0, 0, 1, 1], [], []>} : vector<286x3xf32>, vector<3x32xf32>, vector<286x32xf32> -> vector<286x32xf32>
    %8 = arith.addf %2, %7 : vector<286x32xf32>
    %c0_7 = arith.constant 0 : index
    %c1 = arith.constant 1 : index
    %c0_8 = arith.constant 0 : index
    %9 = vector.load %arg1[%c0_7, %c1, %c0_8] : memref<1x324x3xf32, #tpu.memory_space<vmem>>, vector<1x286x3xf32>
    %10 = vector.shape_cast %9 : vector<1x286x3xf32> to vector<286x3xf32>
    %c1_9 = arith.constant 1 : index
    %c0_10 = arith.constant 0 : index
    %c0_11 = arith.constant 0 : index
    %11 = vector.load %arg2[%c1_9, %c0_10, %c0_11] : memref<9x3x32xf32, #tpu.memory_space<vmem>>, vector<1x3x32xf32>
    %12 = vector.shape_cast %11 : vector<1x3x32xf32> to vector<3x32xf32>
    %cst_12 = arith.constant dense<0.000000e+00> : vector<286x32xf32>
    %13 = tpu.matmul %10, %12, %cst_12 {dimension_numbers = #tpu.dot_dimension_numbers<[1], [0], [0], [1], [0, 0, 1, 1], [], []>} : vector<286x3xf32>, vector<3x32xf32>, vector<286x32xf32> -> vector<286x32xf32>
    %14 = arith.addf %8, %13 : vector<286x32xf32>
    %c0_13 = arith.constant 0 : index
    %c2 = arith.constant 2 : index
    %c0_14 = arith.constant 0 : index
    %15 = vector.load %arg1[%c0_13, %c2, %c0_14] : memref<1x324x3xf32, #tpu.memory_space<vmem>>, vector<1x286x3xf32>
    %16 = vector.shape_cast %15 : vector<1x286x3xf32> to vector<286x3xf32>
    %c2_15 = arith.constant 2 : index
    %c0_16 = arith.constant 0 : index
    %c0_17 = arith.constant 0 : index
    %17 = vector.load %arg2[%c2_15, %c0_16, %c0_17] : memref<9x3x32xf32, #tpu.memory_space<vmem>>, vector<1x3x32xf32>
    %18 = vector.shape_cast %17 : vector<1x3x32xf32> to vector<3x32xf32>
    %cst_18 = arith.constant dense<0.000000e+00> : vector<286x32xf32>
    %19 = tpu.matmul %16, %18, %cst_18 {dimension_numbers = #tpu.dot_dimension_numbers<[1], [0], [0], [1], [0, 0, 1, 1], [], []>} : vector<286x3xf32>, vector<3x32xf32>, vector<286x32xf32> -> vector<286x32xf32>
    %20 = arith.addf %14, %19 : vector<286x32xf32>
    %c0_19 = arith.constant 0 : index
    %c18 = arith.constant 18 : index
    %c0_20 = arith.constant 0 : index
    %21 = vector.load %arg1[%c0_19, %c18, %c0_20] : memref<1x324x3xf32, #tpu.memory_space<vmem>>, vector<1x286x3xf32>
    %22 = vector.shape_cast %21 : vector<1x286x3xf32> to vector<286x3xf32>
    %c3 = arith.constant 3 : index
    %c0_21 = arith.constant 0 : index
    %c0_22 = arith.constant 0 : index
    %23 = vector.load %arg2[%c3, %c0_21, %c0_22] : memref<9x3x32xf32, #tpu.memory_space<vmem>>, vector<1x3x32xf32>
    %24 = vector.shape_cast %23 : vector<1x3x32xf32> to vector<3x32xf32>
    %cst_23 = arith.constant dense<0.000000e+00> : vector<286x32xf32>
    %25 = tpu.matmul %22, %24, %cst_23 {dimension_numbers = #tpu.dot_dimension_numbers<[1], [0], [0], [1], [0, 0, 1, 1], [], []>} : vector<286x3xf32>, vector<3x32xf32>, vector<286x32xf32> -> vector<286x32xf32>
    %26 = arith.addf %20, %25 : vector<286x32xf32>
    %c0_24 = arith.constant 0 : index
    %c19 = arith.constant 19 : index
    %c0_25 = arith.constant 0 : index
    %27 = vector.load %arg1[%c0_24, %c19, %c0_25] : memref<1x324x3xf32, #tpu.memory_space<vmem>>, vector<1x286x3xf32>
    %28 = vector.shape_cast %27 : vector<1x286x3xf32> to vector<286x3xf32>
    %c4 = arith.constant 4 : index
    %c0_26 = arith.constant 0 : index
    %c0_27 = arith.constant 0 : index
    %29 = vector.load %arg2[%c4, %c0_26, %c0_27] : memref<9x3x32xf32, #tpu.memory_space<vmem>>, vector<1x3x32xf32>
    %30 = vector.shape_cast %29 : vector<1x3x32xf32> to vector<3x32xf32>
    %cst_28 = arith.constant dense<0.000000e+00> : vector<286x32xf32>
    %31 = tpu.matmul %28, %30, %cst_28 {dimension_numbers = #tpu.dot_dimension_numbers<[1], [0], [0], [1], [0, 0, 1, 1], [], []>} : vector<286x3xf32>, vector<3x32xf32>, vector<286x32xf32> -> vector<286x32xf32>
    %32 = arith.addf %26, %31 : vector<286x32xf32>
    %c0_29 = arith.constant 0 : index
    %c20 = arith.constant 20 : index
    %c0_30 = arith.constant 0 : index
    %33 = vector.load %arg1[%c0_29, %c20, %c0_30] : memref<1x324x3xf32, #tpu.memory_space<vmem>>, vector<1x286x3xf32>
    %34 = vector.shape_cast %33 : vector<1x286x3xf32> to vector<286x3xf32>
    %c5 = arith.constant 5 : index
    %c0_31 = arith.constant 0 : index
    %c0_32 = arith.constant 0 : index
    %35 = vector.load %arg2[%c5, %c0_31, %c0_32] : memref<9x3x32xf32, #tpu.memory_space<vmem>>, vector<1x3x32xf32>
    %36 = vector.shape_cast %35 : vector<1x3x32xf32> to vector<3x32xf32>
    %cst_33 = arith.constant dense<0.000000e+00> : vector<286x32xf32>
    %37 = tpu.matmul %34, %36, %cst_33 {dimension_numbers = #tpu.dot_dimension_numbers<[1], [0], [0], [1], [0, 0, 1, 1], [], []>} : vector<286x3xf32>, vector<3x32xf32>, vector<286x32xf32> -> vector<286x32xf32>
    %38 = arith.addf %32, %37 : vector<286x32xf32>
    %c0_34 = arith.constant 0 : index
    %c36 = arith.constant 36 : index
    %c0_35 = arith.constant 0 : index
    %39 = vector.load %arg1[%c0_34, %c36, %c0_35] : memref<1x324x3xf32, #tpu.memory_space<vmem>>, vector<1x286x3xf32>
    %40 = vector.shape_cast %39 : vector<1x286x3xf32> to vector<286x3xf32>
    %c6 = arith.constant 6 : index
    %c0_36 = arith.constant 0 : index
    %c0_37 = arith.constant 0 : index
    %41 = vector.load %arg2[%c6, %c0_36, %c0_37] : memref<9x3x32xf32, #tpu.memory_space<vmem>>, vector<1x3x32xf32>
    %42 = vector.shape_cast %41 : vector<1x3x32xf32> to vector<3x32xf32>
    %cst_38 = arith.constant dense<0.000000e+00> : vector<286x32xf32>
    %43 = tpu.matmul %40, %42, %cst_38 {dimension_numbers = #tpu.dot_dimension_numbers<[1], [0], [0], [1], [0, 0, 1, 1], [], []>} : vector<286x3xf32>, vector<3x32xf32>, vector<286x32xf32> -> vector<286x32xf32>
    %44 = arith.addf %38, %43 : vector<286x32xf32>
    %c0_39 = arith.constant 0 : index
    %c37 = arith.constant 37 : index
    %c0_40 = arith.constant 0 : index
    %45 = vector.load %arg1[%c0_39, %c37, %c0_40] : memref<1x324x3xf32, #tpu.memory_space<vmem>>, vector<1x286x3xf32>
    %46 = vector.shape_cast %45 : vector<1x286x3xf32> to vector<286x3xf32>
    %c7 = arith.constant 7 : index
    %c0_41 = arith.constant 0 : index
    %c0_42 = arith.constant 0 : index
    %47 = vector.load %arg2[%c7, %c0_41, %c0_42] : memref<9x3x32xf32, #tpu.memory_space<vmem>>, vector<1x3x32xf32>
    %48 = vector.shape_cast %47 : vector<1x3x32xf32> to vector<3x32xf32>
    %cst_43 = arith.constant dense<0.000000e+00> : vector<286x32xf32>
    %49 = tpu.matmul %46, %48, %cst_43 {dimension_numbers = #tpu.dot_dimension_numbers<[1], [0], [0], [1], [0, 0, 1, 1], [], []>} : vector<286x3xf32>, vector<3x32xf32>, vector<286x32xf32> -> vector<286x32xf32>
    %50 = arith.addf %44, %49 : vector<286x32xf32>
    %c0_44 = arith.constant 0 : index
    %c38 = arith.constant 38 : index
    %c0_45 = arith.constant 0 : index
    %51 = vector.load %arg1[%c0_44, %c38, %c0_45] : memref<1x324x3xf32, #tpu.memory_space<vmem>>, vector<1x286x3xf32>
    %52 = vector.shape_cast %51 : vector<1x286x3xf32> to vector<286x3xf32>
    %c8 = arith.constant 8 : index
    %c0_46 = arith.constant 0 : index
    %c0_47 = arith.constant 0 : index
    %53 = vector.load %arg2[%c8, %c0_46, %c0_47] : memref<9x3x32xf32, #tpu.memory_space<vmem>>, vector<1x3x32xf32>
    %54 = vector.shape_cast %53 : vector<1x3x32xf32> to vector<3x32xf32>
    %cst_48 = arith.constant dense<0.000000e+00> : vector<286x32xf32>
    %55 = tpu.matmul %52, %54, %cst_48 {dimension_numbers = #tpu.dot_dimension_numbers<[1], [0], [0], [1], [0, 0, 1, 1], [], []>} : vector<286x3xf32>, vector<3x32xf32>, vector<286x32xf32> -> vector<286x32xf32>
    %56 = arith.addf %50, %55 : vector<286x32xf32>
    %cst_49 = arith.constant 0.000000e+00 : f32
    %57 = vector.broadcast %cst_49 : f32 to vector<286x32xf32>
    %58 = arith.maximumf %56, %57 : vector<286x32xf32>
    %cst_50 = arith.constant 0.000000e+00 : f32
    %59 = vector.broadcast %cst_50 : f32 to vector<324x32xf32>
    %c0_51 = arith.constant 0 : index
    %c0_52 = arith.constant 0 : index
    %60 = vector.load %arg9[%c0_51, %c0_52] : memref<324x32xf32, #tpu.memory_space<vmem>>, vector<324x32xf32>
    tpu.vector_store %arg9[%c0_51, %c0_52], %59 {strides = array<i32>} : memref<324x32xf32, #tpu.memory_space<vmem>>, vector<324x32xf32>,
    %61 = vector.extract_strided_slice %58 {offsets = [0, 0], sizes = [16, 32], strides = [1, 1]} : vector<286x32xf32> to vector<16x32xf32>
    %c19_53 = arith.constant 19 : index
    %c0_54 = arith.constant 0 : index
    %62 = vector.load %arg9[%c19_53, %c0_54] : memref<324x32xf32, #tpu.memory_space<vmem>>, vector<16x32xf32>
    tpu.vector_store %arg9[%c19_53, %c0_54], %61 {strides = array<i32>} : memref<324x32xf32, #tpu.memory_space<vmem>>, vector<16x32xf32>,
    %63 = vector.extract_strided_slice %58 {offsets = [18, 0], sizes = [16, 32], strides = [1, 1]} : vector<286x32xf32> to vector<16x32xf32>
    %c37_55 = arith.constant 37 : index
    %c0_56 = arith.constant 0 : index
    %64 = vector.load %arg9[%c37_55, %c0_56] : memref<324x32xf32, #tpu.memory_space<vmem>>, vector<16x32xf32>
    tpu.vector_store %arg9[%c37_55, %c0_56], %63 {strides = array<i32>} : memref<324x32xf32, #tpu.memory_space<vmem>>, vector<16x32xf32>,
    %65 = vector.extract_strided_slice %58 {offsets = [36, 0], sizes = [16, 32], strides = [1, 1]} : vector<286x32xf32> to vector<16x32xf32>
    %c55 = arith.constant 55 : index
    %c0_57 = arith.constant 0 : index
    %66 = vector.load %arg9[%c55, %c0_57] : memref<324x32xf32, #tpu.memory_space<vmem>>, vector<16x32xf32>
    tpu.vector_store %arg9[%c55, %c0_57], %65 {strides = array<i32>} : memref<324x32xf32, #tpu.memory_space<vmem>>, vector<16x32xf32>,
    %67 = vector.extract_strided_slice %58 {offsets = [54, 0], sizes = [16, 32], strides = [1, 1]} : vector<286x32xf32> to vector<16x32xf32>
    %c73 = arith.constant 73 : index
    %c0_58 = arith.constant 0 : index
    %68 = vector.load %arg9[%c73, %c0_58] : memref<324x32xf32, #tpu.memory_space<vmem>>, vector<16x32xf32>
    tpu.vector_store %arg9[%c73, %c0_58], %67 {strides = array<i32>} : memref<324x32xf32, #tpu.memory_space<vmem>>, vector<16x32xf32>,
    %69 = vector.extract_strided_slice %58 {offsets = [72, 0], sizes = [16, 32], strides = [1, 1]} : vector<286x32xf32> to vector<16x32xf32>
    %c91 = arith.constant 91 : index
    %c0_59 = arith.constant 0 : index
    %70 = vector.load %arg9[%c91, %c0_59] : memref<324x32xf32, #tpu.memory_space<vmem>>, vector<16x32xf32>
    tpu.vector_store %arg9[%c91, %c0_59], %69 {strides = array<i32>} : memref<324x32xf32, #tpu.memory_space<vmem>>, vector<16x32xf32>,
    %71 = vector.extract_strided_slice %58 {offsets = [90, 0], sizes = [16, 32], strides = [1, 1]} : vector<286x32xf32> to vector<16x32xf32>
    %c109 = arith.constant 109 : index
    %c0_60 = arith.constant 0 : index
    %72 = vector.load %arg9[%c109, %c0_60] : memref<324x32xf32, #tpu.memory_space<vmem>>, vector<16x32xf32>
    tpu.vector_store %arg9[%c109, %c0_60], %71 {strides = array<i32>} : memref<324x32xf32, #tpu.memory_space<vmem>>, vector<16x32xf32>,
    %73 = vector.extract_strided_slice %58 {offsets = [108, 0], sizes = [16, 32], strides = [1, 1]} : vector<286x32xf32> to vector<16x32xf32>
    %c127 = arith.constant 127 : index
    %c0_61 = arith.constant 0 : index
    %74 = vector.load %arg9[%c127, %c0_61] : memref<324x32xf32, #tpu.memory_space<vmem>>, vector<16x32xf32>
    tpu.vector_store %arg9[%c127, %c0_61], %73 {strides = array<i32>} : memref<324x32xf32, #tpu.memory_space<vmem>>, vector<16x32xf32>,
    %75 = vector.extract_strided_slice %58 {offsets = [126, 0], sizes = [16, 32], strides = [1, 1]} : vector<286x32xf32> to vector<16x32xf32>
    %c145 = arith.constant 145 : index
    %c0_62 = arith.constant 0 : index
    %76 = vector.load %arg9[%c145, %c0_62] : memref<324x32xf32, #tpu.memory_space<vmem>>, vector<16x32xf32>
    tpu.vector_store %arg9[%c145, %c0_62], %75 {strides = array<i32>} : memref<324x32xf32, #tpu.memory_space<vmem>>, vector<16x32xf32>,
    %77 = vector.extract_strided_slice %58 {offsets = [144, 0], sizes = [16, 32], strides = [1, 1]} : vector<286x32xf32> to vector<16x32xf32>
    %c163 = arith.constant 163 : index
    %c0_63 = arith.constant 0 : index
    %78 = vector.load %arg9[%c163, %c0_63] : memref<324x32xf32, #tpu.memory_space<vmem>>, vector<16x32xf32>
    tpu.vector_store %arg9[%c163, %c0_63], %77 {strides = array<i32>} : memref<324x32xf32, #tpu.memory_space<vmem>>, vector<16x32xf32>,
    %79 = vector.extract_strided_slice %58 {offsets = [162, 0], sizes = [16, 32], strides = [1, 1]} : vector<286x32xf32> to vector<16x32xf32>
    %c181 = arith.constant 181 : index
    %c0_64 = arith.constant 0 : index
    %80 = vector.load %arg9[%c181, %c0_64] : memref<324x32xf32, #tpu.memory_space<vmem>>, vector<16x32xf32>
    tpu.vector_store %arg9[%c181, %c0_64], %79 {strides = array<i32>} : memref<324x32xf32, #tpu.memory_space<vmem>>, vector<16x32xf32>,
    %81 = vector.extract_strided_slice %58 {offsets = [180, 0], sizes = [16, 32], strides = [1, 1]} : vector<286x32xf32> to vector<16x32xf32>
    %c199 = arith.constant 199 : index
    %c0_65 = arith.constant 0 : index
    %82 = vector.load %arg9[%c199, %c0_65] : memref<324x32xf32, #tpu.memory_space<vmem>>, vector<16x32xf32>
    tpu.vector_store %arg9[%c199, %c0_65], %81 {strides = array<i32>} : memref<324x32xf32, #tpu.memory_space<vmem>>, vector<16x32xf32>,
    %83 = vector.extract_strided_slice %58 {offsets = [198, 0], sizes = [16, 32], strides = [1, 1]} : vector<286x32xf32> to vector<16x32xf32>
    %c217 = arith.constant 217 : index
    %c0_66 = arith.constant 0 : index
    %84 = vector.load %arg9[%c217, %c0_66] : memref<324x32xf32, #tpu.memory_space<vmem>>, vector<16x32xf32>
    tpu.vector_store %arg9[%c217, %c0_66], %83 {strides = array<i32>} : memref<324x32xf32, #tpu.memory_space<vmem>>, vector<16x32xf32>,
    %85 = vector.extract_strided_slice %58 {offsets = [216, 0], sizes = [16, 32], strides = [1, 1]} : vector<286x32xf32> to vector<16x32xf32>
    %c235 = arith.constant 235 : index
    %c0_67 = arith.constant 0 : index
    %86 = vector.load %arg9[%c235, %c0_67] : memref<324x32xf32, #tpu.memory_space<vmem>>, vector<16x32xf32>
    tpu.vector_store %arg9[%c235, %c0_67], %85 {strides = array<i32>} : memref<324x32xf32, #tpu.memory_space<vmem>>, vector<16x32xf32>,
    %87 = vector.extract_strided_slice %58 {offsets = [234, 0], sizes = [16, 32], strides = [1, 1]} : vector<286x32xf32> to vector<16x32xf32>
    %c253 = arith.constant 253 : index
    %c0_68 = arith.constant 0 : index
    %88 = vector.load %arg9[%c253, %c0_68] : memref<324x32xf32, #tpu.memory_space<vmem>>, vector<16x32xf32>
    tpu.vector_store %arg9[%c253, %c0_68], %87 {strides = array<i32>} : memref<324x32xf32, #tpu.memory_space<vmem>>, vector<16x32xf32>,
    %89 = vector.extract_strided_slice %58 {offsets = [252, 0], sizes = [16, 32], strides = [1, 1]} : vector<286x32xf32> to vector<16x32xf32>
    %c271 = arith.constant 271 : index
    %c0_69 = arith.constant 0 : index
    %90 = vector.load %arg9[%c271, %c0_69] : memref<324x32xf32, #tpu.memory_space<vmem>>, vector<16x32xf32>
    tpu.vector_store %arg9[%c271, %c0_69], %89 {strides = array<i32>} : memref<324x32xf32, #tpu.memory_space<vmem>>, vector<16x32xf32>,
    %91 = vector.extract_strided_slice %58 {offsets = [270, 0], sizes = [16, 32], strides = [1, 1]} : vector<286x32xf32> to vector<16x32xf32>
    %c289 = arith.constant 289 : index
    %c0_70 = arith.constant 0 : index
    %92 = vector.load %arg9[%c289, %c0_70] : memref<324x32xf32, #tpu.memory_space<vmem>>, vector<16x32xf32>
    tpu.vector_store %arg9[%c289, %c0_70], %91 {strides = array<i32>} : memref<324x32xf32, #tpu.memory_space<vmem>>, vector<16x32xf32>,
    %c0_71 = arith.constant 0 : index
    %c0_72 = arith.constant 0 : index
    %93 = vector.load %arg5[%c0_71, %c0_72] : memref<1x32xf32, #tpu.memory_space<vmem>>, vector<1x32xf32>
    %94 = vector.shape_cast %93 : vector<1x32xf32> to vector<1x32xf32>
    %95 = vector.broadcast %94 : vector<1x32xf32> to vector<286x32xf32>
    %c0_73 = arith.constant 0 : index
    %c0_74 = arith.constant 0 : index
    %96 = vector.load %arg9[%c0_73, %c0_74] : memref<324x32xf32, #tpu.memory_space<vmem>>, vector<286x32xf32>
    %c0_75 = arith.constant 0 : index
    %c0_76 = arith.constant 0 : index
    %c0_77 = arith.constant 0 : index
    %97 = vector.load %arg4[%c0_75, %c0_76, %c0_77] : memref<9x32x32xf32, #tpu.memory_space<vmem>>, vector<1x32x32xf32>
    %98 = vector.shape_cast %97 : vector<1x32x32xf32> to vector<32x32xf32>
    %cst_78 = arith.constant dense<0.000000e+00> : vector<286x32xf32>
    %99 = tpu.matmul %96, %98, %cst_78 {dimension_numbers = #tpu.dot_dimension_numbers<[1], [0], [0], [1], [0, 0, 1, 1], [], []>} : vector<286x32xf32>, vector<32x32xf32>, vector<286x32xf32> -> vector<286x32xf32>
    %100 = arith.addf %95, %99 : vector<286x32xf32>
    %c1_79 = arith.constant 1 : index
    %c0_80 = arith.constant 0 : index
    %101 = vector.load %arg9[%c1_79, %c0_80] : memref<324x32xf32, #tpu.memory_space<vmem>>, vector<286x32xf32>
    %c1_81 = arith.constant 1 : index
    %c0_82 = arith.constant 0 : index
    %c0_83 = arith.constant 0 : index
    %102 = vector.load %arg4[%c1_81, %c0_82, %c0_83] : memref<9x32x32xf32, #tpu.memory_space<vmem>>, vector<1x32x32xf32>
    %103 = vector.shape_cast %102 : vector<1x32x32xf32> to vector<32x32xf32>
    %cst_84 = arith.constant dense<0.000000e+00> : vector<286x32xf32>
    %104 = tpu.matmul %101, %103, %cst_84 {dimension_numbers = #tpu.dot_dimension_numbers<[1], [0], [0], [1], [0, 0, 1, 1], [], []>} : vector<286x32xf32>, vector<32x32xf32>, vector<286x32xf32> -> vector<286x32xf32>
    %105 = arith.addf %100, %104 : vector<286x32xf32>
    %c2_85 = arith.constant 2 : index
    %c0_86 = arith.constant 0 : index
    %106 = vector.load %arg9[%c2_85, %c0_86] : memref<324x32xf32, #tpu.memory_space<vmem>>, vector<286x32xf32>
    %c2_87 = arith.constant 2 : index
    %c0_88 = arith.constant 0 : index
    %c0_89 = arith.constant 0 : index
    %107 = vector.load %arg4[%c2_87, %c0_88, %c0_89] : memref<9x32x32xf32, #tpu.memory_space<vmem>>, vector<1x32x32xf32>
    %108 = vector.shape_cast %107 : vector<1x32x32xf32> to vector<32x32xf32>
    %cst_90 = arith.constant dense<0.000000e+00> : vector<286x32xf32>
    %109 = tpu.matmul %106, %108, %cst_90 {dimension_numbers = #tpu.dot_dimension_numbers<[1], [0], [0], [1], [0, 0, 1, 1], [], []>} : vector<286x32xf32>, vector<32x32xf32>, vector<286x32xf32> -> vector<286x32xf32>
    %110 = arith.addf %105, %109 : vector<286x32xf32>
    %c18_91 = arith.constant 18 : index
    %c0_92 = arith.constant 0 : index
    %111 = vector.load %arg9[%c18_91, %c0_92] : memref<324x32xf32, #tpu.memory_space<vmem>>, vector<286x32xf32>
    %c3_93 = arith.constant 3 : index
    %c0_94 = arith.constant 0 : index
    %c0_95 = arith.constant 0 : index
    %112 = vector.load %arg4[%c3_93, %c0_94, %c0_95] : memref<9x32x32xf32, #tpu.memory_space<vmem>>, vector<1x32x32xf32>
    %113 = vector.shape_cast %112 : vector<1x32x32xf32> to vector<32x32xf32>
    %cst_96 = arith.constant dense<0.000000e+00> : vector<286x32xf32>
    %114 = tpu.matmul %111, %113, %cst_96 {dimension_numbers = #tpu.dot_dimension_numbers<[1], [0], [0], [1], [0, 0, 1, 1], [], []>} : vector<286x32xf32>, vector<32x32xf32>, vector<286x32xf32> -> vector<286x32xf32>
    %115 = arith.addf %110, %114 : vector<286x32xf32>
    %c19_97 = arith.constant 19 : index
    %c0_98 = arith.constant 0 : index
    %116 = vector.load %arg9[%c19_97, %c0_98] : memref<324x32xf32, #tpu.memory_space<vmem>>, vector<286x32xf32>
    %c4_99 = arith.constant 4 : index
    %c0_100 = arith.constant 0 : index
    %c0_101 = arith.constant 0 : index
    %117 = vector.load %arg4[%c4_99, %c0_100, %c0_101] : memref<9x32x32xf32, #tpu.memory_space<vmem>>, vector<1x32x32xf32>
    %118 = vector.shape_cast %117 : vector<1x32x32xf32> to vector<32x32xf32>
    %cst_102 = arith.constant dense<0.000000e+00> : vector<286x32xf32>
    %119 = tpu.matmul %116, %118, %cst_102 {dimension_numbers = #tpu.dot_dimension_numbers<[1], [0], [0], [1], [0, 0, 1, 1], [], []>} : vector<286x32xf32>, vector<32x32xf32>, vector<286x32xf32> -> vector<286x32xf32>
    %120 = arith.addf %115, %119 : vector<286x32xf32>
    %c20_103 = arith.constant 20 : index
    %c0_104 = arith.constant 0 : index
    %121 = vector.load %arg9[%c20_103, %c0_104] : memref<324x32xf32, #tpu.memory_space<vmem>>, vector<286x32xf32>
    %c5_105 = arith.constant 5 : index
    %c0_106 = arith.constant 0 : index
    %c0_107 = arith.constant 0 : index
    %122 = vector.load %arg4[%c5_105, %c0_106, %c0_107] : memref<9x32x32xf32, #tpu.memory_space<vmem>>, vector<1x32x32xf32>
    %123 = vector.shape_cast %122 : vector<1x32x32xf32> to vector<32x32xf32>
    %cst_108 = arith.constant dense<0.000000e+00> : vector<286x32xf32>
    %124 = tpu.matmul %121, %123, %cst_108 {dimension_numbers = #tpu.dot_dimension_numbers<[1], [0], [0], [1], [0, 0, 1, 1], [], []>} : vector<286x32xf32>, vector<32x32xf32>, vector<286x32xf32> -> vector<286x32xf32>
    %125 = arith.addf %120, %124 : vector<286x32xf32>
    %c36_109 = arith.constant 36 : index
    %c0_110 = arith.constant 0 : index
    %126 = vector.load %arg9[%c36_109, %c0_110] : memref<324x32xf32, #tpu.memory_space<vmem>>, vector<286x32xf32>
    %c6_111 = arith.constant 6 : index
    %c0_112 = arith.constant 0 : index
    %c0_113 = arith.constant 0 : index
    %127 = vector.load %arg4[%c6_111, %c0_112, %c0_113] : memref<9x32x32xf32, #tpu.memory_space<vmem>>, vector<1x32x32xf32>
    %128 = vector.shape_cast %127 : vector<1x32x32xf32> to vector<32x32xf32>
    %cst_114 = arith.constant dense<0.000000e+00> : vector<286x32xf32>
    %129 = tpu.matmul %126, %128, %cst_114 {dimension_numbers = #tpu.dot_dimension_numbers<[1], [0], [0], [1], [0, 0, 1, 1], [], []>} : vector<286x32xf32>, vector<32x32xf32>, vector<286x32xf32> -> vector<286x32xf32>
    %130 = arith.addf %125, %129 : vector<286x32xf32>
    %c37_115 = arith.constant 37 : index
    %c0_116 = arith.constant 0 : index
    %131 = vector.load %arg9[%c37_115, %c0_116] : memref<324x32xf32, #tpu.memory_space<vmem>>, vector<286x32xf32>
    %c7_117 = arith.constant 7 : index
    %c0_118 = arith.constant 0 : index
    %c0_119 = arith.constant 0 : index
    %132 = vector.load %arg4[%c7_117, %c0_118, %c0_119] : memref<9x32x32xf32, #tpu.memory_space<vmem>>, vector<1x32x32xf32>
    %133 = vector.shape_cast %132 : vector<1x32x32xf32> to vector<32x32xf32>
    %cst_120 = arith.constant dense<0.000000e+00> : vector<286x32xf32>
    %134 = tpu.matmul %131, %133, %cst_120 {dimension_numbers = #tpu.dot_dimension_numbers<[1], [0], [0], [1], [0, 0, 1, 1], [], []>} : vector<286x32xf32>, vector<32x32xf32>, vector<286x32xf32> -> vector<286x32xf32>
    %135 = arith.addf %130, %134 : vector<286x32xf32>
    %c38_121 = arith.constant 38 : index
    %c0_122 = arith.constant 0 : index
    %136 = vector.load %arg9[%c38_121, %c0_122] : memref<324x32xf32, #tpu.memory_space<vmem>>, vector<286x32xf32>
    %c8_123 = arith.constant 8 : index
    %c0_124 = arith.constant 0 : index
    %c0_125 = arith.constant 0 : index
    %137 = vector.load %arg4[%c8_123, %c0_124, %c0_125] : memref<9x32x32xf32, #tpu.memory_space<vmem>>, vector<1x32x32xf32>
    %138 = vector.shape_cast %137 : vector<1x32x32xf32> to vector<32x32xf32>
    %cst_126 = arith.constant dense<0.000000e+00> : vector<286x32xf32>
    %139 = tpu.matmul %136, %138, %cst_126 {dimension_numbers = #tpu.dot_dimension_numbers<[1], [0], [0], [1], [0, 0, 1, 1], [], []>} : vector<286x32xf32>, vector<32x32xf32>, vector<286x32xf32> -> vector<286x32xf32>
    %140 = arith.addf %135, %139 : vector<286x32xf32>
    %cst_127 = arith.constant 0.000000e+00 : f32
    %141 = vector.broadcast %cst_127 : f32 to vector<286x32xf32>
    %142 = arith.maximumf %140, %141 : vector<286x32xf32>
    %cst_128 = arith.constant 0.000000e+00 : f32
    %143 = vector.broadcast %cst_128 : f32 to vector<324x32xf32>
    %c0_129 = arith.constant 0 : index
    %c0_130 = arith.constant 0 : index
    %144 = vector.load %arg10[%c0_129, %c0_130] : memref<324x32xf32, #tpu.memory_space<vmem>>, vector<324x32xf32>
    tpu.vector_store %arg10[%c0_129, %c0_130], %143 {strides = array<i32>} : memref<324x32xf32, #tpu.memory_space<vmem>>, vector<324x32xf32>,
    %145 = vector.extract_strided_slice %142 {offsets = [0, 0], sizes = [16, 32], strides = [1, 1]} : vector<286x32xf32> to vector<16x32xf32>
    %c19_131 = arith.constant 19 : index
    %c0_132 = arith.constant 0 : index
    %146 = vector.load %arg10[%c19_131, %c0_132] : memref<324x32xf32, #tpu.memory_space<vmem>>, vector<16x32xf32>
    tpu.vector_store %arg10[%c19_131, %c0_132], %145 {strides = array<i32>} : memref<324x32xf32, #tpu.memory_space<vmem>>, vector<16x32xf32>,
    %147 = vector.extract_strided_slice %142 {offsets = [18, 0], sizes = [16, 32], strides = [1, 1]} : vector<286x32xf32> to vector<16x32xf32>
    %c37_133 = arith.constant 37 : index
    %c0_134 = arith.constant 0 : index
    %148 = vector.load %arg10[%c37_133, %c0_134] : memref<324x32xf32, #tpu.memory_space<vmem>>, vector<16x32xf32>
    tpu.vector_store %arg10[%c37_133, %c0_134], %147 {strides = array<i32>} : memref<324x32xf32, #tpu.memory_space<vmem>>, vector<16x32xf32>,
    %149 = vector.extract_strided_slice %142 {offsets = [36, 0], sizes = [16, 32], strides = [1, 1]} : vector<286x32xf32> to vector<16x32xf32>
    %c55_135 = arith.constant 55 : index
    %c0_136 = arith.constant 0 : index
    %150 = vector.load %arg10[%c55_135, %c0_136] : memref<324x32xf32, #tpu.memory_space<vmem>>, vector<16x32xf32>
    tpu.vector_store %arg10[%c55_135, %c0_136], %149 {strides = array<i32>} : memref<324x32xf32, #tpu.memory_space<vmem>>, vector<16x32xf32>,
    %151 = vector.extract_strided_slice %142 {offsets = [54, 0], sizes = [16, 32], strides = [1, 1]} : vector<286x32xf32> to vector<16x32xf32>
    %c73_137 = arith.constant 73 : index
    %c0_138 = arith.constant 0 : index
    %152 = vector.load %arg10[%c73_137, %c0_138] : memref<324x32xf32, #tpu.memory_space<vmem>>, vector<16x32xf32>
    tpu.vector_store %arg10[%c73_137, %c0_138], %151 {strides = array<i32>} : memref<324x32xf32, #tpu.memory_space<vmem>>, vector<16x32xf32>,
    %153 = vector.extract_strided_slice %142 {offsets = [72, 0], sizes = [16, 32], strides = [1, 1]} : vector<286x32xf32> to vector<16x32xf32>
    %c91_139 = arith.constant 91 : index
    %c0_140 = arith.constant 0 : index
    %154 = vector.load %arg10[%c91_139, %c0_140] : memref<324x32xf32, #tpu.memory_space<vmem>>, vector<16x32xf32>
    tpu.vector_store %arg10[%c91_139, %c0_140], %153 {strides = array<i32>} : memref<324x32xf32, #tpu.memory_space<vmem>>, vector<16x32xf32>,
    %155 = vector.extract_strided_slice %142 {offsets = [90, 0], sizes = [16, 32], strides = [1, 1]} : vector<286x32xf32> to vector<16x32xf32>
    %c109_141 = arith.constant 109 : index
    %c0_142 = arith.constant 0 : index
    %156 = vector.load %arg10[%c109_141, %c0_142] : memref<324x32xf32, #tpu.memory_space<vmem>>, vector<16x32xf32>
    tpu.vector_store %arg10[%c109_141, %c0_142], %155 {strides = array<i32>} : memref<324x32xf32, #tpu.memory_space<vmem>>, vector<16x32xf32>,
    %157 = vector.extract_strided_slice %142 {offsets = [108, 0], sizes = [16, 32], strides = [1, 1]} : vector<286x32xf32> to vector<16x32xf32>
    %c127_143 = arith.constant 127 : index
    %c0_144 = arith.constant 0 : index
    %158 = vector.load %arg10[%c127_143, %c0_144] : memref<324x32xf32, #tpu.memory_space<vmem>>, vector<16x32xf32>
    tpu.vector_store %arg10[%c127_143, %c0_144], %157 {strides = array<i32>} : memref<324x32xf32, #tpu.memory_space<vmem>>, vector<16x32xf32>,
    %159 = vector.extract_strided_slice %142 {offsets = [126, 0], sizes = [16, 32], strides = [1, 1]} : vector<286x32xf32> to vector<16x32xf32>
    %c145_145 = arith.constant 145 : index
    %c0_146 = arith.constant 0 : index
    %160 = vector.load %arg10[%c145_145, %c0_146] : memref<324x32xf32, #tpu.memory_space<vmem>>, vector<16x32xf32>
    tpu.vector_store %arg10[%c145_145, %c0_146], %159 {strides = array<i32>} : memref<324x32xf32, #tpu.memory_space<vmem>>, vector<16x32xf32>,
    %161 = vector.extract_strided_slice %142 {offsets = [144, 0], sizes = [16, 32], strides = [1, 1]} : vector<286x32xf32> to vector<16x32xf32>
    %c163_147 = arith.constant 163 : index
    %c0_148 = arith.constant 0 : index
    %162 = vector.load %arg10[%c163_147, %c0_148] : memref<324x32xf32, #tpu.memory_space<vmem>>, vector<16x32xf32>
    tpu.vector_store %arg10[%c163_147, %c0_148], %161 {strides = array<i32>} : memref<324x32xf32, #tpu.memory_space<vmem>>, vector<16x32xf32>,
    %163 = vector.extract_strided_slice %142 {offsets = [162, 0], sizes = [16, 32], strides = [1, 1]} : vector<286x32xf32> to vector<16x32xf32>
    %c181_149 = arith.constant 181 : index
    %c0_150 = arith.constant 0 : index
    %164 = vector.load %arg10[%c181_149, %c0_150] : memref<324x32xf32, #tpu.memory_space<vmem>>, vector<16x32xf32>
    tpu.vector_store %arg10[%c181_149, %c0_150], %163 {strides = array<i32>} : memref<324x32xf32, #tpu.memory_space<vmem>>, vector<16x32xf32>,
    %165 = vector.extract_strided_slice %142 {offsets = [180, 0], sizes = [16, 32], strides = [1, 1]} : vector<286x32xf32> to vector<16x32xf32>
    %c199_151 = arith.constant 199 : index
    %c0_152 = arith.constant 0 : index
    %166 = vector.load %arg10[%c199_151, %c0_152] : memref<324x32xf32, #tpu.memory_space<vmem>>, vector<16x32xf32>
    tpu.vector_store %arg10[%c199_151, %c0_152], %165 {strides = array<i32>} : memref<324x32xf32, #tpu.memory_space<vmem>>, vector<16x32xf32>,
    %167 = vector.extract_strided_slice %142 {offsets = [198, 0], sizes = [16, 32], strides = [1, 1]} : vector<286x32xf32> to vector<16x32xf32>
    %c217_153 = arith.constant 217 : index
    %c0_154 = arith.constant 0 : index
    %168 = vector.load %arg10[%c217_153, %c0_154] : memref<324x32xf32, #tpu.memory_space<vmem>>, vector<16x32xf32>
    tpu.vector_store %arg10[%c217_153, %c0_154], %167 {strides = array<i32>} : memref<324x32xf32, #tpu.memory_space<vmem>>, vector<16x32xf32>,
    %169 = vector.extract_strided_slice %142 {offsets = [216, 0], sizes = [16, 32], strides = [1, 1]} : vector<286x32xf32> to vector<16x32xf32>
    %c235_155 = arith.constant 235 : index
    %c0_156 = arith.constant 0 : index
    %170 = vector.load %arg10[%c235_155, %c0_156] : memref<324x32xf32, #tpu.memory_space<vmem>>, vector<16x32xf32>
    tpu.vector_store %arg10[%c235_155, %c0_156], %169 {strides = array<i32>} : memref<324x32xf32, #tpu.memory_space<vmem>>, vector<16x32xf32>,
    %171 = vector.extract_strided_slice %142 {offsets = [234, 0], sizes = [16, 32], strides = [1, 1]} : vector<286x32xf32> to vector<16x32xf32>
    %c253_157 = arith.constant 253 : index
    %c0_158 = arith.constant 0 : index
    %172 = vector.load %arg10[%c253_157, %c0_158] : memref<324x32xf32, #tpu.memory_space<vmem>>, vector<16x32xf32>
    tpu.vector_store %arg10[%c253_157, %c0_158], %171 {strides = array<i32>} : memref<324x32xf32, #tpu.memory_space<vmem>>, vector<16x32xf32>,
    %173 = vector.extract_strided_slice %142 {offsets = [252, 0], sizes = [16, 32], strides = [1, 1]} : vector<286x32xf32> to vector<16x32xf32>
    %c271_159 = arith.constant 271 : index
    %c0_160 = arith.constant 0 : index
    %174 = vector.load %arg10[%c271_159, %c0_160] : memref<324x32xf32, #tpu.memory_space<vmem>>, vector<16x32xf32>
    tpu.vector_store %arg10[%c271_159, %c0_160], %173 {strides = array<i32>} : memref<324x32xf32, #tpu.memory_space<vmem>>, vector<16x32xf32>,
    %175 = vector.extract_strided_slice %142 {offsets = [270, 0], sizes = [16, 32], strides = [1, 1]} : vector<286x32xf32> to vector<16x32xf32>
    %c289_161 = arith.constant 289 : index
    %c0_162 = arith.constant 0 : index
    %176 = vector.load %arg10[%c289_161, %c0_162] : memref<324x32xf32, #tpu.memory_space<vmem>>, vector<16x32xf32>
    tpu.vector_store %arg10[%c289_161, %c0_162], %175 {strides = array<i32>} : memref<324x32xf32, #tpu.memory_space<vmem>>, vector<16x32xf32>,
    %c0_163 = arith.constant 0 : index
    %c0_164 = arith.constant 0 : index
    %177 = vector.load %arg7[%c0_163, %c0_164] : memref<1x4xf32, #tpu.memory_space<vmem>>, vector<1x4xf32>
    %178 = vector.shape_cast %177 : vector<1x4xf32> to vector<1x4xf32>
    %179 = vector.broadcast %178 : vector<1x4xf32> to vector<286x4xf32>
    %c0_165 = arith.constant 0 : index
    %c0_166 = arith.constant 0 : index
    %180 = vector.load %arg10[%c0_165, %c0_166] : memref<324x32xf32, #tpu.memory_space<vmem>>, vector<286x32xf32>
    %c0_167 = arith.constant 0 : index
    %c0_168 = arith.constant 0 : index
    %c0_169 = arith.constant 0 : index
    %181 = vector.load %arg6[%c0_167, %c0_168, %c0_169] : memref<9x32x4xf32, #tpu.memory_space<vmem>>, vector<1x32x4xf32>
    %182 = vector.shape_cast %181 : vector<1x32x4xf32> to vector<32x4xf32>
    %cst_170 = arith.constant dense<0.000000e+00> : vector<286x4xf32>
    %183 = tpu.matmul %180, %182, %cst_170 {dimension_numbers = #tpu.dot_dimension_numbers<[1], [0], [0], [1], [0, 0, 1, 1], [], []>} : vector<286x32xf32>, vector<32x4xf32>, vector<286x4xf32> -> vector<286x4xf32>
    %184 = arith.addf %179, %183 : vector<286x4xf32>
    %c1_171 = arith.constant 1 : index
    %c0_172 = arith.constant 0 : index
    %185 = vector.load %arg10[%c1_171, %c0_172] : memref<324x32xf32, #tpu.memory_space<vmem>>, vector<286x32xf32>
    %c1_173 = arith.constant 1 : index
    %c0_174 = arith.constant 0 : index
    %c0_175 = arith.constant 0 : index
    %186 = vector.load %arg6[%c1_173, %c0_174, %c0_175] : memref<9x32x4xf32, #tpu.memory_space<vmem>>, vector<1x32x4xf32>
    %187 = vector.shape_cast %186 : vector<1x32x4xf32> to vector<32x4xf32>
    %cst_176 = arith.constant dense<0.000000e+00> : vector<286x4xf32>
    %188 = tpu.matmul %185, %187, %cst_176 {dimension_numbers = #tpu.dot_dimension_numbers<[1], [0], [0], [1], [0, 0, 1, 1], [], []>} : vector<286x32xf32>, vector<32x4xf32>, vector<286x4xf32> -> vector<286x4xf32>
    %189 = arith.addf %184, %188 : vector<286x4xf32>
    %c2_177 = arith.constant 2 : index
    %c0_178 = arith.constant 0 : index
    %190 = vector.load %arg10[%c2_177, %c0_178] : memref<324x32xf32, #tpu.memory_space<vmem>>, vector<286x32xf32>
    %c2_179 = arith.constant 2 : index
    %c0_180 = arith.constant 0 : index
    %c0_181 = arith.constant 0 : index
    %191 = vector.load %arg6[%c2_179, %c0_180, %c0_181] : memref<9x32x4xf32, #tpu.memory_space<vmem>>, vector<1x32x4xf32>
    %192 = vector.shape_cast %191 : vector<1x32x4xf32> to vector<32x4xf32>
    %cst_182 = arith.constant dense<0.000000e+00> : vector<286x4xf32>
    %193 = tpu.matmul %190, %192, %cst_182 {dimension_numbers = #tpu.dot_dimension_numbers<[1], [0], [0], [1], [0, 0, 1, 1], [], []>} : vector<286x32xf32>, vector<32x4xf32>, vector<286x4xf32> -> vector<286x4xf32>
    %194 = arith.addf %189, %193 : vector<286x4xf32>
    %c18_183 = arith.constant 18 : index
    %c0_184 = arith.constant 0 : index
    %195 = vector.load %arg10[%c18_183, %c0_184] : memref<324x32xf32, #tpu.memory_space<vmem>>, vector<286x32xf32>
    %c3_185 = arith.constant 3 : index
    %c0_186 = arith.constant 0 : index
    %c0_187 = arith.constant 0 : index
    %196 = vector.load %arg6[%c3_185, %c0_186, %c0_187] : memref<9x32x4xf32, #tpu.memory_space<vmem>>, vector<1x32x4xf32>
    %197 = vector.shape_cast %196 : vector<1x32x4xf32> to vector<32x4xf32>
    %cst_188 = arith.constant dense<0.000000e+00> : vector<286x4xf32>
    %198 = tpu.matmul %195, %197, %cst_188 {dimension_numbers = #tpu.dot_dimension_numbers<[1], [0], [0], [1], [0, 0, 1, 1], [], []>} : vector<286x32xf32>, vector<32x4xf32>, vector<286x4xf32> -> vector<286x4xf32>
    %199 = arith.addf %194, %198 : vector<286x4xf32>
    %c19_189 = arith.constant 19 : index
    %c0_190 = arith.constant 0 : index
    %200 = vector.load %arg10[%c19_189, %c0_190] : memref<324x32xf32, #tpu.memory_space<vmem>>, vector<286x32xf32>
    %c4_191 = arith.constant 4 : index
    %c0_192 = arith.constant 0 : index
    %c0_193 = arith.constant 0 : index
    %201 = vector.load %arg6[%c4_191, %c0_192, %c0_193] : memref<9x32x4xf32, #tpu.memory_space<vmem>>, vector<1x32x4xf32>
    %202 = vector.shape_cast %201 : vector<1x32x4xf32> to vector<32x4xf32>
    %cst_194 = arith.constant dense<0.000000e+00> : vector<286x4xf32>
    %203 = tpu.matmul %200, %202, %cst_194 {dimension_numbers = #tpu.dot_dimension_numbers<[1], [0], [0], [1], [0, 0, 1, 1], [], []>} : vector<286x32xf32>, vector<32x4xf32>, vector<286x4xf32> -> vector<286x4xf32>
    %204 = arith.addf %199, %203 : vector<286x4xf32>
    %c20_195 = arith.constant 20 : index
    %c0_196 = arith.constant 0 : index
    %205 = vector.load %arg10[%c20_195, %c0_196] : memref<324x32xf32, #tpu.memory_space<vmem>>, vector<286x32xf32>
    %c5_197 = arith.constant 5 : index
    %c0_198 = arith.constant 0 : index
    %c0_199 = arith.constant 0 : index
    %206 = vector.load %arg6[%c5_197, %c0_198, %c0_199] : memref<9x32x4xf32, #tpu.memory_space<vmem>>, vector<1x32x4xf32>
    %207 = vector.shape_cast %206 : vector<1x32x4xf32> to vector<32x4xf32>
    %cst_200 = arith.constant dense<0.000000e+00> : vector<286x4xf32>
    %208 = tpu.matmul %205, %207, %cst_200 {dimension_numbers = #tpu.dot_dimension_numbers<[1], [0], [0], [1], [0, 0, 1, 1], [], []>} : vector<286x32xf32>, vector<32x4xf32>, vector<286x4xf32> -> vector<286x4xf32>
    %209 = arith.addf %204, %208 : vector<286x4xf32>
    %c36_201 = arith.constant 36 : index
    %c0_202 = arith.constant 0 : index
    %210 = vector.load %arg10[%c36_201, %c0_202] : memref<324x32xf32, #tpu.memory_space<vmem>>, vector<286x32xf32>
    %c6_203 = arith.constant 6 : index
    %c0_204 = arith.constant 0 : index
    %c0_205 = arith.constant 0 : index
    %211 = vector.load %arg6[%c6_203, %c0_204, %c0_205] : memref<9x32x4xf32, #tpu.memory_space<vmem>>, vector<1x32x4xf32>
    %212 = vector.shape_cast %211 : vector<1x32x4xf32> to vector<32x4xf32>
    %cst_206 = arith.constant dense<0.000000e+00> : vector<286x4xf32>
    %213 = tpu.matmul %210, %212, %cst_206 {dimension_numbers = #tpu.dot_dimension_numbers<[1], [0], [0], [1], [0, 0, 1, 1], [], []>} : vector<286x32xf32>, vector<32x4xf32>, vector<286x4xf32> -> vector<286x4xf32>
    %214 = arith.addf %209, %213 : vector<286x4xf32>
    %c37_207 = arith.constant 37 : index
    %c0_208 = arith.constant 0 : index
    %215 = vector.load %arg10[%c37_207, %c0_208] : memref<324x32xf32, #tpu.memory_space<vmem>>, vector<286x32xf32>
    %c7_209 = arith.constant 7 : index
    %c0_210 = arith.constant 0 : index
    %c0_211 = arith.constant 0 : index
    %216 = vector.load %arg6[%c7_209, %c0_210, %c0_211] : memref<9x32x4xf32, #tpu.memory_space<vmem>>, vector<1x32x4xf32>
    %217 = vector.shape_cast %216 : vector<1x32x4xf32> to vector<32x4xf32>
    %cst_212 = arith.constant dense<0.000000e+00> : vector<286x4xf32>
    %218 = tpu.matmul %215, %217, %cst_212 {dimension_numbers = #tpu.dot_dimension_numbers<[1], [0], [0], [1], [0, 0, 1, 1], [], []>} : vector<286x32xf32>, vector<32x4xf32>, vector<286x4xf32> -> vector<286x4xf32>
    %219 = arith.addf %214, %218 : vector<286x4xf32>
    %c38_213 = arith.constant 38 : index
    %c0_214 = arith.constant 0 : index
    %220 = vector.load %arg10[%c38_213, %c0_214] : memref<324x32xf32, #tpu.memory_space<vmem>>, vector<286x32xf32>
    %c8_215 = arith.constant 8 : index
    %c0_216 = arith.constant 0 : index
    %c0_217 = arith.constant 0 : index
    %221 = vector.load %arg6[%c8_215, %c0_216, %c0_217] : memref<9x32x4xf32, #tpu.memory_space<vmem>>, vector<1x32x4xf32>
    %222 = vector.shape_cast %221 : vector<1x32x4xf32> to vector<32x4xf32>
    %cst_218 = arith.constant dense<0.000000e+00> : vector<286x4xf32>
    %223 = tpu.matmul %220, %222, %cst_218 {dimension_numbers = #tpu.dot_dimension_numbers<[1], [0], [0], [1], [0, 0, 1, 1], [], []>} : vector<286x32xf32>, vector<32x4xf32>, vector<286x4xf32> -> vector<286x4xf32>
    %224 = arith.addf %219, %223 : vector<286x4xf32>
    %225 = vector.extract_strided_slice %224 {offsets = [0, 0], sizes = [16, 4], strides = [1, 1]} : vector<286x4xf32> to vector<16x4xf32>
    %c0_219 = arith.constant 0 : index
    %c0_220 = arith.constant 0 : index
    %c0_221 = arith.constant 0 : index
    %226 = vector.load %arg8[%c0_219, %c0_220, %c0_221] : memref<1x256x4xf32, #tpu.memory_space<vmem>>, vector<1x16x4xf32>
    %227 = vector.shape_cast %226 : vector<1x16x4xf32> to vector<16x4xf32>
    %228 = vector.shape_cast %225 : vector<16x4xf32> to vector<1x16x4xf32>
    tpu.vector_store %arg8[%c0_219, %c0_220, %c0_221], %228 {strides = array<i32>} : memref<1x256x4xf32, #tpu.memory_space<vmem>>, vector<1x16x4xf32>,
    %229 = vector.extract_strided_slice %224 {offsets = [18, 0], sizes = [16, 4], strides = [1, 1]} : vector<286x4xf32> to vector<16x4xf32>
    %c0_222 = arith.constant 0 : index
    %c16 = arith.constant 16 : index
    %c0_223 = arith.constant 0 : index
    %230 = vector.load %arg8[%c0_222, %c16, %c0_223] : memref<1x256x4xf32, #tpu.memory_space<vmem>>, vector<1x16x4xf32>
    %231 = vector.shape_cast %230 : vector<1x16x4xf32> to vector<16x4xf32>
    %232 = vector.shape_cast %229 : vector<16x4xf32> to vector<1x16x4xf32>
    tpu.vector_store %arg8[%c0_222, %c16, %c0_223], %232 {strides = array<i32>} : memref<1x256x4xf32, #tpu.memory_space<vmem>>, vector<1x16x4xf32>,
    %233 = vector.extract_strided_slice %224 {offsets = [36, 0], sizes = [16, 4], strides = [1, 1]} : vector<286x4xf32> to vector<16x4xf32>
    %c0_224 = arith.constant 0 : index
    %c32 = arith.constant 32 : index
    %c0_225 = arith.constant 0 : index
    %234 = vector.load %arg8[%c0_224, %c32, %c0_225] : memref<1x256x4xf32, #tpu.memory_space<vmem>>, vector<1x16x4xf32>
    %235 = vector.shape_cast %234 : vector<1x16x4xf32> to vector<16x4xf32>
    %236 = vector.shape_cast %233 : vector<16x4xf32> to vector<1x16x4xf32>
    tpu.vector_store %arg8[%c0_224, %c32, %c0_225], %236 {strides = array<i32>} : memref<1x256x4xf32, #tpu.memory_space<vmem>>, vector<1x16x4xf32>,
    %237 = vector.extract_strided_slice %224 {offsets = [54, 0], sizes = [16, 4], strides = [1, 1]} : vector<286x4xf32> to vector<16x4xf32>
    %c0_226 = arith.constant 0 : index
    %c48 = arith.constant 48 : index
    %c0_227 = arith.constant 0 : index
    %238 = vector.load %arg8[%c0_226, %c48, %c0_227] : memref<1x256x4xf32, #tpu.memory_space<vmem>>, vector<1x16x4xf32>
    %239 = vector.shape_cast %238 : vector<1x16x4xf32> to vector<16x4xf32>
    %240 = vector.shape_cast %237 : vector<16x4xf32> to vector<1x16x4xf32>
    tpu.vector_store %arg8[%c0_226, %c48, %c0_227], %240 {strides = array<i32>} : memref<1x256x4xf32, #tpu.memory_space<vmem>>, vector<1x16x4xf32>,
    %241 = vector.extract_strided_slice %224 {offsets = [72, 0], sizes = [16, 4], strides = [1, 1]} : vector<286x4xf32> to vector<16x4xf32>
    %c0_228 = arith.constant 0 : index
    %c64 = arith.constant 64 : index
    %c0_229 = arith.constant 0 : index
    %242 = vector.load %arg8[%c0_228, %c64, %c0_229] : memref<1x256x4xf32, #tpu.memory_space<vmem>>, vector<1x16x4xf32>
    %243 = vector.shape_cast %242 : vector<1x16x4xf32> to vector<16x4xf32>
    %244 = vector.shape_cast %241 : vector<16x4xf32> to vector<1x16x4xf32>
    tpu.vector_store %arg8[%c0_228, %c64, %c0_229], %244 {strides = array<i32>} : memref<1x256x4xf32, #tpu.memory_space<vmem>>, vector<1x16x4xf32>,
    %245 = vector.extract_strided_slice %224 {offsets = [90, 0], sizes = [16, 4], strides = [1, 1]} : vector<286x4xf32> to vector<16x4xf32>
    %c0_230 = arith.constant 0 : index
    %c80 = arith.constant 80 : index
    %c0_231 = arith.constant 0 : index
    %246 = vector.load %arg8[%c0_230, %c80, %c0_231] : memref<1x256x4xf32, #tpu.memory_space<vmem>>, vector<1x16x4xf32>
    %247 = vector.shape_cast %246 : vector<1x16x4xf32> to vector<16x4xf32>
    %248 = vector.shape_cast %245 : vector<16x4xf32> to vector<1x16x4xf32>
    tpu.vector_store %arg8[%c0_230, %c80, %c0_231], %248 {strides = array<i32>} : memref<1x256x4xf32, #tpu.memory_space<vmem>>, vector<1x16x4xf32>,
    %249 = vector.extract_strided_slice %224 {offsets = [108, 0], sizes = [16, 4], strides = [1, 1]} : vector<286x4xf32> to vector<16x4xf32>
    %c0_232 = arith.constant 0 : index
    %c96 = arith.constant 96 : index
    %c0_233 = arith.constant 0 : index
    %250 = vector.load %arg8[%c0_232, %c96, %c0_233] : memref<1x256x4xf32, #tpu.memory_space<vmem>>, vector<1x16x4xf32>
    %251 = vector.shape_cast %250 : vector<1x16x4xf32> to vector<16x4xf32>
    %252 = vector.shape_cast %249 : vector<16x4xf32> to vector<1x16x4xf32>
    tpu.vector_store %arg8[%c0_232, %c96, %c0_233], %252 {strides = array<i32>} : memref<1x256x4xf32, #tpu.memory_space<vmem>>, vector<1x16x4xf32>,
    %253 = vector.extract_strided_slice %224 {offsets = [126, 0], sizes = [16, 4], strides = [1, 1]} : vector<286x4xf32> to vector<16x4xf32>
    %c0_234 = arith.constant 0 : index
    %c112 = arith.constant 112 : index
    %c0_235 = arith.constant 0 : index
    %254 = vector.load %arg8[%c0_234, %c112, %c0_235] : memref<1x256x4xf32, #tpu.memory_space<vmem>>, vector<1x16x4xf32>
    %255 = vector.shape_cast %254 : vector<1x16x4xf32> to vector<16x4xf32>
    %256 = vector.shape_cast %253 : vector<16x4xf32> to vector<1x16x4xf32>
    tpu.vector_store %arg8[%c0_234, %c112, %c0_235], %256 {strides = array<i32>} : memref<1x256x4xf32, #tpu.memory_space<vmem>>, vector<1x16x4xf32>,
    %257 = vector.extract_strided_slice %224 {offsets = [144, 0], sizes = [16, 4], strides = [1, 1]} : vector<286x4xf32> to vector<16x4xf32>
    %c0_236 = arith.constant 0 : index
    %c128 = arith.constant 128 : index
    %c0_237 = arith.constant 0 : index
    %258 = vector.load %arg8[%c0_236, %c128, %c0_237] : memref<1x256x4xf32, #tpu.memory_space<vmem>>, vector<1x16x4xf32>
    %259 = vector.shape_cast %258 : vector<1x16x4xf32> to vector<16x4xf32>
    %260 = vector.shape_cast %257 : vector<16x4xf32> to vector<1x16x4xf32>
    tpu.vector_store %arg8[%c0_236, %c128, %c0_237], %260 {strides = array<i32>} : memref<1x256x4xf32, #tpu.memory_space<vmem>>, vector<1x16x4xf32>,
    %261 = vector.extract_strided_slice %224 {offsets = [162, 0], sizes = [16, 4], strides = [1, 1]} : vector<286x4xf32> to vector<16x4xf32>
    %c0_238 = arith.constant 0 : index
    %c144 = arith.constant 144 : index
    %c0_239 = arith.constant 0 : index
    %262 = vector.load %arg8[%c0_238, %c144, %c0_239] : memref<1x256x4xf32, #tpu.memory_space<vmem>>, vector<1x16x4xf32>
    %263 = vector.shape_cast %262 : vector<1x16x4xf32> to vector<16x4xf32>
    %264 = vector.shape_cast %261 : vector<16x4xf32> to vector<1x16x4xf32>
    tpu.vector_store %arg8[%c0_238, %c144, %c0_239], %264 {strides = array<i32>} : memref<1x256x4xf32, #tpu.memory_space<vmem>>, vector<1x16x4xf32>,
    %265 = vector.extract_strided_slice %224 {offsets = [180, 0], sizes = [16, 4], strides = [1, 1]} : vector<286x4xf32> to vector<16x4xf32>
    %c0_240 = arith.constant 0 : index
    %c160 = arith.constant 160 : index
    %c0_241 = arith.constant 0 : index
    %266 = vector.load %arg8[%c0_240, %c160, %c0_241] : memref<1x256x4xf32, #tpu.memory_space<vmem>>, vector<1x16x4xf32>
    %267 = vector.shape_cast %266 : vector<1x16x4xf32> to vector<16x4xf32>
    %268 = vector.shape_cast %265 : vector<16x4xf32> to vector<1x16x4xf32>
    tpu.vector_store %arg8[%c0_240, %c160, %c0_241], %268 {strides = array<i32>} : memref<1x256x4xf32, #tpu.memory_space<vmem>>, vector<1x16x4xf32>,
    %269 = vector.extract_strided_slice %224 {offsets = [198, 0], sizes = [16, 4], strides = [1, 1]} : vector<286x4xf32> to vector<16x4xf32>
    %c0_242 = arith.constant 0 : index
    %c176 = arith.constant 176 : index
    %c0_243 = arith.constant 0 : index
    %270 = vector.load %arg8[%c0_242, %c176, %c0_243] : memref<1x256x4xf32, #tpu.memory_space<vmem>>, vector<1x16x4xf32>
    %271 = vector.shape_cast %270 : vector<1x16x4xf32> to vector<16x4xf32>
    %272 = vector.shape_cast %269 : vector<16x4xf32> to vector<1x16x4xf32>
    tpu.vector_store %arg8[%c0_242, %c176, %c0_243], %272 {strides = array<i32>} : memref<1x256x4xf32, #tpu.memory_space<vmem>>, vector<1x16x4xf32>,
    %273 = vector.extract_strided_slice %224 {offsets = [216, 0], sizes = [16, 4], strides = [1, 1]} : vector<286x4xf32> to vector<16x4xf32>
    %c0_244 = arith.constant 0 : index
    %c192 = arith.constant 192 : index
    %c0_245 = arith.constant 0 : index
    %274 = vector.load %arg8[%c0_244, %c192, %c0_245] : memref<1x256x4xf32, #tpu.memory_space<vmem>>, vector<1x16x4xf32>
    %275 = vector.shape_cast %274 : vector<1x16x4xf32> to vector<16x4xf32>
    %276 = vector.shape_cast %273 : vector<16x4xf32> to vector<1x16x4xf32>
    tpu.vector_store %arg8[%c0_244, %c192, %c0_245], %276 {strides = array<i32>} : memref<1x256x4xf32, #tpu.memory_space<vmem>>, vector<1x16x4xf32>,
    %277 = vector.extract_strided_slice %224 {offsets = [234, 0], sizes = [16, 4], strides = [1, 1]} : vector<286x4xf32> to vector<16x4xf32>
    %c0_246 = arith.constant 0 : index
    %c208 = arith.constant 208 : index
    %c0_247 = arith.constant 0 : index
    %278 = vector.load %arg8[%c0_246, %c208, %c0_247] : memref<1x256x4xf32, #tpu.memory_space<vmem>>, vector<1x16x4xf32>
    %279 = vector.shape_cast %278 : vector<1x16x4xf32> to vector<16x4xf32>
    %280 = vector.shape_cast %277 : vector<16x4xf32> to vector<1x16x4xf32>
    tpu.vector_store %arg8[%c0_246, %c208, %c0_247], %280 {strides = array<i32>} : memref<1x256x4xf32, #tpu.memory_space<vmem>>, vector<1x16x4xf32>,
    %281 = vector.extract_strided_slice %224 {offsets = [252, 0], sizes = [16, 4], strides = [1, 1]} : vector<286x4xf32> to vector<16x4xf32>
    %c0_248 = arith.constant 0 : index
    %c224 = arith.constant 224 : index
    %c0_249 = arith.constant 0 : index
    %282 = vector.load %arg8[%c0_248, %c224, %c0_249] : memref<1x256x4xf32, #tpu.memory_space<vmem>>, vector<1x16x4xf32>
    %283 = vector.shape_cast %282 : vector<1x16x4xf32> to vector<16x4xf32>
    %284 = vector.shape_cast %281 : vector<16x4xf32> to vector<1x16x4xf32>
    tpu.vector_store %arg8[%c0_248, %c224, %c0_249], %284 {strides = array<i32>} : memref<1x256x4xf32, #tpu.memory_space<vmem>>, vector<1x16x4xf32>,
    %285 = vector.extract_strided_slice %224 {offsets = [270, 0], sizes = [16, 4], strides = [1, 1]} : vector<286x4xf32> to vector<16x4xf32>
    %c0_250 = arith.constant 0 : index
    %c240 = arith.constant 240 : index
    %c0_251 = arith.constant 0 : index
    %286 = vector.load %arg8[%c0_250, %c240, %c0_251] : memref<1x256x4xf32, #tpu.memory_space<vmem>>, vector<1x16x4xf32>
    %287 = vector.shape_cast %286 : vector<1x16x4xf32> to vector<16x4xf32>
    %288 = vector.shape_cast %285 : vector<16x4xf32> to vector<1x16x4xf32>
    tpu.vector_store %arg8[%c0_250, %c240, %c0_251], %288 {strides = array<i32>} : memref<1x256x4xf32, #tpu.memory_space<vmem>>, vector<1x16x4xf32>,
    return
  }
  func.func @transform_0(%arg0: i32) -> (i32, i32, i32) {
    %c0_i32 = arith.constant 0 : i32
    %c0_i32_0 = arith.constant 0 : i32
    %c0_i32_1 = arith.constant 0 : i32
    return %arg0, %c0_i32, %c0_i32_0 : i32, i32, i32
  }
  func.func @transform_1(%arg0: i32) -> (i32, i32, i32) {
    %c0_i32 = arith.constant 0 : i32
    %c0_i32_0 = arith.constant 0 : i32
    %c0_i32_1 = arith.constant 0 : i32
    %c0_i32_2 = arith.constant 0 : i32
    return %c0_i32, %c0_i32_0, %c0_i32_1 : i32, i32, i32
  }
  func.func @transform_2(%arg0: i32) -> (i32, i32) {
    %c0_i32 = arith.constant 0 : i32
    %c0_i32_0 = arith.constant 0 : i32
    %c0_i32_1 = arith.constant 0 : i32
    return %c0_i32, %c0_i32_0 : i32, i32
  }
  func.func @transform_3(%arg0: i32) -> (i32, i32, i32) {
    %c0_i32 = arith.constant 0 : i32
    %c0_i32_0 = arith.constant 0 : i32
    %c0_i32_1 = arith.constant 0 : i32
    %c0_i32_2 = arith.constant 0 : i32
    return %c0_i32, %c0_i32_0, %c0_i32_1 : i32, i32, i32
  }
  func.func @transform_4(%arg0: i32) -> (i32, i32) {
    %c0_i32 = arith.constant 0 : i32
    %c0_i32_0 = arith.constant 0 : i32
    %c0_i32_1 = arith.constant 0 : i32
    return %c0_i32, %c0_i32_0 : i32, i32
  }
  func.func @transform_5(%arg0: i32) -> (i32, i32, i32) {
    %c0_i32 = arith.constant 0 : i32
    %c0_i32_0 = arith.constant 0 : i32
    %c0_i32_1 = arith.constant 0 : i32
    %c0_i32_2 = arith.constant 0 : i32
    return %c0_i32, %c0_i32_0, %c0_i32_1 : i32, i32, i32
  }
  func.func @transform_6(%arg0: i32) -> (i32, i32) {
    %c0_i32 = arith.constant 0 : i32
    %c0_i32_0 = arith.constant 0 : i32
    %c0_i32_1 = arith.constant 0 : i32
    return %c0_i32, %c0_i32_0 : i32, i32
  }
  func.func @transform_7(%arg0: i32) -> (i32, i32, i32) {
    %c0_i32 = arith.constant 0 : i32
    %c0_i32_0 = arith.constant 0 : i32
    %c0_i32_1 = arith.constant 0 : i32
    return %arg0, %c0_i32, %c0_i32_0 : i32, i32, i32
  }
}

</mosaic_0001>

<bundles_post_ra>
// kernel: _fused_encoder_forward.1
= control target key start
LH: loop header
LB: loop body
LE: loop exit
PB: predicated region body
PF: predicated region fallthrough
CT: control target
= control target key end

     0   :  { %s17181_s24 = smov 0   ;;  %s19772_s0 = inlined_call_operand.vmem [shape: f32[2,324,3], index: 0, kind: input, shape index: {}]   ;;  %s19773_s1 = inlined_call_operand.vmem [shape: f32[9,3,32], index: 1, kind: input, shape index: {}]   ;;  %s19774_s2 = inlined_call_operand.vmem [shape: f32[1,32], index: 2, kind: input, shape index: {}]   ;;  %s19775_s3 = inlined_call_operand.vmem [shape: f32[9,32,32], index: 3, kind: input, shape index: {}]   ;;  %s19776_s4 = inlined_call_operand.vmem [shape: f32[1,32], index: 4, kind: input, shape index: {}]   ;;  %s19777_s5 = inlined_call_operand.vmem [shape: f32[9,32,4], index: 5, kind: input, shape index: {}]   ;;  %s19778_s6 = inlined_call_operand.vmem [shape: f32[1,4], index: 6, kind: input, shape index: {}]   ;;  %s19779_s7 = inlined_call_operand.vmem [shape: f32[2,256,4], index: 7, kind: output, shape index: {}]  }
   0x1 LB: > { %s12264_s25 = sadd.s32 4294967295, %s17138_s24   ;;  %p12268_p0 = scmp.ge.s32.totalorder %s17138_s24, 1  ;;  %s17138_s24 = sphi %s17181_s24, %s17_s24  }
   0x2   : > { %p237_p1 = scmp.lt.s32.totalorder %s17138_s24, 3 }
   0x4   : > { %p238_p2 = pnand %p12268_p0, %p237_p1 }
   0x5   : > { %v322_v0 = vld [vmem:[%s19773_s1] sm:$0x7] (!%p238_p2)  ;;  %vm432_vm0 = vcmask (!%p238_p2), 1042432   ;;  %v17195_v1 = vld [vmem:[%s19773_s1 + $0x10] sm:$0x7] (!%p238_p2)  ;;  %p269_p3 = scmp.lt.s32.totalorder (!%p238_p2), %s12264_s25, 1 }
   0x6   : > { %241 = sbr.rel (%p238_p2) target bundleno = 2155 (0x86b), region = 48  ;;  %14384 = vmatprep.subr.msk.mxu1 (!%p238_p2), %vm432_vm0, %v322_v0  ;;  %14608 = vmatprep.subr.msk.mxu0 (!%p238_p2), %vm432_vm0, %v17195_v1  ;;  %v12310_v2 = vld [vmem:[%s19773_s1 + $0x4] sm:$0x7] (!%p238_p2)  ;;  %v12462_v3 = vld [vmem:[%s19773_s1 + $0x14] sm:$0x7] (!%p238_p2)  ;;  %vm323_vm1 = vcmask (!%p238_p2), 23552  }
   0x7   : > { %14385 = vmatpush3.msk.msra.mxu1 (!%p238_p2), %vm432_vm0, %v322_v0  ;;  %14609 = vmatpush3.msk.msra.mxu0 (!%p238_p2), %vm432_vm0, %v17195_v1  ;;  %v17232_v10 = vld [vmem:[%s19773_s1 + $0x18] sm:$0x7] (!%p238_p2)  ;;  %v17237_v11 = vld [vmem:[%s19773_s1 + $0x8] sm:$0x7] (!%p238_p2)  ;;  %v17320_v48 = vld [vmem:[%s19773_s1 + $0x1c] sm:$0x7] (!%p238_p2) }
   0x8   : > { %14440 = vmatprep.subr.msk.mxu1 (!%p238_p2), %vm432_vm0, %v12310_v2  ;;  %14664 = vmatprep.subr.msk.mxu0 (!%p238_p2), %vm432_vm0, %v12462_v3  ;;  %vm4193_vm2 = vcmask (!%p238_p2), 261120   ;;  %vm4234_vm3 = vcmask (!%p238_p2), 257024   ;;  %vm4238_vm4 = vcmask (!%p238_p2), 261122   ;;  %vm4241_vm5 = vcmask (!%p238_p2), 254976  }
   0x9   : > { %vm4243_vm6 = vcmask (!%p238_p2), 261124   ;;  %vm4247_vm7 = vcmask (!%p238_p2), 261126   ;;  %vm4250_vm8 = vcmask (!%p238_p2), 259072   ;;  %vm12158_vm9 = vcmask (!%p238_p2), 31744  }
   0xa   : > { %vm12161_vm10 = vcmask (!%p238_p2), 31746   ;;  %vm12164_vm11 = vcmask (!%p238_p2), 25600   ;;  %vm12166_vm12 = vcmask (!%p238_p2), 31748   ;;  %vm12169_vm13 = vcmask (!%p238_p2), 27648  }
   0xb   : > { %vm12171_vm14 = vcmask (!%p238_p2), 31750   ;;  %vm12174_vm15 = vcmask (!%p238_p2), 29696  }
   0xd   : > { %s19781_s25 = smov (!%p269_p3, %s12264_s25), 1 }
   0xe   : > { %s17122_s11 = smul.u32 328, %s19781_s25  ;;  %s13330_s28 = sshll.u32 %s19781_s25, 8 }
   0xf   : > { %s19643_s10 = scalar_lea.vmem %s19779_s7, %s13330_s28 }
  0x10   : > { %s17217_s14 = scalar_lea.vmem %s19772_s0, %s17122_s11 }
  0x11   : > { %v286_v4 = vld [vmem:[%s17217_s14] sm:$0xff]  ;;  %v2007_v5 = vld [vmem:[%s17217_s14 + $0x13] sm:$0xff]  ;;  %v287_v6 = vld [vmem:[%s17217_s14 + $0x8] sm:$0xff] }
  0x12   : > { %14386 = vmatprep.mubr.msk.f32.mxu1 %vm323_vm1, %v286_v4  ;;  %14610 = vmatprep.mubr.msk.f32.mxu0 %vm323_vm1, %v2007_v5  ;;  %v2008_v7 = vld [vmem:[%s17217_s14 + $0x1b] sm:$0xff]  ;;  %v288_v8 = vld [vmem:[%s17217_s14 + $0x10] sm:$0xff]  ;;  %v2009_v9 = vld [vmem:[%s17217_s14 + $0x23] sm:$0xff] }
  0x13   : > { %14387 = vmatmul.mubr.msk.f32.vlgmr.msra.gmra.mrb[0].mxu1 %vm323_vm1, %v287_v6  ;;  %14611 = vmatmul.mubr.msk.f32.vlgmr.msra.gmra.mrb[0].mxu0 %vm323_vm1, %v2008_v7  ;;  %v289_v12 = vld [vmem:[%s17217_s14 + $0x18] sm:$0xff]  ;;  %v2010_v13 = vld [vmem:[%s17217_s14 + $0x2b] sm:$0xff]  ;;  %v290_v14 = vld [vmem:[%s17217_s14 + $0x20] sm:$0xff] }
  0x14   : > { %14441 = vmatpush3.msk.msra.mxu1 %vm432_vm0, %v12310_v2  ;;  %14665 = vmatpush3.msk.msra.mxu0 %vm432_vm0, %v12462_v3  ;;  %v2011_v15 = vld [vmem:[%s17217_s14 + $0x33] sm:$0xff]  ;;  %v291_v16 = vld [vmem:[%s17217_s14 + $0x28] sm:$0xff]  ;;  %v2012_v17 = vld [vmem:[%s17217_s14 + $0x3b] sm:$0xff] }
  0x15   : > { %14389 = vmatprep.mubr.msk.f32.mxu1 %vm323_vm1, %v288_v8  ;;  %14613 = vmatprep.mubr.msk.f32.mxu0 %vm323_vm1, %v2009_v9  ;;  %v292_v18 = vld [vmem:[%s17217_s14 + $0x30] sm:$0xff]  ;;  %v2013_v19 = vld [vmem:[%s17217_s14 + $0x43] sm:$0xff]  ;;  %v293_v20 = vld [vmem:[%s17217_s14 + $0x38] sm:$0xff] }
  0x16   : > { %14720 = vmatprep.subr.msk.mxu0 %vm432_vm0, %v17232_v10  ;;  %14496 = vmatprep.subr.msk.mxu1 %vm432_vm0, %v17237_v11  ;;  %v2014_v21 = vld [vmem:[%s17217_s14 + $0x4b] sm:$0xff]  ;;  %v294_v22 = vld [vmem:[%s17217_s14 + $0x40] sm:$0xff]  ;;  %v2015_v23 = vld [vmem:[%s17217_s14 + $0x53] sm:$0xff] }
  0x17   : > { %14390 = vmatmul.mubr.msk.f32.gmra.mrb[2].mxu1 %vm323_vm1, %v289_v12  ;;  %14614 = vmatmul.mubr.msk.f32.gmra.mrb[2].mxu0 %vm323_vm1, %v2010_v13  ;;  %v295_v24 = vld [vmem:[%s17217_s14 + $0x48] sm:$0xff]  ;;  %v2016_v25 = vld [vmem:[%s17217_s14 + $0x5b] sm:$0xff]  ;;  %v296_v26 = vld [vmem:[%s17217_s14 + $0x50] sm:$0xff] }
  0x18   : > { %14392 = vmatprep.mubr.msk.f32.mxu1 %vm323_vm1, %v290_v14  ;;  %14616 = vmatprep.mubr.msk.f32.mxu0 %vm323_vm1, %v2011_v15  ;;  %v2017_v27 = vld [vmem:[%s17217_s14 + $0x63] sm:$0xff]  ;;  %v297_v28 = vld [vmem:[%s17217_s14 + $0x58] sm:$0xff]  ;;  %v2018_v29 = vld [vmem:[%s17217_s14 + $0x6b] sm:$0xff] }
  0x19   : > { %v298_v30 = vld [vmem:[%s17217_s14 + $0x60] sm:$0xff]  ;;  %v2019_v31 = vld [vmem:[%s17217_s14 + $0x73] sm:$0xff]  ;;  %v299_v32 = vld [vmem:[%s17217_s14 + $0x68] sm:$0xff] }
  0x1a   : > { %v2020_v33 = vld [vmem:[%s17217_s14 + $0x7b] sm:$0xff]  ;;  %v300_v34 = vld [vmem:[%s17217_s14 + $0x70] sm:$0xff]  ;;  %v2021_v35 = vld [vmem:[%s17217_s14 + $0x83] sm:$0xff] }
  0x1b   : > { %14393 = vmatmul.mubr.msk.f32.gmra.mrb[4].mxu1 %vm323_vm1, %v291_v16  ;;  %14617 = vmatmul.mubr.msk.f32.gmra.mrb[4].mxu0 %vm323_vm1, %v2012_v17  ;;  %v301_v36 = vld [vmem:[%s17217_s14 + $0x78] sm:$0xff]  ;;  %v2022_v37 = vld [vmem:[%s17217_s14 + $0x8b] sm:$0xff]  ;;  %v302_v38 = vld [vmem:[%s17217_s14 + $0x80] sm:$0xff] }
  0x1c   : > { %14395 = vmatprep.mubr.msk.f32.mxu1 %vm323_vm1, %v292_v18  ;;  %14619 = vmatprep.mubr.msk.f32.mxu0 %vm323_vm1, %v2013_v19  ;;  %v2023_v39 = vld [vmem:[%s17217_s14 + $0x93] sm:$0xff]  ;;  %v303_v40 = vld [vmem:[%s17217_s14 + $0x88] sm:$0xff]  ;;  %v2024_v41 = vld [vmem:[%s17217_s14 + $0x9b] sm:$0xff] }
  0x1d   : > { %v304_v42 = vld [vmem:[%s17217_s14 + $0x90] sm:$0xff]  ;;  %v305_v44 = vld [vmem:[%s17217_s14 + $0x98] sm:$0xff]  ;;  %v306_v46 = vld [vmem:[%s17217_s14 + $0xa0] sm:$0xff] }
  0x1e   : > { %v2437_v43 = vld [vmem:[%s17217_s14 + $0x14] sm:$0xff]  ;;  %v2438_v45 = vld [vmem:[%s17217_s14 + $0x1c] sm:$0xff]  ;;  %v17315_v47 = vld [vmem:[%s17217_s14 + $0x24] sm:$0xff] }
  0x1f   : > { %14396 = vmatmul.mubr.msk.f32.gmra.mrb[6].mxu1 %vm323_vm1, %v293_v20  ;;  %14620 = vmatmul.mubr.msk.f32.gmra.mrb[6].mxu0 %vm323_vm1, %v2014_v21  ;;  %v307_v49 = vld [vmem:[%s17217_s14 + $0xa8] sm:$0xff]  ;;  %v308_v51 = vld [vmem:[%s17217_s14 + $0xb0] sm:$0xff]  ;;  %v309_v53 = vld [vmem:[%s17217_s14 + $0xb8] sm:$0xff] }
  0x20   : > { %14398 = vmatprep.mubr.msk.f32.mxu1 %vm323_vm1, %v294_v22  ;;  %14622 = vmatprep.mubr.msk.f32.mxu0 %vm323_vm1, %v2015_v23  ;;  %v17329_v50 = vld [vmem:[%s17217_s14 + $0x2c] sm:$0xff]  ;;  %v17335_v52 = vld [vmem:[%s17217_s14 + $0x34] sm:$0xff]  ;;  %v17347_v54 = vld [vmem:[%s17217_s14 + $0x3c] sm:$0xff] }
  0x21   : > { %v310_v55 = vld [vmem:[%s17217_s14 + $0xc0] sm:$0xff]  ;;  %v311_v57 = vld [vmem:[%s17217_s14 + $0xc8] sm:$0xff]  ;;  %v312_v59 = vld [vmem:[%s17217_s14 + $0xd0] sm:$0xff] }
  0x22   : > { %v17351_v56 = vld [vmem:[%s17217_s14 + $0x44] sm:$0xff]  ;;  %v17361_v58 = vld [vmem:[%s17217_s14 + $0x4c] sm:$0xff]  ;;  %v17365_v60 = vld [vmem:[%s17217_s14 + $0x54] sm:$0xff] }
  0x23   : > { %14399 = vmatmul.mubr.msk.f32.gmra.mrb[8].mxu1 %vm323_vm1, %v295_v24  ;;  %14623 = vmatmul.mubr.msk.f32.gmra.mrb[8].mxu0 %vm323_vm1, %v2016_v25  ;;  %v313_v61 = vld [vmem:[%s17217_s14 + $0xd8] sm:$0xff]  ;;  %v314_v63 = vld [vmem:[%s17217_s14 + $0xe0] sm:$0xff]  ;;  %v315_v2 = vld [vmem:[%s17217_s14 + $0xe8] sm:$0xff] }
  0x24   : > { %14401 = vmatprep.mubr.msk.f32.mxu1 %vm323_vm1, %v296_v26  ;;  %14625 = vmatprep.mubr.msk.f32.mxu0 %vm323_vm1, %v2017_v27  ;;  %v17375_v62 = vld [vmem:[%s17217_s14 + $0x5c] sm:$0xff]  ;;  %v17379_v0 = vld [vmem:[%s17217_s14 + $0x64] sm:$0xff]  ;;  %v17389_v3 = vld [vmem:[%s17217_s14 + $0x6c] sm:$0xff] }
  0x25   : > { %v316_v4 = vld [vmem:[%s17217_s14 + $0xf0] sm:$0xff]  ;;  %v317_v6 = vld [vmem:[%s17217_s14 + $0xf8] sm:$0xff]  ;;  %v318_v8 = vld [vmem:[%s17217_s14 + $0x100] sm:$0xff] }
  0x26   : > { %v17393_v5 = vld [vmem:[%s17217_s14 + $0x74] sm:$0xff]  ;;  %v17403_v7 = vld [vmem:[%s17217_s14 + $0x7c] sm:$0xff]  ;;  %v17407_v9 = vld [vmem:[%s17217_s14 + $0x84] sm:$0xff] }
  0x27   : > { %14402 = vmatmul.mubr.msk.f32.gmra.mrb[10].mxu1 %vm323_vm1, %v297_v28  ;;  %14626 = vmatmul.mubr.msk.f32.gmra.mrb[10].mxu0 %vm323_vm1, %v2018_v29  ;;  %v17417_v12 = vld [vmem:[%s17217_s14 + $0x8c] sm:$0xff]  ;;  %v17421_v14 = vld [vmem:[%s17217_s14 + $0x94] sm:$0xff]  ;;  %v17431_v16 = vld [vmem:[%s17217_s14 + $0x9c] sm:$0xff] }
  0x28   : > { %14404 = vmatprep.mubr.msk.f32.mxu1 %vm323_vm1, %v298_v30  ;;  %14628 = vmatprep.mubr.msk.f32.mxu0 %vm323_vm1, %v2019_v31  ;;  %v320_v13 = vld [vmem:[%s17217_s14 + $0x110] sm:$0xff]  ;;  %v321_v15 = vld [vmem:[%s17217_s14 + $0x118] sm:$0x3f]  ;;  %v717_v17 = vld [vmem:[%s17217_s14 + $0x1] sm:$0xff] }
  0x29   : > { %v17435_v18 = vld [vmem:[%s17217_s14 + $0xa4] sm:$0xff]  ;;  %v17445_v20 = vld [vmem:[%s17217_s14 + $0xac] sm:$0xff]  ;;  %v17449_v22 = vld [vmem:[%s17217_s14 + $0xb4] sm:$0xff] }
  0x2a   : > { %v718_v19 = vld [vmem:[%s17217_s14 + $0x9] sm:$0xff]  ;;  %v719_v21 = vld [vmem:[%s17217_s14 + $0x11] sm:$0xff]  ;;  %v720_v24 = vld [vmem:[%s17217_s14 + $0x19] sm:$0xff] }
  0x2b   : > { %14405 = vmatmul.mubr.msk.f32.gmra.mrb[12].mxu1 %vm323_vm1, %v299_v32  ;;  %14629 = vmatmul.mubr.msk.f32.gmra.mrb[12].mxu0 %vm323_vm1, %v2020_v33  ;;  %v17454_v23 = vld [vmem:[%s19773_s1 + $0xc] sm:$0x7]  ;;  %v17464_v25 = vld [vmem:[%s17217_s14 + $0xbc] sm:$0xff]  ;;  %v17470_v27 = vld [vmem:[%s17217_s14 + $0xc4] sm:$0xff] }
  0x2c   : > { %14407 = vmatprep.mubr.msk.f32.mxu1 %vm323_vm1, %v300_v34  ;;  %14631 = vmatprep.mubr.msk.f32.mxu0 %vm323_vm1, %v2021_v35  ;;  %v721_v26 = vld [vmem:[%s17217_s14 + $0x21] sm:$0xff]  ;;  %v17482_v28 = vld [vmem:[%s17217_s14 + $0xcc] sm:$0xff]  ;;  %v17486_v30 = vld [vmem:[%s17217_s14 + $0xd4] sm:$0xff] }
  0x2d   : > { %v723_v29 = vld [vmem:[%s17217_s14 + $0x31] sm:$0xff]  ;;  %v724_v31 = vld [vmem:[%s17217_s14 + $0x39] sm:$0xff]  ;;  %v725_v33 = vld [vmem:[%s17217_s14 + $0x41] sm:$0xff] }
  0x2e   : > { %v17496_v32 = vld [vmem:[%s17217_s14 + $0xdc] sm:$0xff]  ;;  %v17500_v34 = vld [vmem:[%s17217_s14 + $0xe4] sm:$0xff] }
  0x2f   : > { %14408 = vmatmul.mubr.msk.f32.gmra.mrb[14].mxu1 %vm323_vm1, %v301_v36  ;;  %14632 = vmatmul.mubr.msk.f32.gmra.mrb[14].mxu0 %vm323_vm1, %v2022_v37  ;;  %v726_v35 = vld [vmem:[%s17217_s14 + $0x49] sm:$0xff]  ;;  %v727_v37 = vld [vmem:[%s17217_s14 + $0x51] sm:$0xff] }
  0x30   : > { %14410 = vmatprep.mubr.msk.f32.mxu1 %vm323_vm1, %v302_v38  ;;  %14634 = vmatprep.mubr.msk.f32.mxu0 %vm323_vm1, %v2023_v39  ;;  %v17510_v36 = vld [vmem:[%s17217_s14 + $0xec] sm:$0xff]  ;;  %v17514_v38 = vld [vmem:[%s17217_s14 + $0xf4] sm:$0xff] }
  0x31   : > { %v728_v39 = vld [vmem:[%s17217_s14 + $0x59] sm:$0xff] }
  0x33   : > { %14411 = vmatmul.mubr.msk.f32.gmra.mrb[16].mxu1 %vm323_vm1, %v303_v40  ;;  %14635 = vmatmul.mubr.msk.f32.gmra.mrb[16].mxu0 %vm323_vm1, %v2024_v41  ;;  %v17524_v40 = vld [vmem:[%s17217_s14 + $0xfc] sm:$0xff] }
  0x34   : > { %14413 = vmatprep.mubr.msk.f32.mxu1 %vm323_vm1, %v304_v42  ;;  %14666 = vmatprep.mubr.msk.f32.mxu0 %vm323_vm1, %v2437_v43  ;;  %v729_v41 = vld [vmem:[%s17217_s14 + $0x61] sm:$0xff]  ;;  %v730_v43 = vld [vmem:[%s17217_s14 + $0x69] sm:$0xff] }
  0x35   : > { %v17528_v42 = vld [vmem:[%s17217_s14 + $0x104] sm:$0xff] }
  0x37   : > { %14414 = vmatmul.mubr.msk.f32.gmra.mrb[18].mxu1 %vm323_vm1, %v305_v44  ;;  %14667 = vmatmul.mubr.msk.f32.vlgmr.msra.gmra.mrb[0].mxu0 %vm323_vm1, %v2438_v45  ;;  %v17538_v44 = vld [vmem:[%s17217_s14 + $0x10c] sm:$0xff] }
  0x38   : > { %14721 = vmatpush3.msk.msra.mxu0 %vm432_vm0, %v17232_v10  ;;  %14416 = vmatprep.mubr.msk.f32.mxu1 %vm323_vm1, %v306_v46  ;;  %v319_v10 = vld [vmem:[%s17217_s14 + $0x108] sm:$0xff]  ;;  %v731_v45 = vld [vmem:[%s17217_s14 + $0x71] sm:$0xff] }
  0x39   : > { %14669 = vmatprep.mubr.msk.f32.mxu0 %vm323_vm1, %v17315_v47  ;;  %14776 = vmatprep.subr.msk.mxu0 %vm432_vm0, %v17320_v48  ;;  %v17542_v46 = vld [vmem:[%s17217_s14 + $0x114] sm:$0xff] }
  0x3b   : > { %14417 = vmatmul.mubr.msk.f32.gmra.mrb[20].mxu1 %vm323_vm1, %v307_v49  ;;  %14670 = vmatmul.mubr.msk.f32.gmra.mrb[2].mxu0 %vm323_vm1, %v17329_v50  ;;  %v732_v49 = vld [vmem:[%s17217_s14 + $0x79] sm:$0xff] }
  0x3c   : > { %14419 = vmatprep.mubr.msk.f32.mxu1 %vm323_vm1, %v308_v51  ;;  %14672 = vmatprep.mubr.msk.f32.mxu0 %vm323_vm1, %v17335_v52  ;;  %v17552_v51 = vld [vmem:[%s17217_s14 + $0x11c] sm:$0xff] }
  0x3f   : > { %14420 = vmatmul.mubr.msk.f32.gmra.mrb[22].mxu1 %vm323_vm1, %v309_v53  ;;  %14673 = vmatmul.mubr.msk.f32.gmra.mrb[4].mxu0 %vm323_vm1, %v17347_v54  ;;  %v733_v53 = vld [vmem:[%s17217_s14 + $0x81] sm:$0xff] }
  0x40   : > { %14422 = vmatprep.mubr.msk.f32.mxu1 %vm323_vm1, %v310_v55  ;;  %14675 = vmatprep.mubr.msk.f32.mxu0 %vm323_vm1, %v17351_v56  ;;  %v17556_v55 = vld [vmem:[%s17217_s14 + $0x124] sm:$0xff] }
  0x43   : > { %14423 = vmatmul.mubr.msk.f32.gmra.mrb[24].mxu1 %vm323_vm1, %v311_v57  ;;  %14676 = vmatmul.mubr.msk.f32.gmra.mrb[6].mxu0 %vm323_vm1, %v17361_v58  ;;  %v734_v57 = vld [vmem:[%s17217_s14 + $0x89] sm:$0xff] }
  0x44   : > { %14425 = vmatprep.mubr.msk.f32.mxu1 %vm323_vm1, %v312_v59  ;;  %14678 = vmatprep.mubr.msk.f32.mxu0 %vm323_vm1, %v17365_v60  ;;  %v2472_v59 = vld [vmem:[%s17217_s14 + $0x12c] sm:$0x3f] }
  0x47   : > { %14426 = vmatmul.mubr.msk.f32.gmra.mrb[26].mxu1 %vm323_vm1, %v313_v61  ;;  %14679 = vmatmul.mubr.msk.f32.gmra.mrb[8].mxu0 %vm323_vm1, %v17375_v62  ;;  %v735_v61 = vld [vmem:[%s17217_s14 + $0x91] sm:$0xff] }
  0x48   : > { %14428 = vmatprep.mubr.msk.f32.mxu1 %vm323_vm1, %v314_v63  ;;  %14681 = vmatprep.mubr.msk.f32.mxu0 %vm323_vm1, %v17379_v0  ;;  %v736_v63 = vld [vmem:[%s17217_s14 + $0x99] sm:$0xff] }
  0x4b   : > { %14429 = vmatmul.mubr.msk.f32.gmra.mrb[28].mxu1 %vm323_vm1, %v315_v2  ;;  %14682 = vmatmul.mubr.msk.f32.gmra.mrb[10].mxu0 %vm323_vm1, %v17389_v3  ;;  %v737_v2 = vld [vmem:[%s17217_s14 + $0xa1] sm:$0xff] }
  0x4c   : > { %14431 = vmatprep.mubr.msk.f32.mxu1 %vm323_vm1, %v316_v4  ;;  %14684 = vmatprep.mubr.msk.f32.mxu0 %vm323_vm1, %v17393_v5  ;;  %v17577_v4 = vld [vmem:[%s19773_s1 + $0x20] sm:$0x7] }
  0x4f   : > { %14432 = vmatmul.mubr.msk.f32.gmra.mrb[30].mxu1 %vm323_vm1, %v317_v6  ;;  %14685 = vmatmul.mubr.msk.f32.gmra.mrb[12].mxu0 %vm323_vm1, %v17403_v7  ;;  %v739_v6 = vld [vmem:[%s17217_s14 + $0xb1] sm:$0xff] }
  0x50   : > { %14434 = vmatprep.mubr.msk.f32.mxu1 %vm323_vm1, %v318_v8  ;;  %14687 = vmatprep.mubr.msk.f32.mxu0 %vm323_vm1, %v17407_v9  ;;  %v752_v8 = vld [vmem:[%s17217_s14 + $0x119] sm:$0x3f] }
  0x53   : > { %14435 = vmatmul.mubr.msk.f32.gmra.mrb[32].mxu1 %vm323_vm1, %v319_v10  ;;  %14688 = vmatmul.mubr.msk.f32.gmra.mrb[14].mxu0 %vm323_vm1, %v17417_v12  ;;  %v1148_v10 = vld [vmem:[%s17217_s14 + $0xa] sm:$0xff] }
  0x54   : > { %14437 = vmatprep.mubr.msk.f32.mxu1 %vm323_vm1, %v320_v13  ;;  %14690 = vmatprep.mubr.msk.f32.mxu0 %vm323_vm1, %v17421_v14  ;;  %v17665_v13 = vld [vmem:[%s17217_s14 + $0x1a] sm:$0xff] }
  0x57   : > { %14438 = vmatmul.mubr.msk.f32.gmra.mrb[34].mxu1 %vm323_vm1, %v321_v15  ;;  %14691 = vmatmul.mubr.msk.f32.gmra.mrb[16].mxu0 %vm323_vm1, %v17431_v16  ;;  %v17683_v15 = vld [vmem:[%s17217_s14 + $0x2a] sm:$0xff] }
  0x58   : > { %14442 = vmatprep.mubr.msk.f32.mxu1 %vm323_vm1, %v717_v17  ;;  %14693 = vmatprep.mubr.msk.f32.mxu0 %vm323_vm1, %v17435_v18  ;;  %v17697_v17 = vld [vmem:[%s17217_s14 + $0x3a] sm:$0xff] }
  0x5b   : > { %14443 = vmatmul.mubr.msk.f32.vlgmr.msra.gmra.mrb[0].mxu1 %vm323_vm1, %v718_v19  ;;  %14694 = vmatmul.mubr.msk.f32.gmra.mrb[18].mxu0 %vm323_vm1, %v17445_v20  ;;  %v17711_v19 = vld [vmem:[%s17217_s14 + $0x4a] sm:$0xff] }
  0x5c   : > { %14497 = vmatpush3.msk.msra.mxu1 %vm432_vm0, %v17237_v11  ;;  %14445 = vmatprep.mubr.msk.f32.mxu1 %vm323_vm1, %v719_v21  ;;  %v722_v11 = vld [vmem:[%s17217_s14 + $0x29] sm:$0xff]  ;;  %v17725_v21 = vld [vmem:[%s17217_s14 + $0x5a] sm:$0xff] }
  0x5d   : > { %14696 = vmatprep.mubr.msk.f32.mxu0 %vm323_vm1, %v17449_v22  ;;  %14552 = vmatprep.subr.msk.mxu1 %vm432_vm0, %v17454_v23 }
  0x5f   : > { %14446 = vmatmul.mubr.msk.f32.gmra.mrb[2].mxu1 %vm323_vm1, %v720_v24  ;;  %14697 = vmatmul.mubr.msk.f32.gmra.mrb[20].mxu0 %vm323_vm1, %v17464_v25  ;;  %v17742_v24 = vld [vmem:[%s17217_s14 + $0x72] sm:$0xff] }
  0x60   : > { %14448 = vmatprep.mubr.msk.f32.mxu1 %vm323_vm1, %v721_v26  ;;  %14699 = vmatprep.mubr.msk.f32.mxu0 %vm323_vm1, %v17470_v27  ;;  %v2900_v26 = vld [vmem:[%s17217_s14 + $0x12c] sm:$0xff] }
  0x63   : > { %14449 = vmatmul.mubr.msk.f32.gmra.mrb[4].mxu1 %vm323_vm1, %v722_v11  ;;  %14700 = vmatmul.mubr.msk.f32.gmra.mrb[22].mxu0 %vm323_vm1, %v17482_v28  ;;  %v2901_v11 = vld [vmem:[%s17217_s14 + $0x134] sm:$0xff] }
  0x64   : > { %14451 = vmatprep.mubr.msk.f32.mxu1 %vm323_vm1, %v723_v29  ;;  %14702 = vmatprep.mubr.msk.f32.mxu0 %vm323_vm1, %v17486_v30  ;;  %v2902_v29 = vld [vmem:[%s17217_s14 + $0x13c] sm:$0x3f] }
  0x67   : > { %14452 = vmatmul.mubr.msk.f32.gmra.mrb[6].mxu1 %vm323_vm1, %v724_v31  ;;  %14703 = vmatmul.mubr.msk.f32.gmra.mrb[24].mxu0 %vm323_vm1, %v17496_v32  ;;  %v3297_v31 = vld [vmem:[%s17217_s14 + $0x25] sm:$0xff] }
  0x68   : > { %14454 = vmatprep.mubr.msk.f32.mxu1 %vm323_vm1, %v725_v33  ;;  %14705 = vmatprep.mubr.msk.f32.mxu0 %vm323_vm1, %v17500_v34  ;;  %v3298_v33 = vld [vmem:[%s17217_s14 + $0x2d] sm:$0xff] }
  0x6b   : > { %14455 = vmatmul.mubr.msk.f32.gmra.mrb[8].mxu1 %vm323_vm1, %v726_v35  ;;  %14706 = vmatmul.mubr.msk.f32.gmra.mrb[26].mxu0 %vm323_vm1, %v17510_v36  ;;  %v3299_v35 = vld [vmem:[%s17217_s14 + $0x35] sm:$0xff] }
  0x6c   : > { %14457 = vmatprep.mubr.msk.f32.mxu1 %vm323_vm1, %v727_v37  ;;  %14708 = vmatprep.mubr.msk.f32.mxu0 %vm323_vm1, %v17514_v38  ;;  %v3300_v37 = vld [vmem:[%s17217_s14 + $0x3d] sm:$0xff] }
  0x6f   : > { %14458 = vmatmul.mubr.msk.f32.gmra.mrb[10].mxu1 %vm323_vm1, %v728_v39  ;;  %14709 = vmatmul.mubr.msk.f32.gmra.mrb[28].mxu0 %vm323_vm1, %v17524_v40  ;;  %v3301_v39 = vld [vmem:[%s17217_s14 + $0x45] sm:$0xff] }
  0x70   : > { %14460 = vmatprep.mubr.msk.f32.mxu1 %vm323_vm1, %v729_v41  ;;  %14711 = vmatprep.mubr.msk.f32.mxu0 %vm323_vm1, %v17528_v42  ;;  %v3302_v41 = vld [vmem:[%s17217_s14 + $0x4d] sm:$0xff] }
  0x73   : > { %14461 = vmatmul.mubr.msk.f32.gmra.mrb[12].mxu1 %vm323_vm1, %v730_v43  ;;  %14712 = vmatmul.mubr.msk.f32.gmra.mrb[30].mxu0 %vm323_vm1, %v17538_v44  ;;  %v3303_v43 = vld [vmem:[%s17217_s14 + $0x55] sm:$0xff] }
  0x74   : > { %14463 = vmatprep.mubr.msk.f32.mxu1 %vm323_vm1, %v731_v45  ;;  %14714 = vmatprep.mubr.msk.f32.mxu0 %vm323_vm1, %v17542_v46  ;;  %v3304_v45 = vld [vmem:[%s17217_s14 + $0x5d] sm:$0xff] }
  0x77   : > { %14464 = vmatmul.mubr.msk.f32.gmra.mrb[14].mxu1 %vm323_vm1, %v732_v49  ;;  %14715 = vmatmul.mubr.msk.f32.gmra.mrb[32].mxu0 %vm323_vm1, %v17552_v51  ;;  %v3305_v49 = vld [vmem:[%s17217_s14 + $0x65] sm:$0xff] }
  0x78   : > { %14466 = vmatprep.mubr.msk.f32.mxu1 %vm323_vm1, %v733_v53  ;;  %14717 = vmatprep.mubr.msk.f32.mxu0 %vm323_vm1, %v17556_v55  ;;  %v3306_v53 = vld [vmem:[%s17217_s14 + $0x6d] sm:$0xff] }
  0x7b   : > { %14467 = vmatmul.mubr.msk.f32.gmra.mrb[16].mxu1 %vm323_vm1, %v734_v57  ;;  %14718 = vmatmul.mubr.msk.f32.gmra.mrb[34].mxu0 %vm323_vm1, %v2472_v59  ;;  %v3307_v57 = vld [vmem:[%s17217_s14 + $0x75] sm:$0xff]  ;;  %v17853_v59 = vld [vmem:[%s17217_s14 + $0xea] sm:$0xff] }
  0x7c   : > { %14469 = vmatprep.mubr.msk.f32.mxu1 %vm323_vm1, %v735_v61  ;;  %14722 = vmatprep.mubr.msk.f32.mxu0 %vm323_vm1, %v17315_v47  ;;  %v738_v47 = vld [vmem:[%s17217_s14 + $0xa9] sm:$0xff]  ;;  %v3308_v61 = vld [vmem:[%s17217_s14 + $0x7d] sm:$0xff] }
  0x7f   : > { %14470 = vmatmul.mubr.msk.f32.gmra.mrb[18].mxu1 %vm323_vm1, %v736_v63  ;;  %14723 = vmatmul.mubr.msk.f32.vlgmr.msra.gmra.mrb[0].mxu0 %vm323_vm1, %v17329_v50  ;;  %v741_v50 = vld [vmem:[%s17217_s14 + $0xc1] sm:$0xff]  ;;  %v17857_v63 = vld [vmem:[%s17217_s14 + $0xf2] sm:$0xff] }
  0x80   : > { %14777 = vmatpush3.msk.msra.mxu0 %vm432_vm0, %v17320_v48  ;;  %14472 = vmatprep.mubr.msk.f32.mxu1 %vm323_vm1, %v737_v2  ;;  %v740_v48 = vld [vmem:[%s17217_s14 + $0xb9] sm:$0xff]  ;;  %v3309_v2 = vld [vmem:[%s17217_s14 + $0x85] sm:$0xff] }
  0x81   : > { %14725 = vmatprep.mubr.msk.f32.mxu0 %vm323_vm1, %v17335_v52  ;;  %14832 = vmatprep.subr.msk.mxu0 %vm432_vm0, %v17577_v4  ;;  %v742_v52 = vld [vmem:[%s17217_s14 + $0xc9] sm:$0xff] }
  0x83   : > { %14473 = vmatmul.mubr.msk.f32.gmra.mrb[20].mxu1 %vm323_vm1, %v738_v47  ;;  %14726 = vmatmul.mubr.msk.f32.gmra.mrb[2].mxu0 %vm323_vm1, %v17347_v54  ;;  %v743_v54 = vld [vmem:[%s17217_s14 + $0xd1] sm:$0xff] }
  0x84   : > { %14475 = vmatprep.mubr.msk.f32.mxu1 %vm323_vm1, %v739_v6  ;;  %14728 = vmatprep.mubr.msk.f32.mxu0 %vm323_vm1, %v17351_v56  ;;  %v744_v56 = vld [vmem:[%s17217_s14 + $0xd9] sm:$0xff]  ;;  %v3310_v47 = vld [vmem:[%s17217_s14 + $0x8d] sm:$0xff]  ;;  %v17871_v6 = vld [vmem:[%s17217_s14 + $0x102] sm:$0xff] }
  0x87   : > { %14476 = vmatmul.mubr.msk.f32.gmra.mrb[22].mxu1 %vm323_vm1, %v740_v48  ;;  %14729 = vmatmul.mubr.msk.f32.gmra.mrb[4].mxu0 %vm323_vm1, %v17361_v58  ;;  %v745_v58 = vld [vmem:[%s17217_s14 + $0xe1] sm:$0xff]  ;;  %v3311_v48 = vld [vmem:[%s17217_s14 + $0x95] sm:$0xff] }
  0x88   : > { %14478 = vmatprep.mubr.msk.f32.mxu1 %vm323_vm1, %v741_v50  ;;  %14731 = vmatprep.mubr.msk.f32.mxu0 %vm323_vm1, %v17365_v60  ;;  %v746_v60 = vld [vmem:[%s17217_s14 + $0xe9] sm:$0xff] }
  0x89   : > { %v17881_v50 = vld [vmem:[%s17217_s14 + $0x10a] sm:$0xff] }
  0x8b   : > { %14479 = vmatmul.mubr.msk.f32.gmra.mrb[24].mxu1 %vm323_vm1, %v742_v52  ;;  %14732 = vmatmul.mubr.msk.f32.gmra.mrb[6].mxu0 %vm323_vm1, %v17375_v62  ;;  %v747_v62 = vld [vmem:[%s17217_s14 + $0xf1] sm:$0xff]  ;;  %v3312_v52 = vld [vmem:[%s17217_s14 + $0x9d] sm:$0xff] }
  0x8c   : > { %14481 = vmatprep.mubr.msk.f32.mxu1 %vm323_vm1, %v743_v54  ;;  %14734 = vmatprep.mubr.msk.f32.mxu0 %vm323_vm1, %v17379_v0  ;;  %v748_v0 = vld [vmem:[%s17217_s14 + $0xf9] sm:$0xff] }
  0x8d   : > { %v17885_v54 = vld [vmem:[%s17217_s14 + $0x112] sm:$0xff] }
  0x8f   : > { %14482 = vmatmul.mubr.msk.f32.gmra.mrb[26].mxu1 %vm323_vm1, %v744_v56  ;;  %14735 = vmatmul.mubr.msk.f32.gmra.mrb[8].mxu0 %vm323_vm1, %v17389_v3  ;;  %v749_v3 = vld [vmem:[%s17217_s14 + $0x101] sm:$0xff] }
  0x90   : > { %14484 = vmatprep.mubr.msk.f32.mxu1 %vm323_vm1, %v745_v58  ;;  %14737 = vmatprep.mubr.msk.f32.mxu0 %vm323_vm1, %v17393_v5  ;;  %v750_v5 = vld [vmem:[%s17217_s14 + $0x109] sm:$0xff]  ;;  %v1182_v58 = vld [vmem:[%s17217_s14 + $0x11a] sm:$0x3f] }
  0x91   : > { %v3313_v56 = vld [vmem:[%s17217_s14 + $0xa5] sm:$0xff] }
  0x93   : > { %14485 = vmatmul.mubr.msk.f32.gmra.mrb[28].mxu1 %vm323_vm1, %v746_v60  ;;  %14738 = vmatmul.mubr.msk.f32.gmra.mrb[10].mxu0 %vm323_vm1, %v17403_v7  ;;  %v751_v7 = vld [vmem:[%s17217_s14 + $0x111] sm:$0xff] }
  0x94   : > { %14487 = vmatprep.mubr.msk.f32.mxu1 %vm323_vm1, %v747_v62  ;;  %14740 = vmatprep.mubr.msk.f32.mxu0 %vm323_vm1, %v17407_v9  ;;  %v1147_v9 = vld [vmem:[%s17217_s14 + $0x2] sm:$0xff]  ;;  %v3314_v60 = vld [vmem:[%s17217_s14 + $0xad] sm:$0xff]  ;;  %v3315_v62 = vld [vmem:[%s17217_s14 + $0xb5] sm:$0xff] }
  0x97   : > { %14488 = vmatmul.mubr.msk.f32.gmra.mrb[30].mxu1 %vm323_vm1, %v748_v0  ;;  %14741 = vmatmul.mubr.msk.f32.gmra.mrb[12].mxu0 %vm323_vm1, %v17417_v12  ;;  %v17655_v12 = vld [vmem:[%s17217_s14 + $0x12] sm:$0xff]  ;;  %v3316_v0 = vld [vmem:[%s17217_s14 + $0xbd] sm:$0xff] }
  0x98   : > { %14490 = vmatprep.mubr.msk.f32.mxu1 %vm323_vm1, %v749_v3  ;;  %14743 = vmatprep.mubr.msk.f32.mxu0 %vm323_vm1, %v17421_v14  ;;  %v17670_v14 = vld [vmem:[%s17217_s14 + $0x22] sm:$0xff] }
  0x99   : > { %v3317_v3 = vld [vmem:[%s17217_s14 + $0xc5] sm:$0xff] }
  0x9b   : > { %14491 = vmatmul.mubr.msk.f32.gmra.mrb[32].mxu1 %vm323_vm1, %v750_v5  ;;  %14744 = vmatmul.mubr.msk.f32.gmra.mrb[14].mxu0 %vm323_vm1, %v17431_v16  ;;  %v17686_v16 = vld [vmem:[%s17217_s14 + $0x32] sm:$0xff] }
  0x9c   : > { %14493 = vmatprep.mubr.msk.f32.mxu1 %vm323_vm1, %v751_v7  ;;  %14746 = vmatprep.mubr.msk.f32.mxu0 %vm323_vm1, %v17435_v18  ;;  %v17700_v18 = vld [vmem:[%s17217_s14 + $0x42] sm:$0xff]  ;;  %v3318_v5 = vld [vmem:[%s17217_s14 + $0xcd] sm:$0xff]  ;;  %v3319_v7 = vld [vmem:[%s17217_s14 + $0xd5] sm:$0xff] }
  0x9f   : > { %14494 = vmatmul.mubr.msk.f32.gmra.mrb[34].mxu1 %vm323_vm1, %v752_v8  ;;  %14747 = vmatmul.mubr.msk.f32.gmra.mrb[16].mxu0 %vm323_vm1, %v17445_v20  ;;  %v17714_v20 = vld [vmem:[%s17217_s14 + $0x52] sm:$0xff]  ;;  %v3321_v8 = vld [vmem:[%s17217_s14 + $0xe5] sm:$0xff] }
  0xa0   : > { %14498 = vmatprep.mubr.msk.f32.mxu1 %vm323_vm1, %v1147_v9  ;;  %14749 = vmatprep.mubr.msk.f32.mxu0 %vm323_vm1, %v17449_v22  ;;  %v17728_v22 = vld [vmem:[%s17217_s14 + $0x62] sm:$0xff]  ;;  %v3322_v9 = vld [vmem:[%s17217_s14 + $0xed] sm:$0xff] }
  0xa3   : > { %14499 = vmatmul.mubr.msk.f32.vlgmr.msra.gmra.mrb[0].mxu1 %vm323_vm1, %v1148_v10  ;;  %14750 = vmatmul.mubr.msk.f32.gmra.mrb[18].mxu0 %vm323_vm1, %v17464_v25  ;;  %v17753_v25 = vld [vmem:[%s17217_s14 + $0x7a] sm:$0xff] }
  0xa4   : > { %14553 = vmatpush3.msk.msra.mxu1 %vm432_vm0, %v17454_v23  ;;  %14501 = vmatprep.mubr.msk.f32.mxu1 %vm323_vm1, %v17655_v12  ;;  %v17739_v23 = vld [vmem:[%s17217_s14 + $0x6a] sm:$0xff]  ;;  %v3323_v10 = vld [vmem:[%s17217_s14 + $0xf5] sm:$0xff] }
  0xa5   : > { %14752 = vmatprep.mubr.msk.f32.mxu0 %vm323_vm1, %v17470_v27  ;;  %16148 = vmatprep.subr.msk.mxu1 %vm432_vm0, %v17195_v1  ;;  %v17757_v27 = vld [vmem:[%s17217_s14 + $0x82] sm:$0xff] }
  0xa7   : > { %14502 = vmatmul.mubr.msk.f32.gmra.mrb[2].mxu1 %vm323_vm1, %v17665_v13  ;;  %14753 = vmatmul.mubr.msk.f32.gmra.mrb[20].mxu0 %vm323_vm1, %v17482_v28  ;;  %v17767_v28 = vld [vmem:[%s17217_s14 + $0x8a] sm:$0xff] }
  0xa8   : > { %14504 = vmatprep.mubr.msk.f32.mxu1 %vm323_vm1, %v17670_v14  ;;  %14755 = vmatprep.mubr.msk.f32.mxu0 %vm323_vm1, %v17486_v30  ;;  %v17771_v30 = vld [vmem:[%s17217_s14 + $0x92] sm:$0xff] }
  0xab   : > { %14505 = vmatmul.mubr.msk.f32.gmra.mrb[4].mxu1 %vm323_vm1, %v17683_v15  ;;  %14756 = vmatmul.mubr.msk.f32.gmra.mrb[22].mxu0 %vm323_vm1, %v17496_v32  ;;  %v17781_v32 = vld [vmem:[%s17217_s14 + $0x9a] sm:$0xff] }
  0xac   : > { %14507 = vmatprep.mubr.msk.f32.mxu1 %vm323_vm1, %v17686_v16  ;;  %14758 = vmatprep.mubr.msk.f32.mxu0 %vm323_vm1, %v17500_v34  ;;  %v17785_v34 = vld [vmem:[%s17217_s14 + $0xa2] sm:$0xff] }
  0xaf   : > { %14508 = vmatmul.mubr.msk.f32.gmra.mrb[6].mxu1 %vm323_vm1, %v17697_v17  ;;  %14759 = vmatmul.mubr.msk.f32.gmra.mrb[24].mxu0 %vm323_vm1, %v17510_v36  ;;  %v17796_v36 = vld [vmem:[%s17217_s14 + $0xaa] sm:$0xff] }
  0xb0   : > { %14510 = vmatprep.mubr.msk.f32.mxu1 %vm323_vm1, %v17700_v18  ;;  %14761 = vmatprep.mubr.msk.f32.mxu0 %vm323_vm1, %v17514_v38  ;;  %v17801_v38 = vld [vmem:[%s17217_s14 + $0xb2] sm:$0xff] }
  0xb3   : > { %14511 = vmatmul.mubr.msk.f32.gmra.mrb[8].mxu1 %vm323_vm1, %v17711_v19  ;;  %14762 = vmatmul.mubr.msk.f32.gmra.mrb[26].mxu0 %vm323_vm1, %v17524_v40  ;;  %v17811_v40 = vld [vmem:[%s17217_s14 + $0xba] sm:$0xff] }
  0xb4   : > { %14513 = vmatprep.mubr.msk.f32.mxu1 %vm323_vm1, %v17714_v20  ;;  %14764 = vmatprep.mubr.msk.f32.mxu0 %vm323_vm1, %v17528_v42  ;;  %v17815_v42 = vld [vmem:[%s17217_s14 + $0xc2] sm:$0xff] }
  0xb7   : > { %14514 = vmatmul.mubr.msk.f32.gmra.mrb[10].mxu1 %vm323_vm1, %v17725_v21  ;;  %14765 = vmatmul.mubr.msk.f32.gmra.mrb[28].mxu0 %vm323_vm1, %v17538_v44  ;;  %v17825_v44 = vld [vmem:[%s17217_s14 + $0xca] sm:$0xff] }
  0xb8   : > { %14516 = vmatprep.mubr.msk.f32.mxu1 %vm323_vm1, %v17728_v22  ;;  %14767 = vmatprep.mubr.msk.f32.mxu0 %vm323_vm1, %v17542_v46  ;;  %v17829_v46 = vld [vmem:[%s17217_s14 + $0xd2] sm:$0xff] }
  0xbb   : > { %14517 = vmatmul.mubr.msk.f32.gmra.mrb[12].mxu1 %vm323_vm1, %v17739_v23  ;;  %14768 = vmatmul.mubr.msk.f32.gmra.mrb[30].mxu0 %vm323_vm1, %v17552_v51  ;;  %v17839_v51 = vld [vmem:[%s17217_s14 + $0xda] sm:$0xff] }
  0xbc   : > { %14519 = vmatprep.mubr.msk.f32.mxu1 %vm323_vm1, %v17742_v24  ;;  %14770 = vmatprep.mubr.msk.f32.mxu0 %vm323_vm1, %v17556_v55  ;;  %v17843_v55 = vld [vmem:[%s17217_s14 + $0xe2] sm:$0xff] }
  0xbf   : > { %14520 = vmatmul.mubr.msk.f32.gmra.mrb[14].mxu1 %vm323_vm1, %v17753_v25  ;;  %14771 = vmatmul.mubr.msk.f32.gmra.mrb[32].mxu0 %vm323_vm1, %v2900_v26  ;;  %v3732_v26 = vld [vmem:[%s17217_s14 + $0x4e] sm:$0xff] }
  0xc0   : > { %14522 = vmatprep.mubr.msk.f32.mxu1 %vm323_vm1, %v17757_v27  ;;  %14773 = vmatprep.mubr.msk.f32.mxu0 %vm323_vm1, %v2901_v11  ;;  %v3734_v11 = vld [vmem:[%s17217_s14 + $0x5e] sm:$0xff] }
  0xc3   : > { %14523 = vmatmul.mubr.msk.f32.gmra.mrb[16].mxu1 %vm323_vm1, %v17767_v28  ;;  %14774 = vmatmul.mubr.msk.f32.gmra.mrb[34].mxu0 %vm323_vm1, %v2902_v29  ;;  %v3736_v29 = vld [vmem:[%s17217_s14 + $0x6e] sm:$0xff] }
  0xc4   : > { %14525 = vmatprep.mubr.msk.f32.mxu1 %vm323_vm1, %v17771_v30  ;;  %14778 = vmatprep.mubr.msk.f32.mxu0 %vm323_vm1, %v3297_v31  ;;  %v3738_v31 = vld [vmem:[%s17217_s14 + $0x7e] sm:$0xff] }
  0xc7   : > { %14526 = vmatmul.mubr.msk.f32.gmra.mrb[18].mxu1 %vm323_vm1, %v17781_v32  ;;  %14779 = vmatmul.mubr.msk.f32.vlgmr.msra.gmra.mrb[0].mxu0 %vm323_vm1, %v3298_v33  ;;  %v3740_v33 = vld [vmem:[%s17217_s14 + $0x8e] sm:$0xff] }
  0xc8   : > { %14833 = vmatpush3.msk.msra.mxu0 %vm432_vm0, %v17577_v4  ;;  %14528 = vmatprep.mubr.msk.f32.mxu1 %vm323_vm1, %v17785_v34  ;;  %v17867_v4 = vld [vmem:[%s17217_s14 + $0xfa] sm:$0xff] }
  0xc9   : > { %14781 = vmatprep.mubr.msk.f32.mxu0 %vm323_vm1, %v3299_v35  ;;  %v1610_v35 = vld [vmem:[%s17217_s14 + $0x11a] sm:$0xff] }
  0xcb   : > { %14529 = vmatmul.mubr.msk.f32.gmra.mrb[20].mxu1 %vm323_vm1, %v17796_v36  ;;  %14782 = vmatmul.mubr.msk.f32.gmra.mrb[2].mxu0 %vm323_vm1, %v3300_v37  ;;  %v1611_v37 = vld [vmem:[%s17217_s14 + $0x122] sm:$0xff] }
  0xcc   : > { %14531 = vmatprep.mubr.msk.f32.mxu1 %vm323_vm1, %v17801_v38  ;;  %14784 = vmatprep.mubr.msk.f32.mxu0 %vm323_vm1, %v3301_v39  ;;  %v1612_v39 = vld [vmem:[%s17217_s14 + $0x12a] sm:$0x3f] }
  0xcf   : > { %14532 = vmatmul.mubr.msk.f32.gmra.mrb[22].mxu1 %vm323_vm1, %v17811_v40  ;;  %14785 = vmatmul.mubr.msk.f32.gmra.mrb[4].mxu0 %vm323_vm1, %v3302_v41  ;;  %v2025_v41 = vld [vmem:[%s17217_s14 + $0xa3] sm:$0xff] }
  0xd0   : > { %14534 = vmatprep.mubr.msk.f32.mxu1 %vm323_vm1, %v17815_v42  ;;  %14787 = vmatprep.mubr.msk.f32.mxu0 %vm323_vm1, %v3303_v43  ;;  %v2026_v43 = vld [vmem:[%s17217_s14 + $0xab] sm:$0xff] }
  0xd3   : > { %14535 = vmatmul.mubr.msk.f32.gmra.mrb[24].mxu1 %vm323_vm1, %v17825_v44  ;;  %14788 = vmatmul.mubr.msk.f32.gmra.mrb[6].mxu0 %vm323_vm1, %v3304_v45  ;;  %v2027_v45 = vld [vmem:[%s17217_s14 + $0xb3] sm:$0xff] }
  0xd4   : > { %14537 = vmatprep.mubr.msk.f32.mxu1 %vm323_vm1, %v17829_v46  ;;  %14790 = vmatprep.mubr.msk.f32.mxu0 %vm323_vm1, %v3305_v49  ;;  %v2028_v49 = vld [vmem:[%s17217_s14 + $0xbb] sm:$0xff] }
  0xd7   : > { %14538 = vmatmul.mubr.msk.f32.gmra.mrb[26].mxu1 %vm323_vm1, %v17839_v51  ;;  %14791 = vmatmul.mubr.msk.f32.gmra.mrb[8].mxu0 %vm323_vm1, %v3306_v53  ;;  %v2029_v53 = vld [vmem:[%s17217_s14 + $0xc3] sm:$0xff] }
  0xd8   : > { %14540 = vmatprep.mubr.msk.f32.mxu1 %vm323_vm1, %v17843_v55  ;;  %14793 = vmatprep.mubr.msk.f32.mxu0 %vm323_vm1, %v3307_v57  ;;  %v2030_v57 = vld [vmem:[%s17217_s14 + $0xcb] sm:$0xff] }
  0xdb   : > { %14541 = vmatmul.mubr.msk.f32.gmra.mrb[28].mxu1 %vm323_vm1, %v17853_v59  ;;  %14794 = vmatmul.mubr.msk.f32.gmra.mrb[10].mxu0 %vm323_vm1, %v3308_v61  ;;  %v2031_v61 = vld [vmem:[%s17217_s14 + $0xd3] sm:$0xff] }
  0xdc   : > { %14543 = vmatprep.mubr.msk.f32.mxu1 %vm323_vm1, %v17857_v63  ;;  %14796 = vmatprep.mubr.msk.f32.mxu0 %vm323_vm1, %v3309_v2  ;;  %v2032_v2 = vld [vmem:[%s17217_s14 + $0xdb] sm:$0xff] }
  0xdf   : > { %14544 = vmatmul.mubr.msk.f32.gmra.mrb[30].mxu1 %vm323_vm1, %v17867_v4  ;;  %14797 = vmatmul.mubr.msk.f32.gmra.mrb[12].mxu0 %vm323_vm1, %v3310_v47  ;;  %v2033_v47 = vld [vmem:[%s17217_s14 + $0xe3] sm:$0xff] }
  0xe0   : > { %14546 = vmatprep.mubr.msk.f32.mxu1 %vm323_vm1, %v17871_v6  ;;  %14799 = vmatprep.mubr.msk.f32.mxu0 %vm323_vm1, %v3311_v48  ;;  %v2034_v48 = vld [vmem:[%s17217_s14 + $0xeb] sm:$0xff] }
  0xe3   : > { %14547 = vmatmul.mubr.msk.f32.gmra.mrb[32].mxu1 %vm323_vm1, %v17881_v50  ;;  %14800 = vmatmul.mubr.msk.f32.gmra.mrb[14].mxu0 %vm323_vm1, %v3312_v52  ;;  %v2035_v52 = vld [vmem:[%s17217_s14 + $0xf3] sm:$0xff] }
  0xe4   : > { %14549 = vmatprep.mubr.msk.f32.mxu1 %vm323_vm1, %v17885_v54  ;;  %14802 = vmatprep.mubr.msk.f32.mxu0 %vm323_vm1, %v3313_v56  ;;  %v2036_v56 = vld [vmem:[%s17217_s14 + $0xfb] sm:$0xff] }
  0xe7   : > { %14550 = vmatmul.mubr.msk.f32.gmra.mrb[34].mxu1 %vm323_vm1, %v1182_v58  ;;  %14803 = vmatmul.mubr.msk.f32.gmra.mrb[16].mxu0 %vm323_vm1, %v3314_v60  ;;  %v3756_v58 = vld [vmem:[%s17217_s14 + $0x10e] sm:$0xff]  ;;  %v2037_v60 = vld [vmem:[%s17217_s14 + $0x103] sm:$0xff] }
  0xe8   : > { %14554 = vmatprep.mubr.msk.f32.mxu1 %vm323_vm1, %v17655_v12  ;;  %14805 = vmatprep.mubr.msk.f32.mxu0 %vm323_vm1, %v3315_v62  ;;  %v3324_v12 = vld [vmem:[%s17217_s14 + $0xfd] sm:$0xff] }
  0xe9   : > { %v3757_v62 = vld [vmem:[%s17217_s14 + $0x116] sm:$0xff] }
  0xeb   : > { %14555 = vmatmul.mubr.msk.f32.vlgmr.msra.gmra.mrb[0].mxu1 %vm323_vm1, %v17665_v13  ;;  %14806 = vmatmul.mubr.msk.f32.gmra.mrb[18].mxu0 %vm323_vm1, %v3316_v0  ;;  %v3325_v13 = vld [vmem:[%s17217_s14 + $0x105] sm:$0xff] }
  0xec   : > { %16149 = vmatpush3.msk.msra.mxu1 %vm432_vm0, %v17195_v1  ;;  %14557 = vmatprep.mubr.msk.f32.mxu1 %vm323_vm1, %v17670_v14  ;;  %v3320_v1 = vld [vmem:[%s17217_s14 + $0xdd] sm:$0xff]  ;;  %v3326_v14 = vld [vmem:[%s17217_s14 + $0x10d] sm:$0xff] }
  0xed   : > { %14808 = vmatprep.mubr.msk.f32.mxu0 %vm323_vm1, %v3317_v3  ;;  %v2038_v0 = vld [vmem:[%s17217_s14 + $0x10b] sm:$0xff]  ;;  %v3758_v3 = vld [vmem:[%s17217_s14 + $0x11e] sm:$0xff] }
  0xef   : > { %14558 = vmatmul.mubr.msk.f32.gmra.mrb[2].mxu1 %vm323_vm1, %v17683_v15  ;;  %14809 = vmatmul.mubr.msk.f32.gmra.mrb[20].mxu0 %vm323_vm1, %v3318_v5  ;;  %v3327_v15 = vld [vmem:[%s17217_s14 + $0x115] sm:$0xff] }
  0xf0   : > { %14560 = vmatprep.mubr.msk.f32.mxu1 %vm323_vm1, %v17686_v16  ;;  %14811 = vmatprep.mubr.msk.f32.mxu0 %vm323_vm1, %v3319_v7  ;;  %v3328_v16 = vld [vmem:[%s17217_s14 + $0x11d] sm:$0xff]  ;;  %v2039_v5 = vld [vmem:[%s17217_s14 + $0x113] sm:$0xff]  ;;  %v3759_v7 = vld [vmem:[%s17217_s14 + $0x126] sm:$0xff] }
  0xf3   : > { %14561 = vmatmul.mubr.msk.f32.gmra.mrb[4].mxu1 %vm323_vm1, %v17697_v17  ;;  %14812 = vmatmul.mubr.msk.f32.gmra.mrb[22].mxu0 %vm323_vm1, %v3320_v1  ;;  %v3329_v17 = vld [vmem:[%s17217_s14 + $0x125] sm:$0xff] }
  0xf4   : > { %14563 = vmatprep.mubr.msk.f32.mxu1 %vm323_vm1, %v17700_v18  ;;  %14814 = vmatprep.mubr.msk.f32.mxu0 %vm323_vm1, %v3321_v8  ;;  %v3330_v18 = vld [vmem:[%s17217_s14 + $0x12d] sm:$0xff]  ;;  %v4328_v1 = vld [vmem:[%s19775_s3] sm:$0xff] }
  0xf5   : > { %v4329_v8 = vld [vmem:[%s19775_s3 + $0x8] sm:$0xff] }
  0xf7   : > { %14564 = vmatmul.mubr.msk.f32.gmra.mrb[6].mxu1 %vm323_vm1, %v17711_v19  ;;  %14815 = vmatmul.mubr.msk.f32.gmra.mrb[24].mxu0 %vm323_vm1, %v3322_v9  ;;  %v3331_v19 = vld [vmem:[%s17217_s14 + $0x135] sm:$0xff] }
  0xf8   : > { %14566 = vmatprep.mubr.msk.f32.mxu1 %vm323_vm1, %v17714_v20  ;;  %14817 = vmatprep.mubr.msk.f32.mxu0 %vm323_vm1, %v3323_v10  ;;  %v3332_v20 = vld [vmem:[%s17217_s14 + $0x13d] sm:$0x3f]  ;;  %v3760_v10 = vld [vmem:[%s17217_s14 + $0x12e] sm:$0xff] }
  0xf9   : > { %v2040_v9 = vld [vmem:[%s17217_s14 + $0x11b] sm:$0xff] }
  0xfb   : > { %14567 = vmatmul.mubr.msk.f32.gmra.mrb[8].mxu1 %vm323_vm1, %v17725_v21  ;;  %14818 = vmatmul.mubr.msk.f32.gmra.mrb[26].mxu0 %vm323_vm1, %v3324_v12  ;;  %v3727_v21 = vld [vmem:[%s17217_s14 + $0x26] sm:$0xff]  ;;  %v16004_v12 = vpack.c.bf16 %v4329_v8, %v4328_v1 }
  0xfc   : > { %14569 = vmatprep.mubr.msk.f32.mxu1 %vm323_vm1, %v17728_v22  ;;  %14820 = vmatprep.mubr.msk.f32.mxu0 %vm323_vm1, %v3325_v13  ;;  %v3728_v22 = vld [vmem:[%s17217_s14 + $0x2e] sm:$0xff]  ;;  %v2041_v13 = vld [vmem:[%s17217_s14 + $0x123] sm:$0xff] }
  0xfd   : > { %16005 = vmatprep.subr.bf16.mxu1 %v16004_v12 }
  0xff   : > { %14570 = vmatmul.mubr.msk.f32.gmra.mrb[10].mxu1 %vm323_vm1, %v17739_v23  ;;  %14821 = vmatmul.mubr.msk.f32.gmra.mrb[28].mxu0 %vm323_vm1, %v3326_v14  ;;  %v3729_v23 = vld [vmem:[%s17217_s14 + $0x36] sm:$0xff] }
 0x100   : > { %14572 = vmatprep.mubr.msk.f32.mxu1 %vm323_vm1, %v17742_v24  ;;  %14823 = vmatprep.mubr.msk.f32.mxu0 %vm323_vm1, %v3327_v15  ;;  %v3730_v24 = vld [vmem:[%s17217_s14 + $0x3e] sm:$0xff]  ;;  %v3761_v14 = vld [vmem:[%s17217_s14 + $0x136] sm:$0xff]  ;;  %v2042_v15 = vld [vmem:[%s17217_s14 + $0x12b] sm:$0x3f] }
 0x103   : > { %14573 = vmatmul.mubr.msk.f32.gmra.mrb[12].mxu1 %vm323_vm1, %v17753_v25  ;;  %14824 = vmatmul.mubr.msk.f32.gmra.mrb[30].mxu0 %vm323_vm1, %v3328_v16  ;;  %v3731_v25 = vld [vmem:[%s17217_s14 + $0x46] sm:$0xff]  ;;  %v3762_v16 = vld [vmem:[%s17217_s14 + $0x13e] sm:$0x3f] }
 0x104   : > { %14575 = vmatprep.mubr.msk.f32.mxu1 %vm323_vm1, %v17757_v27  ;;  %14826 = vmatprep.mubr.msk.f32.mxu0 %vm323_vm1, %v3329_v17  ;;  %v3733_v27 = vld [vmem:[%s17217_s14 + $0x56] sm:$0xff] }
 0x105   : > { %v4330_v17 = vld [vmem:[%s19775_s3 + $0x10] sm:$0xff] }
 0x107   : > { %14576 = vmatmul.mubr.msk.f32.gmra.mrb[14].mxu1 %vm323_vm1, %v17767_v28  ;;  %14827 = vmatmul.mubr.msk.f32.gmra.mrb[32].mxu0 %vm323_vm1, %v3330_v18  ;;  %v3735_v28 = vld [vmem:[%s17217_s14 + $0x66] sm:$0xff]  ;;  %v4331_v18 = vld [vmem:[%s19775_s3 + $0x18] sm:$0xff] }
 0x108   : > { %14578 = vmatprep.mubr.msk.f32.mxu1 %vm323_vm1, %v17771_v30  ;;  %14829 = vmatprep.mubr.msk.f32.mxu0 %vm323_vm1, %v3331_v19  ;;  %v3737_v30 = vld [vmem:[%s17217_s14 + $0x76] sm:$0xff]  ;;  %v16008_v19 = vpack.c.bf16 %v4331_v18, %v4330_v17 }
 0x10b   : > { %14579 = vmatmul.mubr.msk.f32.gmra.mrb[16].mxu1 %vm323_vm1, %v17781_v32  ;;  %14830 = vmatmul.mubr.msk.f32.gmra.mrb[34].mxu0 %vm323_vm1, %v3332_v20  ;;  %v3739_v32 = vld [vmem:[%s17217_s14 + $0x86] sm:$0xff]  ;;  %v17140_v20 = vmov 0.0  }
 0x10c   : > { %14581 = vmatprep.mubr.msk.f32.mxu1 %vm323_vm1, %v17785_v34  ;;  %14834 = vmatprep.mubr.msk.f32.mxu0 %vm323_vm1, %v3727_v21  ;;  %v3741_v34 = vld [vmem:[%s17217_s14 + $0x96] sm:$0xff]  ;;  %4197 = vst.msk [vmem:[#allocation2 + $0x18] sm:$0xff] %vm4193_vm2, %v17140_v20  ;;  %4198 = vst.msk [vmem:[#allocation2 + $0x20] sm:$0xff] %vm4193_vm2, %v17140_v20 }
 0x10d   : > { %4194 = vst.msk [vmem:[#allocation2] sm:$0xff] %vm4193_vm2, %v17140_v20  ;;  %4195 = vst.msk [vmem:[#allocation2 + $0x8] sm:$0xff] %vm4193_vm2, %v17140_v20 }
 0x10e   : > { %4196 = vst.msk [vmem:[#allocation2 + $0x10] sm:$0xff] %vm4193_vm2, %v17140_v20  ;;  %4199 = vst.msk [vmem:[#allocation2 + $0x28] sm:$0xff] %vm4193_vm2, %v17140_v20 }
 0x10f   : > { %14582 = vmatmul.mubr.msk.f32.gmra.mrb[18].mxu1 %vm323_vm1, %v17796_v36  ;;  %14835 = vmatmul.mubr.msk.f32.vlgmr.msra.gmra.mrb[0].mxu0 %vm323_vm1, %v3728_v22  ;;  %v3742_v36 = vld [vmem:[%s17217_s14 + $0x9e] sm:$0xff]  ;;  %4200 = vst.msk [vmem:[#allocation2 + $0x30] sm:$0xff] %vm4193_vm2, %v17140_v20  ;;  %4201 = vst.msk [vmem:[#allocation2 + $0x38] sm:$0xff] %vm4193_vm2, %v17140_v20 }
 0x110   : > { %14584 = vmatprep.mubr.msk.f32.mxu1 %vm323_vm1, %v17801_v38  ;;  %14837 = vmatprep.mubr.msk.f32.mxu0 %vm323_vm1, %v3729_v23  ;;  %v3743_v38 = vld [vmem:[%s17217_s14 + $0xa6] sm:$0xff]  ;;  %4202 = vst.msk [vmem:[#allocation2 + $0x40] sm:$0xff] %vm4193_vm2, %v17140_v20  ;;  %4203 = vst.msk [vmem:[#allocation2 + $0x48] sm:$0xff] %vm4193_vm2, %v17140_v20 }
 0x111   : > { %4204 = vst.msk [vmem:[#allocation2 + $0x50] sm:$0xff] %vm4193_vm2, %v17140_v20  ;;  %4205 = vst.msk [vmem:[#allocation2 + $0x58] sm:$0xff] %vm4193_vm2, %v17140_v20  ;;  %v12651_v23 = vld [vmem:[%s19775_s3 + $0x20] sm:$0xff] }
 0x112   : > { %4206 = vst.msk [vmem:[#allocation2 + $0x60] sm:$0xff] %vm4193_vm2, %v17140_v20  ;;  %4207 = vst.msk [vmem:[#allocation2 + $0x68] sm:$0xff] %vm4193_vm2, %v17140_v20 }
 0x113   : > { %14585 = vmatmul.mubr.msk.f32.gmra.mrb[20].mxu1 %vm323_vm1, %v17811_v40  ;;  %14838 = vmatmul.mubr.msk.f32.gmra.mrb[2].mxu0 %vm323_vm1, %v3730_v24  ;;  %v3744_v40 = vld [vmem:[%s17217_s14 + $0xae] sm:$0xff]  ;;  %4208 = vst.msk [vmem:[#allocation2 + $0x70] sm:$0xff] %vm4193_vm2, %v17140_v20  ;;  %4209 = vst.msk [vmem:[#allocation2 + $0x78] sm:$0xff] %vm4193_vm2, %v17140_v20 }
 0x114   : > { %14587 = vmatprep.mubr.msk.f32.mxu1 %vm323_vm1, %v17815_v42  ;;  %14840 = vmatprep.mubr.msk.f32.mxu0 %vm323_vm1, %v3731_v25  ;;  %v3745_v42 = vld [vmem:[%s17217_s14 + $0xb6] sm:$0xff]  ;;  %4210 = vst.msk [vmem:[#allocation2 + $0x80] sm:$0xff] %vm4193_vm2, %v17140_v20  ;;  %4211 = vst.msk [vmem:[#allocation2 + $0x88] sm:$0xff] %vm4193_vm2, %v17140_v20  ;;  %v4292_v21 = vld [vmem:[#allocation2] sm:$0xff] }
 0x115   : > { %4212 = vst.msk [vmem:[#allocation2 + $0x90] sm:$0xff] %vm4193_vm2, %v17140_v20  ;;  %4213 = vst.msk [vmem:[#allocation2 + $0x98] sm:$0xff] %vm4193_vm2, %v17140_v20  ;;  %v4293_v22 = vld [vmem:[#allocation2 + $0x8] sm:$0xff] }
 0x116   : > { %4214 = vst.msk [vmem:[#allocation2 + $0xa0] sm:$0xff] %vm4193_vm2, %v17140_v20  ;;  %4215 = vst.msk [vmem:[#allocation2 + $0xa8] sm:$0xff] %vm4193_vm2, %v17140_v20  ;;  %v12652_v24 = vld [vmem:[%s19775_s3 + $0x28] sm:$0xff] }
 0x117   : > { %14588 = vmatmul.mubr.msk.f32.gmra.mrb[22].mxu1 %vm323_vm1, %v17825_v44  ;;  %14841 = vmatmul.mubr.msk.f32.gmra.mrb[4].mxu0 %vm323_vm1, %v3732_v26  ;;  %v3746_v44 = vld [vmem:[%s17217_s14 + $0xbe] sm:$0xff]  ;;  %4216 = vst.msk [vmem:[#allocation2 + $0xb0] sm:$0xff] %vm4193_vm2, %v17140_v20  ;;  %4217 = vst.msk [vmem:[#allocation2 + $0xb8] sm:$0xff] %vm4193_vm2, %v17140_v20  ;;  %v16012_v25 = vpack.c.bf16 %v12652_v24, %v12651_v23  ;;  %v12653_v26 = vld [vmem:[%s19775_s3 + $0x30] sm:$0xff] }
 0x118   : > { %14590 = vmatprep.mubr.msk.f32.mxu1 %vm323_vm1, %v17829_v46  ;;  %14843 = vmatprep.mubr.msk.f32.mxu0 %vm323_vm1, %v3733_v27  ;;  %v3747_v46 = vld [vmem:[%s17217_s14 + $0xc6] sm:$0xff]  ;;  %4218 = vst.msk [vmem:[#allocation2 + $0xc0] sm:$0xff] %vm4193_vm2, %v17140_v20  ;;  %4219 = vst.msk [vmem:[#allocation2 + $0xc8] sm:$0xff] %vm4193_vm2, %v17140_v20  ;;  %v12654_v27 = vld [vmem:[%s19775_s3 + $0x38] sm:$0xff] }
 0x119   : > { %4220 = vst.msk [vmem:[#allocation2 + $0xd0] sm:$0xff] %vm4193_vm2, %v17140_v20  ;;  %4221 = vst.msk [vmem:[#allocation2 + $0xd8] sm:$0xff] %vm4193_vm2, %v17140_v20 }
 0x11a   : > { %4222 = vst.msk [vmem:[#allocation2 + $0xe0] sm:$0xff] %vm4193_vm2, %v17140_v20  ;;  %4223 = vst.msk [vmem:[#allocation2 + $0xe8] sm:$0xff] %vm4193_vm2, %v17140_v20 }
 0x11b   : > { %14591 = vmatmul.mubr.msk.f32.gmra.mrb[24].mxu1 %vm323_vm1, %v17839_v51  ;;  %14844 = vmatmul.mubr.msk.f32.gmra.mrb[6].mxu0 %vm323_vm1, %v3734_v11  ;;  %v3748_v51 = vld [vmem:[%s17217_s14 + $0xce] sm:$0xff]  ;;  %4224 = vst.msk [vmem:[#allocation2 + $0xf0] sm:$0xff] %vm4193_vm2, %v17140_v20  ;;  %4225 = vst.msk [vmem:[#allocation2 + $0xf8] sm:$0xff] %vm4193_vm2, %v17140_v20  ;;  %v16016_v11 = vpack.c.bf16 %v12654_v27, %v12653_v26 }
 0x11c   : > { %14593 = vmatprep.mubr.msk.f32.mxu1 %vm323_vm1, %v17843_v55  ;;  %14846 = vmatprep.mubr.msk.f32.mxu0 %vm323_vm1, %v3735_v28  ;;  %v3749_v55 = vld [vmem:[%s17217_s14 + $0xd6] sm:$0xff]  ;;  %4226 = vst.msk [vmem:[#allocation2 + $0x100] sm:$0xff] %vm4193_vm2, %v17140_v20  ;;  %4227 = vst.msk [vmem:[#allocation2 + $0x108] sm:$0xff] %vm4193_vm2, %v17140_v20  ;;  %v12691_v28 = vld [vmem:[%s19775_s3 + $0x40] sm:$0xff] }
 0x11d   : > { %4228 = vst.msk [vmem:[#allocation2 + $0x110] sm:$0xff] %vm4193_vm2, %v17140_v20  ;;  %4229 = vst.msk [vmem:[#allocation2 + $0x118] sm:$0xff] %vm4193_vm2, %v17140_v20 }
 0x11e   : > { %4230 = vst.msk [vmem:[#allocation2 + $0x120] sm:$0xff] %vm4193_vm2, %v17140_v20  ;;  %4231 = vst.msk [vmem:[#allocation2 + $0x128] sm:$0xff] %vm4193_vm2, %v17140_v20 }
 0x11f   : > { %14594 = vmatmul.mubr.msk.f32.gmra.mrb[26].mxu1 %vm323_vm1, %v17853_v59  ;;  %14847 = vmatmul.mubr.msk.f32.gmra.mrb[8].mxu0 %vm323_vm1, %v3736_v29  ;;  %v3750_v59 = vld [vmem:[%s17217_s14 + $0xde] sm:$0xff]  ;;  %4232 = vst.msk [vmem:[#allocation2 + $0x130] sm:$0xff] %vm4193_vm2, %v17140_v20  ;;  %4233 = vst.msk [vmem:[#allocation2 + $0x138] sm:$0xff] %vm4193_vm2, %v17140_v20  ;;  %v12692_v29 = vld [vmem:[%s19775_s3 + $0x48] sm:$0xff] }
 0x120   : > { %14596 = vmatprep.mubr.msk.f32.mxu1 %vm323_vm1, %v17857_v63  ;;  %14849 = vmatprep.mubr.msk.f32.mxu0 %vm323_vm1, %v3737_v30  ;;  %v3751_v63 = vld [vmem:[%s17217_s14 + $0xe6] sm:$0xff]  ;;  %8197 = vst.msk [vmem:[#allocation3] sm:$0xff] %vm4193_vm2, %v17140_v20  ;;  %8198 = vst.msk [vmem:[#allocation3 + $0x8] sm:$0xff] %vm4193_vm2, %v17140_v20  ;;  %v18312_v30 = vpack.c.bf16 %v12692_v29, %v12691_v28 }
 0x121   : > { %8199 = vst.msk [vmem:[#allocation3 + $0x10] sm:$0xff] %vm4193_vm2, %v17140_v20  ;;  %8200 = vst.msk [vmem:[#allocation3 + $0x18] sm:$0xff] %vm4193_vm2, %v17140_v20 }
 0x122   : > { %8201 = vst.msk [vmem:[#allocation3 + $0x20] sm:$0xff] %vm4193_vm2, %v17140_v20  ;;  %8202 = vst.msk [vmem:[#allocation3 + $0x28] sm:$0xff] %vm4193_vm2, %v17140_v20 }
 0x123   : > { %14597 = vmatmul.mubr.msk.f32.gmra.mrb[28].mxu1 %vm323_vm1, %v17867_v4  ;;  %14850 = vmatmul.mubr.msk.f32.gmra.mrb[10].mxu0 %vm323_vm1, %v3738_v31  ;;  %v3752_v4 = vld [vmem:[%s17217_s14 + $0xee] sm:$0xff]  ;;  %8203 = vst.msk [vmem:[#allocation3 + $0x30] sm:$0xff] %vm4193_vm2, %v17140_v20  ;;  %8204 = vst.msk [vmem:[#allocation3 + $0x38] sm:$0xff] %vm4193_vm2, %v17140_v20 }
 0x124   : > { %14599 = vmatprep.mubr.msk.f32.mxu1 %vm323_vm1, %v17871_v6  ;;  %14852 = vmatprep.mubr.msk.f32.mxu0 %vm323_vm1, %v3739_v32  ;;  %v3753_v6 = vld [vmem:[%s17217_s14 + $0xf6] sm:$0xff]  ;;  %8205 = vst.msk [vmem:[#allocation3 + $0x40] sm:$0xff] %vm4193_vm2, %v17140_v20  ;;  %8206 = vst.msk [vmem:[#allocation3 + $0x48] sm:$0xff] %vm4193_vm2, %v17140_v20 }
 0x125   : > { %8207 = vst.msk [vmem:[#allocation3 + $0x50] sm:$0xff] %vm4193_vm2, %v17140_v20  ;;  %8208 = vst.msk [vmem:[#allocation3 + $0x58] sm:$0xff] %vm4193_vm2, %v17140_v20 }
 0x126   : > { %8209 = vst.msk [vmem:[#allocation3 + $0x60] sm:$0xff] %vm4193_vm2, %v17140_v20  ;;  %8210 = vst.msk [vmem:[#allocation3 + $0x68] sm:$0xff] %vm4193_vm2, %v17140_v20 }
 0x127   : > { %14600 = vmatmul.mubr.msk.f32.gmra.mrb[30].mxu1 %vm323_vm1, %v17881_v50  ;;  %14853 = vmatmul.mubr.msk.f32.gmra.mrb[12].mxu0 %vm323_vm1, %v3740_v33  ;;  %v3754_v50 = vld [vmem:[%s17217_s14 + $0xfe] sm:$0xff]  ;;  %8211 = vst.msk [vmem:[#allocation3 + $0x70] sm:$0xff] %vm4193_vm2, %v17140_v20  ;;  %8212 = vst.msk [vmem:[#allocation3 + $0x78] sm:$0xff] %vm4193_vm2, %v17140_v20 }
 0x128   : > { %14602 = vmatprep.mubr.msk.f32.mxu1 %vm323_vm1, %v17885_v54  ;;  %14855 = vmatprep.mubr.msk.f32.mxu0 %vm323_vm1, %v3741_v34  ;;  %v3755_v54 = vld [vmem:[%s17217_s14 + $0x106] sm:$0xff]  ;;  %8213 = vst.msk [vmem:[#allocation3 + $0x80] sm:$0xff] %vm4193_vm2, %v17140_v20  ;;  %8214 = vst.msk [vmem:[#allocation3 + $0x88] sm:$0xff] %vm4193_vm2, %v17140_v20 }
 0x129   : > { %8215 = vst.msk [vmem:[#allocation3 + $0x90] sm:$0xff] %vm4193_vm2, %v17140_v20  ;;  %8216 = vst.msk [vmem:[#allocation3 + $0x98] sm:$0xff] %vm4193_vm2, %v17140_v20 }
 0x12a   : > { %8217 = vst.msk [vmem:[#allocation3 + $0xa0] sm:$0xff] %vm4193_vm2, %v17140_v20  ;;  %8218 = vst.msk [vmem:[#allocation3 + $0xa8] sm:$0xff] %vm4193_vm2, %v17140_v20 }
 0x12b   : > { %14603 = vmatmul.mubr.msk.f32.gmra.mrb[32].mxu1 %vm323_vm1, %v1610_v35  ;;  %14856 = vmatmul.mubr.msk.f32.gmra.mrb[14].mxu0 %vm323_vm1, %v3742_v36  ;;  %8219 = vst.msk [vmem:[#allocation3 + $0xb0] sm:$0xff] %vm4193_vm2, %v17140_v20  ;;  %8220 = vst.msk [vmem:[#allocation3 + $0xb8] sm:$0xff] %vm4193_vm2, %v17140_v20 }
 0x12c   : > { %14605 = vmatprep.mubr.msk.f32.mxu1 %vm323_vm1, %v1611_v37  ;;  %14858 = vmatprep.mubr.msk.f32.mxu0 %vm323_vm1, %v3743_v38  ;;  %8221 = vst.msk [vmem:[#allocation3 + $0xc0] sm:$0xff] %vm4193_vm2, %v17140_v20  ;;  %8222 = vst.msk [vmem:[#allocation3 + $0xc8] sm:$0xff] %vm4193_vm2, %v17140_v20 }
 0x12d   : > { %8223 = vst.msk [vmem:[#allocation3 + $0xd0] sm:$0xff] %vm4193_vm2, %v17140_v20  ;;  %8224 = vst.msk [vmem:[#allocation3 + $0xd8] sm:$0xff] %vm4193_vm2, %v17140_v20 }
 0x12e   : > { %8225 = vst.msk [vmem:[#allocation3 + $0xe0] sm:$0xff] %vm4193_vm2, %v17140_v20  ;;  %8226 = vst.msk [vmem:[#allocation3 + $0xe8] sm:$0xff] %vm4193_vm2, %v17140_v20 }
 0x12f   : > { %14606 = vmatmul.mubr.msk.f32.gmra.mrb[34].mxu1 %vm323_vm1, %v1612_v39  ;;  %14859 = vmatmul.mubr.msk.f32.gmra.mrb[16].mxu0 %vm323_vm1, %v3744_v40  ;;  %8227 = vst.msk [vmem:[#allocation3 + $0xf0] sm:$0xff] %vm4193_vm2, %v17140_v20  ;;  %8228 = vst.msk [vmem:[#allocation3 + $0xf8] sm:$0xff] %vm4193_vm2, %v17140_v20 }
 0x130   : > { %14637 = vmatprep.mubr.msk.f32.mxu1 %vm323_vm1, %v2025_v41  ;;  %14861 = vmatprep.mubr.msk.f32.mxu0 %vm323_vm1, %v3745_v42  ;;  %8229 = vst.msk [vmem:[#allocation3 + $0x100] sm:$0xff] %vm4193_vm2, %v17140_v20  ;;  %8230 = vst.msk [vmem:[#allocation3 + $0x108] sm:$0xff] %vm4193_vm2, %v17140_v20 }
 0x131   : > { %8231 = vst.msk [vmem:[#allocation3 + $0x110] sm:$0xff] %vm4193_vm2, %v17140_v20  ;;  %8232 = vst.msk [vmem:[#allocation3 + $0x118] sm:$0xff] %vm4193_vm2, %v17140_v20 }
 0x132   : > { %8233 = vst.msk [vmem:[#allocation3 + $0x120] sm:$0xff] %vm4193_vm2, %v17140_v20  ;;  %8234 = vst.msk [vmem:[#allocation3 + $0x128] sm:$0xff] %vm4193_vm2, %v17140_v20 }
 0x133   : > { %14638 = vmatmul.mubr.msk.f32.vlgmr.msra.gmra.mrb[18].mxu1 %vm323_vm1, %v2026_v43  ;;  %14862 = vmatmul.mubr.msk.f32.gmra.mrb[18].mxu0 %vm323_vm1, %v3746_v44  ;;  %8235 = vst.msk [vmem:[#allocation3 + $0x130] sm:$0xff] %vm4193_vm2, %v17140_v20  ;;  %8236 = vst.msk [vmem:[#allocation3 + $0x138] sm:$0xff] %vm4193_vm2, %v17140_v20 }
 0x134   : > { %14640 = vmatprep.mubr.msk.f32.mxu1 %vm323_vm1, %v2027_v45  ;;  %14864 = vmatprep.mubr.msk.f32.mxu0 %vm323_vm1, %v3747_v46  ;;  %4235 = vst.msk [vmem:[#allocation2 + $0x140] sm:$0xf] %vm4234_vm3, %v17140_v20  ;;  %8237 = vst.msk [vmem:[#allocation3 + $0x140] sm:$0xf] %vm4234_vm3, %v17140_v20 }
 0x135   : > { %16007 = vmatpush3.bf16.msra.mxu1 %v16004_v12 }
 0x136   : > { %16009 = vmatprep.subr.bf16.mxu1 %v16008_v19 }
 0x137   : > { %14641 = vmatmul.mubr.msk.f32.gmra.mrb[20].mxu1 %vm323_vm1, %v2028_v49  ;;  %14865 = vmatmul.mubr.msk.f32.gmra.mrb[20].mxu0 %vm323_vm1, %v3748_v51  ;;  %v18330_v49 = vld [vmem:[%s19774_s2] ss:$0 sm:$0xff] }
 0x138   : > { %14643 = vmatprep.mubr.msk.f32.mxu1 %vm323_vm1, %v2029_v53  ;;  %14867 = vmatprep.mubr.msk.f32.mxu0 %vm323_vm1, %v3749_v55 }
 0x139   : > { %16011 = vmatpush3.bf16.msra.mxu1 %v16008_v19 }
 0x13a   : > { %16013 = vmatprep.subr.bf16.mxu1 %v16012_v25 }
 0x13b   : > { %14644 = vmatmul.mubr.msk.f32.gmra.mrb[22].mxu1 %vm323_vm1, %v2030_v57  ;;  %14868 = vmatmul.mubr.msk.f32.gmra.mrb[22].mxu0 %vm323_vm1, %v3750_v59 }
 0x13c   : > { %14646 = vmatprep.mubr.msk.f32.mxu1 %vm323_vm1, %v2031_v61  ;;  %14870 = vmatprep.mubr.msk.f32.mxu0 %vm323_vm1, %v3751_v63 }
 0x13f   : > { %14647 = vmatmul.mubr.msk.f32.gmra.mrb[24].mxu1 %vm323_vm1, %v2032_v2  ;;  %14871 = vmatmul.mubr.msk.f32.gmra.mrb[24].mxu0 %vm323_vm1, %v3752_v4 }
 0x140   : > { %14649 = vmatprep.mubr.msk.f32.mxu1 %vm323_vm1, %v2033_v47  ;;  %14873 = vmatprep.mubr.msk.f32.mxu0 %vm323_vm1, %v3753_v6 }
 0x143   : > { %14650 = vmatmul.mubr.msk.f32.gmra.mrb[26].mxu1 %vm323_vm1, %v2034_v48  ;;  %14874 = vmatmul.mubr.msk.f32.gmra.mrb[26].mxu0 %vm323_vm1, %v3754_v50 }
 0x144   : > { %14652 = vmatprep.mubr.msk.f32.mxu1 %vm323_vm1, %v2035_v52  ;;  %14876 = vmatprep.mubr.msk.f32.mxu0 %vm323_vm1, %v3755_v54 }
 0x147   : > { %14653 = vmatmul.mubr.msk.f32.gmra.mrb[28].mxu1 %vm323_vm1, %v2036_v56  ;;  %14877 = vmatmul.mubr.msk.f32.gmra.mrb[28].mxu0 %vm323_vm1, %v3756_v58 }
 0x148   : > { %14655 = vmatprep.mubr.msk.f32.mxu1 %vm323_vm1, %v2037_v60  ;;  %14879 = vmatprep.mubr.msk.f32.mxu0 %vm323_vm1, %v3757_v62 }
 0x14b   : > { %14656 = vmatmul.mubr.msk.f32.gmra.mrb[30].mxu1 %vm323_vm1, %v2038_v0  ;;  %14880 = vmatmul.mubr.msk.f32.gmra.mrb[30].mxu0 %vm323_vm1, %v3758_v3 }
 0x14c   : > { %14658 = vmatprep.mubr.msk.f32.mxu1 %vm323_vm1, %v2039_v5  ;;  %14882 = vmatprep.mubr.msk.f32.mxu0 %vm323_vm1, %v3759_v7 }
 0x14f   : > { %14659 = vmatmul.mubr.msk.f32.gmra.mrb[32].mxu1 %vm323_vm1, %v2040_v9  ;;  %14883 = vmatmul.mubr.msk.f32.gmra.mrb[32].mxu0 %vm323_vm1, %v3760_v10 }
 0x150   : > { %14661 = vmatprep.mubr.msk.f32.mxu1 %vm323_vm1, %v2041_v13  ;;  %14885 = vmatprep.mubr.msk.f32.mxu0 %vm323_vm1, %v3761_v14 }
 0x153   : > { %14662 = vmatmul.mubr.msk.f32.gmra.mrb[34].mxu1 %vm323_vm1, %v2042_v15  ;;  %14886 = vmatmul.mubr.msk.f32.gmra.mrb[34].mxu0 %vm323_vm1, %v3762_v16 }
 0x154   : > { %14896 = vmatprep.mubr.msk.f32.mxu1 %vm4193_vm2, %v4292_v21 }
 0x157   : > { %14897 = vmatmul.mubr.msk.f32.vlgmr.msra.gmra.mrb[36].mxu1 %vm4193_vm2, %v4293_v22 }
 0x158   : > { %16015 = vmatpush3.bf16.msra.mxu1 %v16012_v25 }
 0x159   : > { %16017 = vmatprep.subr.bf16.mxu1 %v16016_v11 }
 0x15c   : > { %16019 = vmatpush3.bf16.msra.mxu1 %v16016_v11 }
 0x15d   : > { %16021 = vmatprep.subr.bf16.mxu1 %v18312_v30 }
 0x1be   : > { %v14556_v31 = vpop.f32.mrb[0].mxu1 }
 0x1bf   : > { %v1792_v32 = vpop.f32.mrb[1].mxu1  ;;  %v16150_v55 = vadd.f32 %v14556_v31, %v18330_v49 }
 0x1c0   : > { %v16152_v57 = vadd.f32 %v18330_v49, %v1792_v32 }
 0x1c2   : > { %v14559_v33 = vpop.f32.mrb[2].mxu1 }
 0x1c3   : > { %v1802_v34 = vpop.f32.mrb[3].mxu1  ;;  %v16154_v4 = vadd.f32 %v14559_v33, %v18330_v49 }
 0x1c4   : > { %v16156_v6 = vadd.f32 %v18330_v49, %v1802_v34 }
 0x1c6   : > { %v14562_v35 = vpop.f32.mrb[4].mxu1 }
 0x1c7   : > { %v1812_v36 = vpop.f32.mrb[5].mxu1  ;;  %v16158_v58 = vadd.f32 %v14562_v35, %v18330_v49 }
 0x1c8   : > { %v16160_v62 = vadd.f32 %v18330_v49, %v1812_v36 }
 0x1ca   : > { %v14565_v37 = vpop.f32.mrb[6].mxu1 }
 0x1cb   : > { %v1822_v38 = vpop.f32.mrb[7].mxu1  ;;  %v16162_v8 = vadd.f32 %v14565_v37, %v18330_v49 }
 0x1cc   : > { %v16164_v10 = vadd.f32 %v18330_v49, %v1822_v38 }
 0x1ce   : > { %v14568_v39 = vpop.f32.mrb[8].mxu1 }
 0x1cf   : > { %v1832_v40 = vpop.f32.mrb[9].mxu1  ;;  %v16166_v19 = vadd.f32 %v14568_v39, %v18330_v49 }
 0x1d0   : > { %v16168_v21 = vadd.f32 %v18330_v49, %v1832_v40 }
 0x1d2   : > { %v18315_v41 = vpop.f32.mrb[10].mxu1 }
 0x1d3   : > { %v18317_v42 = vpop.f32.mrb[11].mxu1  ;;  %v16170_v28 = vadd.f32 %v18315_v41, %v18330_v49 }
 0x1d4   : > { %v16172_v31 = vadd.f32 %v18330_v49, %v18317_v42 }
 0x1d6   : > { %v18319_v43 = vpop.f32.mrb[12].mxu1 }
 0x1d7   : > { %v18321_v44 = vpop.f32.mrb[13].mxu1  ;;  %v16174_v39 = vadd.f32 %v18319_v43, %v18330_v49 }
 0x1d8   : > { %v16176_v41 = vadd.f32 %v18330_v49, %v18321_v44 }
 0x1da   : > { %v18323_v45 = vpop.f32.mrb[14].mxu1 }
 0x1db   : > { %v18325_v46 = vpop.f32.mrb[15].mxu1  ;;  %v16178_v43 = vadd.f32 %v18323_v45, %v18330_v49 }
 0x1dc   : > { %v16180_v44 = vadd.f32 %v18330_v49, %v18325_v46 }
 0x1de   : > { %v18332_v51 = vpop.f32.mrb[16].mxu1 }
 0x1df   : > { %v18334_v53 = vpop.f32.mrb[17].mxu1  ;;  %v16182_v45 = vadd.f32 %v18332_v51, %v18330_v49 }
 0x1e0   : > { %v16184_v46 = vadd.f32 %v18330_v49, %v18334_v53 }
 0x1e2   : > { %v14836_v59 = vpop.f32.mrb[0].mxu0 }
 0x1e3   : > { %v16151_v61 = vadd.f32 %v16150_v55, %v14836_v59  ;;  %v3942_v63 = vpop.f32.mrb[1].mxu0 }
 0x1e4   : > { %v16153_v2 = vadd.f32 %v16152_v57, %v3942_v63 }
 0x1e5   : > { %v4158_v47 = vmax.f32 %v16151_v61, 0.0 }
 0x1e6   : > { %v4157_v48 = vmax.f32 %v16153_v2, 0.0  ;;  %v14839_v50 = vpop.f32.mrb[2].mxu0 }
 0x1e7   : > { %4237 = vst.msk [vmem:[#allocation2 + $0x1b] sm:$0xff] %vm4193_vm2, %v4158_v47  ;;  %v16155_v52 = vadd.f32 %v16154_v4, %v14839_v50  ;;  %v3952_v54 = vpop.f32.mrb[3].mxu0 }
 0x1e8   : > { %4236 = vst.msk [vmem:[#allocation2 + $0x13] sm:$0xff] %vm4193_vm2, %v4157_v48  ;;  %v16157_v56 = vadd.f32 %v16156_v6, %v3952_v54 }
 0x1e9   : > { %v4160_v60 = vmax.f32 %v16155_v52, 0.0 }
 0x1ea   : > { %v4159_v0 = vmax.f32 %v16157_v56, 0.0  ;;  %v14842_v3 = vpop.f32.mrb[4].mxu0 }
 0x1eb   : > { %4240 = vst.msk [vmem:[#allocation2 + $0x2b] sm:$0xff] %vm4193_vm2, %v4160_v60  ;;  %v16159_v5 = vadd.f32 %v16158_v58, %v14842_v3  ;;  %v3962_v7 = vpop.f32.mrb[5].mxu0 }
 0x1ec   : > { %4239 = vst.msk [vmem:[#allocation2 + $0x23] sm:$0xfc] %vm4238_vm4, %v4159_v0  ;;  %v16161_v1 = vadd.f32 %v16160_v62, %v3962_v7 }
 0x1ed   : > { %v4162_v9 = vmax.f32 %v16159_v5, 0.0 }
 0x1ee   : > { %v4161_v12 = vmax.f32 %v16161_v1, 0.0  ;;  %v14845_v13 = vpop.f32.mrb[6].mxu0 }
 0x1ef   : > { %4245 = vst.msk [vmem:[#allocation2 + $0x3b] sm:$0xff] %vm4193_vm2, %v4162_v9  ;;  %v16163_v14 = vadd.f32 %v16162_v8, %v14845_v13  ;;  %v3972_v15 = vpop.f32.mrb[7].mxu0  ;;  %v4294_v16 = vld [vmem:[#allocation2 + $0x10] sm:$0xff]  ;;  %v4295_v17 = vld [vmem:[#allocation2 + $0x18] sm:$0xff] }
 0x1f0   : > { %4242 = vst.msk [vmem:[#allocation2 + $0x33] sm:$0x3] %vm4241_vm5, %v4161_v12  ;;  %v16165_v18 = vadd.f32 %v16164_v10, %v3972_v15  ;;  %14899 = vmatprep.mubr.msk.f32.mxu1 %vm4193_vm2, %v4294_v16 }
 0x1f1   : > { %4244 = vst.msk [vmem:[#allocation2 + $0x33] sm:$0xf0] %vm4243_vm6, %v4161_v12  ;;  %v4164_v20 = vmax.f32 %v16163_v14, 0.0  ;;  %14900 = vmatmul.mubr.msk.f32.gmra.mrb[38].mxu1 %vm4193_vm2, %v4295_v17 }
 0x1f2   : > { %v4163_v22 = vmax.f32 %v16165_v18, 0.0  ;;  %v14848_v23 = vpop.f32.mrb[8].mxu0 }
 0x1f3   : > { %4249 = vst.msk [vmem:[#allocation2 + $0x4b] sm:$0xff] %vm4193_vm2, %v4164_v20  ;;  %v16167_v24 = vadd.f32 %v16166_v19, %v14848_v23  ;;  %v3982_v25 = vpop.f32.mrb[9].mxu0  ;;  %v4296_v26 = vld [vmem:[#allocation2 + $0x20] sm:$0xff]  ;;  %v4297_v27 = vld [vmem:[#allocation2 + $0x28] sm:$0xff] }
 0x1f4   : > { %4246 = vst.msk [vmem:[#allocation2 + $0x43] sm:$0xf] %vm4234_vm3, %v4163_v22  ;;  %v16169_v11 = vadd.f32 %v16168_v21, %v3982_v25  ;;  %14902 = vmatprep.mubr.msk.f32.mxu1 %vm4193_vm2, %v4296_v26 }
 0x1f5   : > { %4248 = vst.msk [vmem:[#allocation2 + $0x43] sm:$0xc0] %vm4247_vm7, %v4163_v22  ;;  %v4166_v29 = vmax.f32 %v16167_v24, 0.0  ;;  %14903 = vmatmul.mubr.msk.f32.gmra.mrb[40].mxu1 %vm4193_vm2, %v4297_v27 }
 0x1f6   : > { %v4165_v32 = vmax.f32 %v16169_v11, 0.0  ;;  %v14851_v33 = vpop.f32.mrb[10].mxu0 }
 0x1f7   : > { %4252 = vst.msk [vmem:[#allocation2 + $0x5b] sm:$0xff] %vm4193_vm2, %v4166_v29  ;;  %v16171_v34 = vadd.f32 %v16170_v28, %v14851_v33  ;;  %v3992_v35 = vpop.f32.mrb[11].mxu0 }
 0x1f8   : > { %v4298_v36 = vld [vmem:[#allocation2 + $0x30] sm:$0xff]  ;;  %v4299_v37 = vld [vmem:[#allocation2 + $0x38] sm:$0xff]  ;;  %4251 = vst.msk [vmem:[#allocation2 + $0x53] sm:$0x3f] %vm4250_vm8, %v4165_v32  ;;  %v16173_v38 = vadd.f32 %v16172_v31, %v3992_v35 }
 0x1f9   : > { %14905 = vmatprep.mubr.msk.f32.mxu1 %vm4193_vm2, %v4298_v36  ;;  %v4168_v40 = vmax.f32 %v16171_v34, 0.0 }
 0x1fa   : > { %14906 = vmatmul.mubr.msk.f32.gmra.mrb[42].mxu1 %vm4193_vm2, %v4299_v37  ;;  %v4167_v42 = vmax.f32 %v16173_v38, 0.0  ;;  %v14854_v55 = vpop.f32.mrb[12].mxu0 }
 0x1fb   : > { %4254 = vst.msk [vmem:[#allocation2 + $0x6b] sm:$0xfc] %vm4238_vm4, %v4168_v40  ;;  %v16175_v57 = vadd.f32 %v16174_v39, %v14854_v55  ;;  %v4002_v59 = vpop.f32.mrb[13].mxu0  ;;  %v4300_v61 = vld [vmem:[#allocation2 + $0x40] sm:$0xff] }
 0x1fc   : > { %v4301_v63 = vld [vmem:[#allocation2 + $0x48] sm:$0xff]  ;;  %4253 = vst.msk [vmem:[#allocation2 + $0x63] sm:$0xff] %vm4193_vm2, %v4167_v42  ;;  %v16177_v2 = vadd.f32 %v16176_v41, %v4002_v59  ;;  %14908 = vmatprep.mubr.msk.f32.mxu1 %vm4193_vm2, %v4300_v61 }
 0x1fd   : > { %v4170_v4 = vmax.f32 %v16175_v57, 0.0 }
 0x1fe   : > { %14909 = vmatmul.mubr.msk.f32.gmra.mrb[44].mxu1 %vm4193_vm2, %v4301_v63  ;;  %v4169_v47 = vmax.f32 %v16177_v2, 0.0  ;;  %v14857_v6 = vpop.f32.mrb[14].mxu0 }
 0x1ff   : > { %4256 = vst.msk [vmem:[#allocation2 + $0x7b] sm:$0x3] %vm4241_vm5, %v4170_v4  ;;  %v16179_v48 = vadd.f32 %v16178_v43, %v14857_v6  ;;  %v4012_v50 = vpop.f32.mrb[15].mxu0  ;;  %v4302_v52 = vld [vmem:[#allocation2 + $0x50] sm:$0xff]  ;;  %v4303_v54 = vld [vmem:[#allocation2 + $0x58] sm:$0xff] }
 0x200   : > { %4257 = vst.msk [vmem:[#allocation2 + $0x7b] sm:$0xf0] %vm4243_vm6, %v4170_v4  ;;  %v16181_v56 = vadd.f32 %v16180_v44, %v4012_v50  ;;  %14911 = vmatprep.mubr.msk.f32.mxu1 %vm4193_vm2, %v4302_v52 }
 0x201   : > { %4255 = vst.msk [vmem:[#allocation2 + $0x73] sm:$0xff] %vm4193_vm2, %v4169_v47  ;;  %v4172_v58 = vmax.f32 %v16179_v48, 0.0 }
 0x202   : > { %14912 = vmatmul.mubr.msk.f32.gmra.mrb[46].mxu1 %vm4193_vm2, %v4303_v54  ;;  %v4171_v60 = vmax.f32 %v16181_v56, 0.0  ;;  %v14860_v62 = vpop.f32.mrb[16].mxu0 }
 0x203   : > { %4259 = vst.msk [vmem:[#allocation2 + $0x8b] sm:$0xf] %vm4234_vm3, %v4172_v58  ;;  %v16183_v0 = vadd.f32 %v16182_v45, %v14860_v62  ;;  %v4022_v3 = vpop.f32.mrb[17].mxu0  ;;  %v4304_v5 = vld [vmem:[#allocation2 + $0x60] sm:$0xff]  ;;  %v4305_v7 = vld [vmem:[#allocation2 + $0x68] sm:$0xff] }
 0x204   : > { %4260 = vst.msk [vmem:[#allocation2 + $0x8b] sm:$0xc0] %vm4247_vm7, %v4172_v58  ;;  %v16185_v1 = vadd.f32 %v16184_v46, %v4022_v3  ;;  %14914 = vmatprep.mubr.msk.f32.mxu1 %vm4193_vm2, %v4304_v5 }
 0x205   : > { %4258 = vst.msk [vmem:[#allocation2 + $0x83] sm:$0xff] %vm4193_vm2, %v4171_v60  ;;  %v4174_v51 = vmax.f32 %v16183_v0, 0.0 }
 0x206   : > { %14915 = vmatmul.mubr.msk.f32.gmra.mrb[48].mxu1 %vm4193_vm2, %v4305_v7  ;;  %v4173_v8 = vmax.f32 %v16185_v1, 0.0  ;;  %v14639_v53 = vpop.f32.mrb[18].mxu1  ;;  %v14863_v9 = vpop.f32.mrb[18].mxu0 }
 0x207   : > { %4262 = vst.msk [vmem:[#allocation2 + $0x9b] sm:$0x3f] %vm4250_vm8, %v4174_v51  ;;  %v16186_v10 = vadd.f32 %v14639_v53, %v18330_v49  ;;  %v2312_v12 = vpop.f32.mrb[19].mxu1  ;;  %v4032_v13 = vpop.f32.mrb[19].mxu0 }
 0x208   : > { %v4306_v14 = vld [vmem:[#allocation2 + $0x70] sm:$0xff]  ;;  %v4307_v15 = vld [vmem:[#allocation2 + $0x78] sm:$0xff]  ;;  %4261 = vst.msk [vmem:[#allocation2 + $0x93] sm:$0xff] %vm4193_vm2, %v4173_v8  ;;  %v16188_v16 = vadd.f32 %v18330_v49, %v2312_v12 }
 0x209   : > { %14917 = vmatprep.mubr.msk.f32.mxu1 %vm4193_vm2, %v4306_v14  ;;  %v16187_v17 = vadd.f32 %v16186_v10, %v14863_v9 }
 0x20a   : > { %14918 = vmatmul.mubr.msk.f32.gmra.mrb[50].mxu1 %vm4193_vm2, %v4307_v15  ;;  %v16189_v18 = vadd.f32 %v16188_v16, %v4032_v13  ;;  %v14642_v19 = vpop.f32.mrb[20].mxu1  ;;  %v14866_v20 = vpop.f32.mrb[20].mxu0 }
 0x20b   : > { %v4176_v21 = vmax.f32 %v16187_v17, 0.0  ;;  %v16190_v22 = vadd.f32 %v14642_v19, %v18330_v49  ;;  %v2322_v23 = vpop.f32.mrb[21].mxu1  ;;  %v4042_v24 = vpop.f32.mrb[21].mxu0 }
 0x20c   : > { %v4308_v25 = vld [vmem:[#allocation2 + $0x80] sm:$0xff]  ;;  %v4309_v26 = vld [vmem:[#allocation2 + $0x88] sm:$0xff]  ;;  %v4175_v27 = vmax.f32 %v16189_v18, 0.0  ;;  %v16192_v11 = vadd.f32 %v18330_v49, %v2322_v23 }
 0x20d   : > { %14920 = vmatprep.mubr.msk.f32.mxu1 %vm4193_vm2, %v4308_v25  ;;  %4264 = vst.msk [vmem:[#allocation2 + $0xab] sm:$0xff] %vm4193_vm2, %v4176_v21  ;;  %v16191_v28 = vadd.f32 %v16190_v22, %v14866_v20 }
 0x20e   : > { %14921 = vmatmul.mubr.msk.f32.gmra.mrb[52].mxu1 %vm4193_vm2, %v4309_v26  ;;  %4263 = vst.msk [vmem:[#allocation2 + $0xa3] sm:$0xff] %vm4193_vm2, %v4175_v27  ;;  %v16193_v29 = vadd.f32 %v16192_v11, %v4042_v24  ;;  %v14645_v31 = vpop.f32.mrb[22].mxu1  ;;  %v14869_v32 = vpop.f32.mrb[22].mxu0 }
 0x20f   : > { %v4178_v33 = vmax.f32 %v16191_v28, 0.0  ;;  %v16194_v34 = vadd.f32 %v14645_v31, %v18330_v49  ;;  %v2332_v35 = vpop.f32.mrb[23].mxu1  ;;  %v4052_v36 = vpop.f32.mrb[23].mxu0  ;;  %v4310_v37 = vld [vmem:[#allocation2 + $0x90] sm:$0xff]  ;;  %v4311_v38 = vld [vmem:[#allocation2 + $0x98] sm:$0xff] }
 0x210   : > { %v4177_v39 = vmax.f32 %v16193_v29, 0.0  ;;  %v16196_v40 = vadd.f32 %v18330_v49, %v2332_v35  ;;  %14923 = vmatprep.mubr.msk.f32.mxu1 %vm4193_vm2, %v4310_v37 }
 0x211   : > { %4266 = vst.msk [vmem:[#allocation2 + $0xbb] sm:$0xff] %vm4193_vm2, %v4178_v33  ;;  %v16195_v41 = vadd.f32 %v16194_v34, %v14869_v32 }
 0x212   : > { %14924 = vmatmul.mubr.msk.f32.gmra.mrb[54].mxu1 %vm4193_vm2, %v4311_v38  ;;  %4265 = vst.msk [vmem:[#allocation2 + $0xb3] sm:$0xfc] %vm4238_vm4, %v4177_v39  ;;  %v16197_v42 = vadd.f32 %v16196_v40, %v4052_v36  ;;  %v14648_v55 = vpop.f32.mrb[24].mxu1  ;;  %v14872_v57 = vpop.f32.mrb[24].mxu0 }
 0x213   : > { %v4180_v59 = vmax.f32 %v16195_v41, 0.0  ;;  %v16198_v61 = vadd.f32 %v14648_v55, %v18330_v49  ;;  %v2342_v63 = vpop.f32.mrb[25].mxu1  ;;  %v4062_v2 = vpop.f32.mrb[25].mxu0 }
 0x214   : > { %v4179_v43 = vmax.f32 %v16197_v42, 0.0  ;;  %v16200_v4 = vadd.f32 %v18330_v49, %v2342_v63 }
 0x215   : > { %4269 = vst.msk [vmem:[#allocation2 + $0xcb] sm:$0xff] %vm4193_vm2, %v4180_v59  ;;  %v16199_v44 = vadd.f32 %v16198_v61, %v14872_v57  ;;  %v4312_v47 = vld [vmem:[#allocation2 + $0xa0] sm:$0xff]  ;;  %v4313_v6 = vld [vmem:[#allocation2 + $0xa8] sm:$0xff] }
 0x216   : > { %4267 = vst.msk [vmem:[#allocation2 + $0xc3] sm:$0x3] %vm4241_vm5, %v4179_v43  ;;  %v16201_v48 = vadd.f32 %v16200_v4, %v4062_v2  ;;  %v14651_v50 = vpop.f32.mrb[26].mxu1  ;;  %v14875_v52 = vpop.f32.mrb[26].mxu0  ;;  %14926 = vmatprep.mubr.msk.f32.mxu1 %vm4193_vm2, %v4312_v47 }
 0x217   : > { %4268 = vst.msk [vmem:[#allocation2 + $0xc3] sm:$0xf0] %vm4243_vm6, %v4179_v43  ;;  %v4182_v54 = vmax.f32 %v16199_v44, 0.0  ;;  %v16202_v56 = vadd.f32 %v14651_v50, %v18330_v49  ;;  %v2352_v45 = vpop.f32.mrb[27].mxu1  ;;  %v4072_v58 = vpop.f32.mrb[27].mxu0  ;;  %14927 = vmatmul.mubr.msk.f32.gmra.mrb[56].mxu1 %vm4193_vm2, %v4313_v6 }
 0x218   : > { %v4181_v46 = vmax.f32 %v16201_v48, 0.0  ;;  %v16204_v60 = vadd.f32 %v18330_v49, %v2352_v45  ;;  %v12693_v45 = vld [vmem:[%s19775_s3 + $0x50] sm:$0xff] }
 0x219   : > { %4272 = vst.msk [vmem:[#allocation2 + $0xdb] sm:$0xff] %vm4193_vm2, %v4182_v54  ;;  %v16203_v62 = vadd.f32 %v16202_v56, %v14875_v52  ;;  %v4314_v0 = vld [vmem:[#allocation2 + $0xb0] sm:$0xff]  ;;  %v4315_v3 = vld [vmem:[#allocation2 + $0xb8] sm:$0xff]  ;;  %v4721_v56 = vld [vmem:[#allocation2 + $0x1] sm:$0xff] }
 0x21a   : > { %4270 = vst.msk [vmem:[#allocation2 + $0xd3] sm:$0xf] %vm4234_vm3, %v4181_v46  ;;  %v16205_v5 = vadd.f32 %v16204_v60, %v4072_v58  ;;  %v14654_v7 = vpop.f32.mrb[28].mxu1  ;;  %v14878_v1 = vpop.f32.mrb[28].mxu0  ;;  %14929 = vmatprep.mubr.msk.f32.mxu1 %vm4193_vm2, %v4314_v0  ;;  %v12694_v58 = vld [vmem:[%s19775_s3 + $0x58] sm:$0xff]  ;;  %v12732_v0 = vld [vmem:[%s19775_s3 + $0x68] sm:$0xff] }
 0x21b   : > { %4271 = vst.msk [vmem:[#allocation2 + $0xd3] sm:$0xc0] %vm4247_vm7, %v4181_v46  ;;  %v4184_v51 = vmax.f32 %v16203_v62, 0.0  ;;  %v16206_v8 = vadd.f32 %v14654_v7, %v18330_v49  ;;  %v2362_v53 = vpop.f32.mrb[29].mxu1  ;;  %v4082_v9 = vpop.f32.mrb[29].mxu0  ;;  %14930 = vmatmul.mubr.msk.f32.gmra.mrb[58].mxu1 %vm4193_vm2, %v4315_v3  ;;  %v4722_v46 = vld [vmem:[#allocation2 + $0x9] sm:$0xff]  ;;  %v16024_v60 = vpack.c.bf16 %v12694_v58, %v12693_v45 }
 0x21c   : > { %v4183_v10 = vmax.f32 %v16205_v5, 0.0  ;;  %v16208_v12 = vadd.f32 %v18330_v49, %v2362_v53  ;;  %v12731_v62 = vld [vmem:[%s19775_s3 + $0x60] sm:$0xff]  ;;  %v4723_v3 = vld [vmem:[#allocation2 + $0x11] sm:$0xff] }
 0x21d   : > { %4274 = vst.msk [vmem:[#allocation2 + $0xeb] sm:$0xff] %vm4193_vm2, %v4184_v51  ;;  %v16207_v13 = vadd.f32 %v16206_v8, %v14878_v1  ;;  %v18474_v5 = vpack.c.bf16 %v12732_v0, %v12731_v62  ;;  %v4724_v7 = vld [vmem:[#allocation2 + $0x19] sm:$0xff]  ;;  %v4725_v1 = vld [vmem:[#allocation2 + $0x21] sm:$0xff]  ;;  %v4726_v51 = vld [vmem:[#allocation2 + $0x29] sm:$0xff] }
 0x21e   : > { %v4316_v14 = vld [vmem:[#allocation2 + $0xc0] sm:$0xff]  ;;  %v4317_v15 = vld [vmem:[#allocation2 + $0xc8] sm:$0xff]  ;;  %4273 = vst.msk [vmem:[#allocation2 + $0xe3] sm:$0x3f] %vm4250_vm8, %v4183_v10  ;;  %v16209_v16 = vadd.f32 %v16208_v12, %v4082_v9  ;;  %v14657_v17 = vpop.f32.mrb[30].mxu1  ;;  %v14881_v18 = vpop.f32.mrb[30].mxu0 }
 0x21f   : > { %14932 = vmatprep.mubr.msk.f32.mxu1 %vm4193_vm2, %v4316_v14  ;;  %v4186_v19 = vmax.f32 %v16207_v13, 0.0  ;;  %v16210_v20 = vadd.f32 %v14657_v17, %v18330_v49  ;;  %v2372_v21 = vpop.f32.mrb[31].mxu1  ;;  %v4092_v22 = vpop.f32.mrb[31].mxu0  ;;  %v4727_v8 = vld [vmem:[#allocation2 + $0x31] sm:$0xff]  ;;  %v4729_v53 = vld [vmem:[#allocation2 + $0x41] sm:$0xff]  ;;  %v4730_v9 = vld [vmem:[#allocation2 + $0x49] sm:$0xff] }
 0x220   : > { %14933 = vmatmul.mubr.msk.f32.gmra.mrb[60].mxu1 %vm4193_vm2, %v4317_v15  ;;  %v4185_v23 = vmax.f32 %v16209_v16, 0.0  ;;  %v16212_v24 = vadd.f32 %v18330_v49, %v2372_v21  ;;  %v4731_v10 = vld [vmem:[#allocation2 + $0x51] sm:$0xff]  ;;  %v4732_v12 = vld [vmem:[#allocation2 + $0x59] sm:$0xff]  ;;  %v4733_v13 = vld [vmem:[#allocation2 + $0x61] sm:$0xff] }
 0x221   : > { %4276 = vst.msk [vmem:[#allocation2 + $0xfb] sm:$0xfc] %vm4238_vm4, %v4186_v19  ;;  %v16211_v25 = vadd.f32 %v16210_v20, %v14881_v18  ;;  %v4318_v26 = vld [vmem:[#allocation2 + $0xd0] sm:$0xff]  ;;  %v4736_v16 = vld [vmem:[#allocation2 + $0x79] sm:$0xff]  ;;  %v4737_v17 = vld [vmem:[#allocation2 + $0x81] sm:$0xff] }
 0x222   : > { %v4319_v27 = vld [vmem:[#allocation2 + $0xd8] sm:$0xff]  ;;  %4275 = vst.msk [vmem:[#allocation2 + $0xf3] sm:$0xff] %vm4193_vm2, %v4185_v23  ;;  %v16213_v11 = vadd.f32 %v16212_v24, %v4092_v22  ;;  %v14660_v28 = vpop.f32.mrb[32].mxu1  ;;  %v14884_v29 = vpop.f32.mrb[32].mxu0  ;;  %14935 = vmatprep.mubr.msk.f32.mxu1 %vm4193_vm2, %v4318_v26  ;;  %v4734_v14 = vld [vmem:[#allocation2 + $0x69] sm:$0xff]  ;;  %v4741_v21 = vld [vmem:[#allocation2 + $0xa1] sm:$0xff] }
 0x223   : > { %v4188_v31 = vmax.f32 %v16211_v25, 0.0  ;;  %v16214_v32 = vadd.f32 %v14660_v28, %v18330_v49  ;;  %v2382_v33 = vpop.f32.mrb[33].mxu1  ;;  %v4102_v34 = vpop.f32.mrb[33].mxu0  ;;  %v4735_v15 = vld [vmem:[#allocation2 + $0x71] sm:$0xff]  ;;  %v4738_v18 = vld [vmem:[#allocation2 + $0x89] sm:$0xff]  ;;  %v4740_v20 = vld [vmem:[#allocation2 + $0x99] sm:$0xff] }
 0x224   : > { %14936 = vmatmul.mubr.msk.f32.gmra.mrb[62].mxu1 %vm4193_vm2, %v4319_v27  ;;  %v4187_v35 = vmax.f32 %v16213_v11, 0.0  ;;  %v16216_v36 = vadd.f32 %v18330_v49, %v2382_v33  ;;  %v4739_v19 = vld [vmem:[#allocation2 + $0x91] sm:$0xff]  ;;  %v4742_v22 = vld [vmem:[#allocation2 + $0xa9] sm:$0xff]  ;;  %v4744_v24 = vld [vmem:[#allocation2 + $0xb9] sm:$0xff] }
 0x225   : > { %4278 = vst.msk [vmem:[#allocation2 + $0x10b] sm:$0x3] %vm4241_vm5, %v4188_v31  ;;  %v16215_v37 = vadd.f32 %v16214_v32, %v14884_v29  ;;  %v4320_v38 = vld [vmem:[#allocation2 + $0xe0] sm:$0xff]  ;;  %v4321_v39 = vld [vmem:[#allocation2 + $0xe8] sm:$0xff]  ;;  %v4743_v23 = vld [vmem:[#allocation2 + $0xb1] sm:$0xff] }
 0x226   : > { %4279 = vst.msk [vmem:[#allocation2 + $0x10b] sm:$0xf0] %vm4243_vm6, %v4188_v31  ;;  %v16217_v40 = vadd.f32 %v16216_v36, %v4102_v34  ;;  %v14663_v41 = vpop.f32.mrb[34].mxu1  ;;  %v14887_v42 = vpop.f32.mrb[34].mxu0  ;;  %14938 = vmatprep.mubr.msk.f32.mxu1 %vm4193_vm2, %v4320_v38  ;;  %v4745_v25 = vld [vmem:[#allocation2 + $0xc1] sm:$0xff]  ;;  %v4746_v26 = vld [vmem:[#allocation2 + $0xc9] sm:$0xff] }
 0x227   : > { %4277 = vst.msk [vmem:[#allocation2 + $0x103] sm:$0xff] %vm4193_vm2, %v4187_v35  ;;  %v4190_v55 = vmax.f32 %v16215_v37, 0.0  ;;  %v16218_v57 = vadd.f32 %v14663_v41, %v18330_v49  ;;  %v2392_v59 = vpop.f32.mrb[35].mxu1  ;;  %v4112_v61 = vpop.f32.mrb[35].mxu0  ;;  %v4747_v27 = vld [vmem:[#allocation2 + $0xd1] sm:$0xff]  ;;  %v4748_v11 = vld [vmem:[#allocation2 + $0xd9] sm:$0xff] }
 0x228   : > { %14939 = vmatmul.mubr.msk.f32.gmra.mrb[64].mxu1 %vm4193_vm2, %v4321_v39  ;;  %v4189_v63 = vmax.f32 %v16217_v40, 0.0  ;;  %v16220_v2 = vadd.f32 %v18330_v49, %v2392_v59  ;;  %v4749_v28 = vld [vmem:[#allocation2 + $0xe1] sm:$0xff]  ;;  %v4750_v29 = vld [vmem:[#allocation2 + $0xe9] sm:$0xff]  ;;  %v12734_v39 = vld [vmem:[%s19775_s3 + $0x78] sm:$0xff] }
 0x229   : > { %4281 = vst.msk [vmem:[#allocation2 + $0x11b] sm:$0xf] %vm4234_vm3, %v4190_v55  ;;  %v16219_v43 = vadd.f32 %v16218_v57, %v14887_v42  ;;  %v4322_v4 = vld [vmem:[#allocation2 + $0xf0] sm:$0xff]  ;;  %v4323_v44 = vld [vmem:[#allocation2 + $0xf8] sm:$0xff]  ;;  %v5151_v36 = vld [vmem:[#allocation2 + $0x2] sm:$0xff] }
 0x22a   : > { %4282 = vst.msk [vmem:[#allocation2 + $0x11b] sm:$0xc0] %vm4247_vm7, %v4190_v55  ;;  %v16221_v47 = vadd.f32 %v16220_v2, %v4112_v61  ;;  %14941 = vmatprep.mubr.msk.f32.mxu1 %vm4193_vm2, %v4322_v4  ;;  %v4751_v31 = vld [vmem:[#allocation2 + $0xf1] sm:$0xff]  ;;  %v4752_v32 = vld [vmem:[#allocation2 + $0xf9] sm:$0xff]  ;;  %v12772_v55 = vld [vmem:[%s19775_s3 + $0x88] sm:$0xff] }
 0x22b   : > { %4280 = vst.msk [vmem:[#allocation2 + $0x113] sm:$0xff] %vm4193_vm2, %v4189_v63  ;;  %v4192_v6 = vmax.f32 %v16219_v43, 0.0  ;;  %v12733_v38 = vld [vmem:[%s19775_s3 + $0x70] sm:$0xff]  ;;  %v12771_v42 = vld [vmem:[%s19775_s3 + $0x80] sm:$0xff] }
 0x22c   : > { %14942 = vmatmul.mubr.msk.f32.gmra.mrb[66].mxu1 %vm4193_vm2, %v4323_v44  ;;  %v4191_v48 = vmax.f32 %v16221_v47, 0.0  ;;  %v5152_v40 = vld [vmem:[#allocation2 + $0xa] sm:$0xff]  ;;  %v16032_v41 = vpack.c.bf16 %v12734_v39, %v12733_v38  ;;  %v18524_v57 = vld [vmem:[#allocation2 + $0x12] sm:$0xff]  ;;  %v18529_v59 = vpack.c.bf16 %v12772_v55, %v12771_v42  ;;  %v18531_v61 = vld [vmem:[#allocation2 + $0x1a] sm:$0xff] }
 0x22d   : > { %4284 = vst.msk [vmem:[#allocation2 + $0x12b] sm:$0x3f] %vm4250_vm8, %v4192_v6  ;;  %v18535_v63 = vld [vmem:[#allocation2 + $0x22] sm:$0xff]  ;;  %v18540_v2 = vld [vmem:[#allocation2 + $0x2a] sm:$0xff]  ;;  %v18544_v43 = vld [vmem:[#allocation2 + $0x32] sm:$0xff] }
 0x22e   : > { %v4324_v50 = vld [vmem:[#allocation2 + $0x100] sm:$0xff]  ;;  %v4325_v49 = vld [vmem:[#allocation2 + $0x108] sm:$0xff]  ;;  %4283 = vst.msk [vmem:[#allocation2 + $0x123] sm:$0xff] %vm4193_vm2, %v4191_v48  ;;  %v18560_v6 = vld [vmem:[#allocation2 + $0x52] sm:$0xff] }
 0x22f   : > { %14944 = vmatprep.mubr.msk.f32.mxu1 %vm4193_vm2, %v4324_v50  ;;  %v4753_v33 = vld [vmem:[#allocation2 + $0x101] sm:$0xff]  ;;  %v4754_v34 = vld [vmem:[#allocation2 + $0x109] sm:$0xff]  ;;  %v5169_v58 = vld [vmem:[#allocation2 + $0x92] sm:$0xff] }
 0x230   : > { %14945 = vmatmul.mubr.msk.f32.gmra.mrb[68].mxu1 %vm4193_vm2, %v4325_v49  ;;  %v18548_v4 = vld [vmem:[#allocation2 + $0x3a] sm:$0xff]  ;;  %v18552_v44 = vld [vmem:[#allocation2 + $0x42] sm:$0xff]  ;;  %v18556_v47 = vld [vmem:[#allocation2 + $0x4a] sm:$0xff] }
 0x231   : > { %v18564_v48 = vld [vmem:[#allocation2 + $0x5a] sm:$0xff]  ;;  %v18568_v50 = vld [vmem:[#allocation2 + $0x62] sm:$0xff]  ;;  %v18572_v49 = vld [vmem:[#allocation2 + $0x6a] sm:$0xff] }
 0x232   : > { %v4326_v52 = vld [vmem:[#allocation2 + $0x110] sm:$0xff]  ;;  %v4327_v54 = vld [vmem:[#allocation2 + $0x118] sm:$0x3f] }
 0x233   : > { %14947 = vmatprep.mubr.msk.f32.mxu1 %vm4193_vm2, %v4326_v52  ;;  %v4755_v35 = vld [vmem:[#allocation2 + $0x111] sm:$0xff]  ;;  %v4756_v37 = vld [vmem:[#allocation2 + $0x119] sm:$0x3f] }
 0x234   : > { %14948 = vmatmul.mubr.msk.f32.gmra.mrb[70].mxu1 %vm4193_vm2, %v4327_v54  ;;  %v18576_v52 = vld [vmem:[#allocation2 + $0x72] sm:$0xff]  ;;  %v18580_v54 = vld [vmem:[#allocation2 + $0x7a] sm:$0xff]  ;;  %v18588_v45 = vld [vmem:[#allocation2 + $0x8a] sm:$0xff] }
 0x235   : > { %14958 = vmatprep.mubr.msk.f32.mxu1 %vm4193_vm2, %v4721_v56  ;;  %v18584_v56 = vld [vmem:[#allocation2 + $0x82] sm:$0xff]  ;;  %v5172_v62 = vld [vmem:[#allocation2 + $0xaa] sm:$0xff]  ;;  %v5173_v0 = vld [vmem:[#allocation2 + $0xb2] sm:$0xff] }
 0x236   : > { %v6019_v38 = vld [vmem:[#allocation2 + $0x53] sm:$0xff]  ;;  %v6020_v39 = vld [vmem:[#allocation2 + $0x5b] sm:$0xff] }
 0x237   : > { %v6023_v42 = vld [vmem:[#allocation2 + $0x73] sm:$0xff]  ;;  %v6024_v55 = vld [vmem:[#allocation2 + $0x7b] sm:$0xff] }
 0x238   : > { %14959 = vmatmul.mubr.msk.f32.vlgmr.msra.gmra.mrb[36].mxu1 %vm4193_vm2, %v4722_v46  ;;  %v5170_v46 = vld [vmem:[#allocation2 + $0x9a] sm:$0xff] }
 0x239   : > { %16023 = vmatpush3.bf16.msra.mxu1 %v18312_v30  ;;  %14961 = vmatprep.mubr.msk.f32.mxu1 %vm4193_vm2, %v4723_v3  ;;  %v4728_v30 = vld [vmem:[#allocation2 + $0x39] sm:$0xff] }
 0x23a   : > { %16025 = vmatprep.subr.bf16.mxu1 %v16024_v60  ;;  %v5174_v3 = vld [vmem:[#allocation2 + $0xba] sm:$0xff] }
 0x23c   : > { %14962 = vmatmul.mubr.msk.f32.gmra.mrb[38].mxu1 %vm4193_vm2, %v4724_v7  ;;  %v5176_v7 = vld [vmem:[#allocation2 + $0xca] sm:$0xff] }
 0x23d   : > { %14964 = vmatprep.mubr.msk.f32.mxu1 %vm4193_vm2, %v4725_v1  ;;  %16027 = vmatpush3.bf16.msra.mxu1 %v16024_v60  ;;  %v5171_v60 = vld [vmem:[#allocation2 + $0xa2] sm:$0xff]  ;;  %v5177_v1 = vld [vmem:[#allocation2 + $0xd2] sm:$0xff] }
 0x23e   : > { %16029 = vmatprep.subr.bf16.mxu1 %v18474_v5 }
 0x240   : > { %14965 = vmatmul.mubr.msk.f32.gmra.mrb[40].mxu1 %vm4193_vm2, %v4726_v51  ;;  %v5178_v51 = vld [vmem:[#allocation2 + $0xda] sm:$0xff] }
 0x241   : > { %14967 = vmatprep.mubr.msk.f32.mxu1 %vm4193_vm2, %v4727_v8  ;;  %v5179_v8 = vld [vmem:[#allocation2 + $0xe2] sm:$0xff] }
 0x244   : > { %14968 = vmatmul.mubr.msk.f32.gmra.mrb[42].mxu1 %vm4193_vm2, %v4728_v30  ;;  %v5180_v30 = vld [vmem:[#allocation2 + $0xea] sm:$0xff] }
 0x245   : > { %14970 = vmatprep.mubr.msk.f32.mxu1 %vm4193_vm2, %v4729_v53  ;;  %v5181_v53 = vld [vmem:[#allocation2 + $0xf2] sm:$0xff] }
 0x248   : > { %14971 = vmatmul.mubr.msk.f32.gmra.mrb[44].mxu1 %vm4193_vm2, %v4730_v9  ;;  %v5182_v9 = vld [vmem:[#allocation2 + $0xfa] sm:$0xff] }
 0x249   : > { %14973 = vmatprep.mubr.msk.f32.mxu1 %vm4193_vm2, %v4731_v10  ;;  %v5183_v10 = vld [vmem:[#allocation2 + $0x102] sm:$0xff] }
 0x24c   : > { %14974 = vmatmul.mubr.msk.f32.gmra.mrb[46].mxu1 %vm4193_vm2, %v4732_v12  ;;  %v5184_v12 = vld [vmem:[#allocation2 + $0x10a] sm:$0xff] }
 0x24d   : > { %14976 = vmatprep.mubr.msk.f32.mxu1 %vm4193_vm2, %v4733_v13  ;;  %v5185_v13 = vld [vmem:[#allocation2 + $0x112] sm:$0xff] }
 0x250   : > { %14977 = vmatmul.mubr.msk.f32.gmra.mrb[48].mxu1 %vm4193_vm2, %v4734_v14  ;;  %v5186_v14 = vld [vmem:[#allocation2 + $0x11a] sm:$0x3f] }
 0x251   : > { %14979 = vmatprep.mubr.msk.f32.mxu1 %vm4193_vm2, %v4735_v15  ;;  %v12773_v15 = vld [vmem:[%s19775_s3 + $0x90] sm:$0xff] }
 0x254   : > { %14980 = vmatmul.mubr.msk.f32.gmra.mrb[50].mxu1 %vm4193_vm2, %v4736_v16  ;;  %v12774_v16 = vld [vmem:[%s19775_s3 + $0x98] sm:$0xff] }
 0x255   : > { %14982 = vmatprep.mubr.msk.f32.mxu1 %vm4193_vm2, %v4737_v17  ;;  %v16040_v17 = vpack.c.bf16 %v12774_v16, %v12773_v15  ;;  %v18764_v15 = vld [vmem:[#allocation2 + $0x4c] sm:$0xff]  ;;  %v18768_v16 = vld [vmem:[#allocation2 + $0x54] sm:$0xff] }
 0x258   : > { %14983 = vmatmul.mubr.msk.f32.gmra.mrb[52].mxu1 %vm4193_vm2, %v4738_v18  ;;  %v12811_v18 = vld [vmem:[%s19775_s3 + $0xa0] sm:$0xff] }
 0x259   : > { %14985 = vmatprep.mubr.msk.f32.mxu1 %vm4193_vm2, %v4739_v19  ;;  %v12812_v19 = vld [vmem:[%s19775_s3 + $0xa8] sm:$0xff] }
 0x25c   : > { %14986 = vmatmul.mubr.msk.f32.gmra.mrb[54].mxu1 %vm4193_vm2, %v4740_v20  ;;  %v16044_v20 = vpack.c.bf16 %v12812_v19, %v12811_v18  ;;  %v18776_v18 = vld [vmem:[#allocation2 + $0x64] sm:$0xff]  ;;  %v18780_v19 = vld [vmem:[#allocation2 + $0x6c] sm:$0xff] }
 0x25d   : > { %14988 = vmatprep.mubr.msk.f32.mxu1 %vm4193_vm2, %v4741_v21  ;;  %v5614_v21 = vld [vmem:[#allocation2 + $0x11a] sm:$0xff] }
 0x260   : > { %14989 = vmatmul.mubr.msk.f32.gmra.mrb[56].mxu1 %vm4193_vm2, %v4742_v22  ;;  %v5615_v22 = vld [vmem:[#allocation2 + $0x122] sm:$0xff] }
 0x261   : > { %14991 = vmatprep.mubr.msk.f32.mxu1 %vm4193_vm2, %v4743_v23  ;;  %v5616_v23 = vld [vmem:[#allocation2 + $0x12a] sm:$0x3f] }
 0x264   : > { %14992 = vmatmul.mubr.msk.f32.gmra.mrb[58].mxu1 %vm4193_vm2, %v4744_v24  ;;  %v12813_v24 = vld [vmem:[%s19775_s3 + $0xb0] sm:$0xff] }
 0x265   : > { %14994 = vmatprep.mubr.msk.f32.mxu1 %vm4193_vm2, %v4745_v25  ;;  %v12814_v25 = vld [vmem:[%s19775_s3 + $0xb8] sm:$0xff] }
 0x268   : > { %14995 = vmatmul.mubr.msk.f32.gmra.mrb[60].mxu1 %vm4193_vm2, %v4746_v26  ;;  %v6011_v26 = vld [vmem:[#allocation2 + $0x13] sm:$0xff] }
 0x269   : > { %14997 = vmatprep.mubr.msk.f32.mxu1 %vm4193_vm2, %v4747_v27  ;;  %v16048_v27 = vpack.c.bf16 %v12814_v25, %v12813_v24  ;;  %v18800_v24 = vld [vmem:[#allocation2 + $0x94] sm:$0xff]  ;;  %v18804_v25 = vld [vmem:[#allocation2 + $0x9c] sm:$0xff] }
 0x26c   : > { %14998 = vmatmul.mubr.msk.f32.gmra.mrb[62].mxu1 %vm4193_vm2, %v4748_v11  ;;  %v6012_v11 = vld [vmem:[#allocation2 + $0x1b] sm:$0xff] }
 0x26d   : > { %15000 = vmatprep.mubr.msk.f32.mxu1 %vm4193_vm2, %v4749_v28  ;;  %v12851_v28 = vld [vmem:[%s19775_s3 + $0xc0] sm:$0xff] }
 0x270   : > { %15001 = vmatmul.mubr.msk.f32.gmra.mrb[64].mxu1 %vm4193_vm2, %v4750_v29  ;;  %v12852_v29 = vld [vmem:[%s19775_s3 + $0xc8] sm:$0xff] }
 0x271   : > { %15003 = vmatprep.mubr.msk.f32.mxu1 %vm4193_vm2, %v4751_v31  ;;  %v6013_v31 = vld [vmem:[#allocation2 + $0x23] sm:$0xff] }
 0x274   : > { %15004 = vmatmul.mubr.msk.f32.gmra.mrb[66].mxu1 %vm4193_vm2, %v4752_v32  ;;  %v18690_v32 = vpack.c.bf16 %v12852_v29, %v12851_v28  ;;  %v6462_v28 = vld [vmem:[#allocation2 + $0xbc] sm:$0xff]  ;;  %v6463_v29 = vld [vmem:[#allocation2 + $0xc4] sm:$0xff] }
 0x275   : > { %15006 = vmatprep.mubr.msk.f32.mxu1 %vm4193_vm2, %v4753_v33  ;;  %v6014_v33 = vld [vmem:[#allocation2 + $0x2b] sm:$0xff] }
 0x278   : > { %15007 = vmatmul.mubr.msk.f32.gmra.mrb[68].mxu1 %vm4193_vm2, %v4754_v34  ;;  %v6015_v34 = vld [vmem:[#allocation2 + $0x33] sm:$0xff] }
 0x279   : > { %15009 = vmatprep.mubr.msk.f32.mxu1 %vm4193_vm2, %v4755_v35  ;;  %v6016_v35 = vld [vmem:[#allocation2 + $0x3b] sm:$0xff] }
 0x27c   : > { %15010 = vmatmul.mubr.msk.f32.gmra.mrb[70].mxu1 %vm4193_vm2, %v4756_v37  ;;  %v6018_v37 = vld [vmem:[#allocation2 + $0x4b] sm:$0xff] }
 0x27d   : > { %15020 = vmatprep.mubr.msk.f32.mxu1 %vm4193_vm2, %v5151_v36  ;;  %v6017_v36 = vld [vmem:[#allocation2 + $0x43] sm:$0xff] }
 0x280   : > { %15021 = vmatmul.mubr.msk.f32.vlgmr.msra.gmra.mrb[36].mxu1 %vm4193_vm2, %v5152_v40  ;;  %v6021_v40 = vld [vmem:[#allocation2 + $0x63] sm:$0xff] }
 0x281   : > { %16031 = vmatpush3.bf16.msra.mxu1 %v18474_v5  ;;  %15023 = vmatprep.mubr.msk.f32.mxu1 %vm4193_vm2, %v18524_v57  ;;  %v5175_v5 = vld [vmem:[#allocation2 + $0xc2] sm:$0xff] }
 0x282   : > { %16033 = vmatprep.subr.bf16.mxu1 %v16032_v41 }
 0x284   : > { %15024 = vmatmul.mubr.msk.f32.gmra.mrb[38].mxu1 %vm4193_vm2, %v18531_v61 }
 0x285   : > { %15026 = vmatprep.mubr.msk.f32.mxu1 %vm4193_vm2, %v18535_v63  ;;  %16035 = vmatpush3.bf16.msra.mxu1 %v16032_v41  ;;  %v6022_v41 = vld [vmem:[#allocation2 + $0x6b] sm:$0xff] }
 0x286   : > { %16037 = vmatprep.subr.bf16.mxu1 %v18529_v59 }
 0x288   : > { %15027 = vmatmul.mubr.msk.f32.gmra.mrb[40].mxu1 %vm4193_vm2, %v18540_v2 }
 0x289   : > { %15029 = vmatprep.mubr.msk.f32.mxu1 %vm4193_vm2, %v18544_v43 }
 0x28c   : > { %15030 = vmatmul.mubr.msk.f32.gmra.mrb[42].mxu1 %vm4193_vm2, %v18548_v4 }
 0x28d   : > { %15032 = vmatprep.mubr.msk.f32.mxu1 %vm4193_vm2, %v18552_v44 }
 0x290   : > { %15033 = vmatmul.mubr.msk.f32.gmra.mrb[44].mxu1 %vm4193_vm2, %v18556_v47 }
 0x291   : > { %15035 = vmatprep.mubr.msk.f32.mxu1 %vm4193_vm2, %v18560_v6 }
 0x294   : > { %15036 = vmatmul.mubr.msk.f32.gmra.mrb[46].mxu1 %vm4193_vm2, %v18564_v48 }
 0x295   : > { %15038 = vmatprep.mubr.msk.f32.mxu1 %vm4193_vm2, %v18568_v50 }
 0x298   : > { %15039 = vmatmul.mubr.msk.f32.gmra.mrb[48].mxu1 %vm4193_vm2, %v18572_v49 }
 0x299   : > { %15041 = vmatprep.mubr.msk.f32.mxu1 %vm4193_vm2, %v18576_v52 }
 0x29c   : > { %15042 = vmatmul.mubr.msk.f32.gmra.mrb[50].mxu1 %vm4193_vm2, %v18580_v54 }
 0x29d   : > { %15044 = vmatprep.mubr.msk.f32.mxu1 %vm4193_vm2, %v18584_v56 }
 0x2a0   : > { %15045 = vmatmul.mubr.msk.f32.gmra.mrb[52].mxu1 %vm4193_vm2, %v18588_v45 }
 0x2a1   : > { %15047 = vmatprep.mubr.msk.f32.mxu1 %vm4193_vm2, %v5169_v58 }
 0x2a4   : > { %15048 = vmatmul.mubr.msk.f32.gmra.mrb[54].mxu1 %vm4193_vm2, %v5170_v46 }
 0x2a5   : > { %15050 = vmatprep.mubr.msk.f32.mxu1 %vm4193_vm2, %v5171_v60 }
 0x2a8   : > { %15051 = vmatmul.mubr.msk.f32.gmra.mrb[56].mxu1 %vm4193_vm2, %v5172_v62 }
 0x2a9   : > { %15053 = vmatprep.mubr.msk.f32.mxu1 %vm4193_vm2, %v5173_v0 }
 0x2ac   : > { %15054 = vmatmul.mubr.msk.f32.gmra.mrb[58].mxu1 %vm4193_vm2, %v5174_v3 }
 0x2ad   : > { %15056 = vmatprep.mubr.msk.f32.mxu1 %vm4193_vm2, %v5175_v5 }
 0x2b0   : > { %15057 = vmatmul.mubr.msk.f32.gmra.mrb[60].mxu1 %vm4193_vm2, %v5176_v7 }
 0x2b1   : > { %15059 = vmatprep.mubr.msk.f32.mxu1 %vm4193_vm2, %v5177_v1 }
 0x2b4   : > { %15060 = vmatmul.mubr.msk.f32.gmra.mrb[62].mxu1 %vm4193_vm2, %v5178_v51 }
 0x2b5   : > { %15062 = vmatprep.mubr.msk.f32.mxu1 %vm4193_vm2, %v5179_v8 }
 0x2b8   : > { %15063 = vmatmul.mubr.msk.f32.gmra.mrb[64].mxu1 %vm4193_vm2, %v5180_v30 }
 0x2b9   : > { %15065 = vmatprep.mubr.msk.f32.mxu1 %vm4193_vm2, %v5181_v53 }
 0x2bc   : > { %15066 = vmatmul.mubr.msk.f32.gmra.mrb[66].mxu1 %vm4193_vm2, %v5182_v9 }
 0x2bd   : > { %15068 = vmatprep.mubr.msk.f32.mxu1 %vm4193_vm2, %v5183_v10 }
 0x2c0   : > { %15069 = vmatmul.mubr.msk.f32.gmra.mrb[68].mxu1 %vm4193_vm2, %v5184_v12 }
 0x2c1   : > { %15071 = vmatprep.mubr.msk.f32.mxu1 %vm4193_vm2, %v5185_v13 }
 0x2c4   : > { %15072 = vmatmul.mubr.msk.f32.gmra.mrb[70].mxu1 %vm4193_vm2, %v5186_v14  ;;  %v18760_v14 = vld [vmem:[#allocation2 + $0x44] sm:$0xff] }
 0x2c5   : > { %15082 = vmatprep.mubr.msk.f32.mxu1 %vm4193_vm2, %v18524_v57  ;;  %v6025_v57 = vld [vmem:[#allocation2 + $0x83] sm:$0xff] }
 0x2c8   : > { %15083 = vmatmul.mubr.msk.f32.vlgmr.msra.gmra.mrb[36].mxu1 %vm4193_vm2, %v18531_v61  ;;  %v6027_v61 = vld [vmem:[#allocation2 + $0x93] sm:$0xff] }
 0x2c9   : > { %16039 = vmatpush3.bf16.msra.mxu1 %v18529_v59  ;;  %15085 = vmatprep.mubr.msk.f32.mxu1 %vm4193_vm2, %v18535_v63  ;;  %v6026_v59 = vld [vmem:[#allocation2 + $0x8b] sm:$0xff]  ;;  %v6028_v63 = vld [vmem:[#allocation2 + $0x9b] sm:$0xff] }
 0x2ca   : > { %16041 = vmatprep.subr.bf16.mxu1 %v16040_v17 }
 0x2cc   : > { %15086 = vmatmul.mubr.msk.f32.gmra.mrb[38].mxu1 %vm4193_vm2, %v18540_v2  ;;  %v6029_v2 = vld [vmem:[#allocation2 + $0xa3] sm:$0xff] }
 0x2cd   : > { %15088 = vmatprep.mubr.msk.f32.mxu1 %vm4193_vm2, %v18544_v43  ;;  %16043 = vmatpush3.bf16.msra.mxu1 %v16040_v17  ;;  %v6030_v43 = vld [vmem:[#allocation2 + $0xab] sm:$0xff]  ;;  %v18772_v17 = vld [vmem:[#allocation2 + $0x5c] sm:$0xff] }
 0x2ce   : > { %16045 = vmatprep.subr.bf16.mxu1 %v16044_v20 }
 0x2d0   : > { %15089 = vmatmul.mubr.msk.f32.gmra.mrb[40].mxu1 %vm4193_vm2, %v18548_v4  ;;  %v6031_v4 = vld [vmem:[#allocation2 + $0xb3] sm:$0xff] }
 0x2d1   : > { %15091 = vmatprep.mubr.msk.f32.mxu1 %vm4193_vm2, %v18552_v44  ;;  %v6032_v44 = vld [vmem:[#allocation2 + $0xbb] sm:$0xff] }
 0x2d4   : > { %15092 = vmatmul.mubr.msk.f32.gmra.mrb[42].mxu1 %vm4193_vm2, %v18556_v47  ;;  %v6033_v47 = vld [vmem:[#allocation2 + $0xc3] sm:$0xff] }
 0x2d5   : > { %15094 = vmatprep.mubr.msk.f32.mxu1 %vm4193_vm2, %v18560_v6  ;;  %v6034_v6 = vld [vmem:[#allocation2 + $0xcb] sm:$0xff] }
 0x2d8   : > { %15095 = vmatmul.mubr.msk.f32.gmra.mrb[44].mxu1 %vm4193_vm2, %v18564_v48  ;;  %v6035_v48 = vld [vmem:[#allocation2 + $0xd3] sm:$0xff] }
 0x2d9   : > { %15097 = vmatprep.mubr.msk.f32.mxu1 %vm4193_vm2, %v18568_v50  ;;  %v6036_v50 = vld [vmem:[#allocation2 + $0xdb] sm:$0xff] }
 0x2dc   : > { %15098 = vmatmul.mubr.msk.f32.gmra.mrb[46].mxu1 %vm4193_vm2, %v18572_v49  ;;  %v6037_v49 = vld [vmem:[#allocation2 + $0xe3] sm:$0xff] }
 0x2dd   : > { %15100 = vmatprep.mubr.msk.f32.mxu1 %vm4193_vm2, %v18576_v52  ;;  %v6038_v52 = vld [vmem:[#allocation2 + $0xeb] sm:$0xff] }
 0x2e0   : > { %15101 = vmatmul.mubr.msk.f32.gmra.mrb[48].mxu1 %vm4193_vm2, %v18580_v54  ;;  %v6039_v54 = vld [vmem:[#allocation2 + $0xf3] sm:$0xff] }
 0x2e1   : > { %15103 = vmatprep.mubr.msk.f32.mxu1 %vm4193_vm2, %v18584_v56  ;;  %v6040_v56 = vld [vmem:[#allocation2 + $0xfb] sm:$0xff] }
 0x2e4   : > { %15104 = vmatmul.mubr.msk.f32.gmra.mrb[50].mxu1 %vm4193_vm2, %v18588_v45  ;;  %v6041_v45 = vld [vmem:[#allocation2 + $0x103] sm:$0xff] }
 0x2e5   : > { %15106 = vmatprep.mubr.msk.f32.mxu1 %vm4193_vm2, %v5169_v58  ;;  %v6042_v58 = vld [vmem:[#allocation2 + $0x10b] sm:$0xff] }
 0x2e8   : > { %15107 = vmatmul.mubr.msk.f32.gmra.mrb[52].mxu1 %vm4193_vm2, %v5170_v46  ;;  %v6043_v46 = vld [vmem:[#allocation2 + $0x113] sm:$0xff] }
 0x2e9   : > { %15109 = vmatprep.mubr.msk.f32.mxu1 %vm4193_vm2, %v5171_v60  ;;  %v6044_v60 = vld [vmem:[#allocation2 + $0x11b] sm:$0xff] }
 0x2ec   : > { %15110 = vmatmul.mubr.msk.f32.gmra.mrb[54].mxu1 %vm4193_vm2, %v5172_v62  ;;  %v6045_v62 = vld [vmem:[#allocation2 + $0x123] sm:$0xff] }
 0x2ed   : > { %15112 = vmatprep.mubr.msk.f32.mxu1 %vm4193_vm2, %v5173_v0  ;;  %v6046_v0 = vld [vmem:[#allocation2 + $0x12b] sm:$0x3f] }
 0x2f0   : > { %15113 = vmatmul.mubr.msk.f32.gmra.mrb[56].mxu1 %vm4193_vm2, %v5174_v3  ;;  %v12853_v3 = vld [vmem:[%s19775_s3 + $0xd0] sm:$0xff] }
 0x2f1   : > { %15115 = vmatprep.mubr.msk.f32.mxu1 %vm4193_vm2, %v5175_v5  ;;  %v12854_v5 = vld [vmem:[%s19775_s3 + $0xd8] sm:$0xff] }
 0x2f4   : > { %15116 = vmatmul.mubr.msk.f32.gmra.mrb[58].mxu1 %vm4193_vm2, %v5176_v7  ;;  %v6441_v7 = vld [vmem:[#allocation2 + $0x14] sm:$0xff] }
 0x2f5   : > { %15118 = vmatprep.mubr.msk.f32.mxu1 %vm4193_vm2, %v5177_v1  ;;  %v16056_v1 = vpack.c.bf16 %v12854_v5, %v12853_v3  ;;  %v8326_v3 = vld [vmem:[%s19777_s5 + $0x8] sm:$0xff]  ;;  %v8327_v5 = vld [vmem:[%s19777_s5 + $0x10] sm:$0xff] }
 0x2f8   : > { %15119 = vmatmul.mubr.msk.f32.gmra.mrb[60].mxu1 %vm4193_vm2, %v5178_v51  ;;  %v6442_v51 = vld [vmem:[#allocation2 + $0x1c] sm:$0xff] }
 0x2f9   : > { %15121 = vmatprep.mubr.msk.f32.mxu1 %vm4193_vm2, %v5179_v8  ;;  %v12891_v8 = vld [vmem:[%s19775_s3 + $0xe0] sm:$0xff] }
 0x2fc   : > { %15122 = vmatmul.mubr.msk.f32.gmra.mrb[62].mxu1 %vm4193_vm2, %v5180_v30  ;;  %v12892_v30 = vld [vmem:[%s19775_s3 + $0xe8] sm:$0xff] }
 0x2fd   : > { %15124 = vmatprep.mubr.msk.f32.mxu1 %vm4193_vm2, %v5181_v53  ;;  %v18740_v53 = vld [vmem:[#allocation2 + $0x24] sm:$0xff] }
 0x300   : > { %15125 = vmatmul.mubr.msk.f32.gmra.mrb[64].mxu1 %vm4193_vm2, %v5182_v9  ;;  %v18745_v9 = vpack.c.bf16 %v12892_v30, %v12891_v8  ;;  %v7310_v8 = vld [vmem:[#allocation2 + $0x6d] sm:$0xff]  ;;  %v7311_v30 = vld [vmem:[#allocation2 + $0x75] sm:$0xff] }
 0x301   : > { %15127 = vmatprep.mubr.msk.f32.mxu1 %vm4193_vm2, %v5183_v10  ;;  %v18747_v10 = vld [vmem:[#allocation2 + $0x2c] sm:$0xff] }
 0x304   : > { %15128 = vmatmul.mubr.msk.f32.gmra.mrb[66].mxu1 %vm4193_vm2, %v5184_v12  ;;  %v18751_v12 = vld [vmem:[#allocation2 + $0x34] sm:$0xff] }
 0x305   : > { %15130 = vmatprep.mubr.msk.f32.mxu1 %vm4193_vm2, %v5185_v13  ;;  %v18756_v13 = vld [vmem:[#allocation2 + $0x3c] sm:$0xff] }
 0x308   : > { %15131 = vmatmul.mubr.msk.f32.gmra.mrb[68].mxu1 %vm4193_vm2, %v5614_v21  ;;  %v18788_v21 = vld [vmem:[#allocation2 + $0x7c] sm:$0xff] }
 0x309   : > { %15133 = vmatprep.mubr.msk.f32.mxu1 %vm4193_vm2, %v5615_v22  ;;  %v18792_v22 = vld [vmem:[#allocation2 + $0x84] sm:$0xff] }
 0x30c   : > { %15134 = vmatmul.mubr.msk.f32.gmra.mrb[70].mxu1 %vm4193_vm2, %v5616_v23  ;;  %v18796_v23 = vld [vmem:[#allocation2 + $0x8c] sm:$0xff] }
 0x30d   : > { %15144 = vmatprep.mubr.msk.f32.mxu1 %vm4193_vm2, %v6011_v26  ;;  %v6459_v26 = vld [vmem:[#allocation2 + $0xa4] sm:$0xff] }
 0x310   : > { %15145 = vmatmul.mubr.msk.f32.vlgmr.msra.gmra.mrb[36].mxu1 %vm4193_vm2, %v6012_v11  ;;  %v6461_v11 = vld [vmem:[#allocation2 + $0xb4] sm:$0xff] }
 0x311   : > { %16047 = vmatpush3.bf16.msra.mxu1 %v16044_v20  ;;  %15147 = vmatprep.mubr.msk.f32.mxu1 %vm4193_vm2, %v6013_v31  ;;  %v18784_v20 = vld [vmem:[#allocation2 + $0x74] sm:$0xff]  ;;  %v6464_v31 = vld [vmem:[#allocation2 + $0xcc] sm:$0xff] }
 0x312   : > { %16049 = vmatprep.subr.bf16.mxu1 %v16048_v27 }
 0x314   : > { %15148 = vmatmul.mubr.msk.f32.gmra.mrb[38].mxu1 %vm4193_vm2, %v6014_v33  ;;  %v6466_v33 = vld [vmem:[#allocation2 + $0xdc] sm:$0xff] }
 0x315   : > { %15150 = vmatprep.mubr.msk.f32.mxu1 %vm4193_vm2, %v6015_v34  ;;  %16051 = vmatpush3.bf16.msra.mxu1 %v16048_v27  ;;  %v6460_v27 = vld [vmem:[#allocation2 + $0xac] sm:$0xff]  ;;  %v6467_v34 = vld [vmem:[#allocation2 + $0xe4] sm:$0xff] }
 0x316   : > { %16053 = vmatprep.subr.bf16.mxu1 %v18690_v32 }
 0x318   : > { %15151 = vmatmul.mubr.msk.f32.gmra.mrb[40].mxu1 %vm4193_vm2, %v6016_v35  ;;  %v6468_v35 = vld [vmem:[#allocation2 + $0xec] sm:$0xff] }
 0x319   : > { %15153 = vmatprep.mubr.msk.f32.mxu1 %vm4193_vm2, %v6017_v36  ;;  %v6469_v36 = vld [vmem:[#allocation2 + $0xf4] sm:$0xff] }
 0x31c   : > { %15154 = vmatmul.mubr.msk.f32.gmra.mrb[42].mxu1 %vm4193_vm2, %v6018_v37  ;;  %v6470_v37 = vld [vmem:[#allocation2 + $0xfc] sm:$0xff] }
 0x31d   : > { %15156 = vmatprep.mubr.msk.f32.mxu1 %vm4193_vm2, %v6019_v38  ;;  %v6471_v38 = vld [vmem:[#allocation2 + $0x104] sm:$0xff] }
 0x320   : > { %15157 = vmatmul.mubr.msk.f32.gmra.mrb[44].mxu1 %vm4193_vm2, %v6020_v39  ;;  %v6472_v39 = vld [vmem:[#allocation2 + $0x10c] sm:$0xff] }
 0x321   : > { %15159 = vmatprep.mubr.msk.f32.mxu1 %vm4193_vm2, %v6021_v40  ;;  %v6473_v40 = vld [vmem:[#allocation2 + $0x114] sm:$0xff] }
 0x324   : > { %15160 = vmatmul.mubr.msk.f32.gmra.mrb[46].mxu1 %vm4193_vm2, %v6022_v41  ;;  %v6474_v41 = vld [vmem:[#allocation2 + $0x11c] sm:$0xff] }
 0x325   : > { %15162 = vmatprep.mubr.msk.f32.mxu1 %vm4193_vm2, %v6023_v42  ;;  %v6475_v42 = vld [vmem:[#allocation2 + $0x124] sm:$0xff] }
 0x328   : > { %15163 = vmatmul.mubr.msk.f32.gmra.mrb[48].mxu1 %vm4193_vm2, %v6024_v55  ;;  %v6476_v55 = vld [vmem:[#allocation2 + $0x12c] sm:$0x3f] }
 0x329   : > { %15165 = vmatprep.mubr.msk.f32.mxu1 %vm4193_vm2, %v6025_v57  ;;  %v12893_v57 = vld [vmem:[%s19775_s3 + $0xf0] sm:$0xff] }
 0x32c   : > { %15166 = vmatmul.mubr.msk.f32.gmra.mrb[50].mxu1 %vm4193_vm2, %v6026_v59  ;;  %v12894_v59 = vld [vmem:[%s19775_s3 + $0xf8] sm:$0xff] }
 0x32d   : > { %15168 = vmatprep.mubr.msk.f32.mxu1 %vm4193_vm2, %v6027_v61  ;;  %v16064_v61 = vpack.c.bf16 %v12894_v59, %v12893_v57  ;;  %v7741_v57 = vld [vmem:[#allocation2 + $0x76] sm:$0xff]  ;;  %v7742_v59 = vld [vmem:[#allocation2 + $0x7e] sm:$0xff] }
 0x330   : > { %15169 = vmatmul.mubr.msk.f32.gmra.mrb[52].mxu1 %vm4193_vm2, %v6028_v63  ;;  %v12931_v63 = vld [vmem:[%s19775_s3 + $0x100] sm:$0xff] }
 0x331   : > { %15171 = vmatprep.mubr.msk.f32.mxu1 %vm4193_vm2, %v6029_v2  ;;  %v12932_v2 = vld [vmem:[%s19775_s3 + $0x108] sm:$0xff] }
 0x334   : > { %15172 = vmatmul.mubr.msk.f32.gmra.mrb[54].mxu1 %vm4193_vm2, %v6030_v43  ;;  %v16068_v43 = vpack.c.bf16 %v12932_v2, %v12931_v63  ;;  %v7744_v63 = vld [vmem:[#allocation2 + $0x8e] sm:$0xff]  ;;  %v7745_v2 = vld [vmem:[#allocation2 + $0x96] sm:$0xff] }
 0x335   : > { %15174 = vmatprep.mubr.msk.f32.mxu1 %vm4193_vm2, %v6031_v4  ;;  %v6905_v4 = vld [vmem:[#allocation2 + $0x134] sm:$0xff] }
 0x338   : > { %15175 = vmatmul.mubr.msk.f32.gmra.mrb[56].mxu1 %vm4193_vm2, %v6032_v44  ;;  %v6904_v44 = vld [vmem:[#allocation2 + $0x12c] sm:$0xff] }
 0x339   : > { %15177 = vmatprep.mubr.msk.f32.mxu1 %vm4193_vm2, %v6033_v47  ;;  %v6906_v47 = vld [vmem:[#allocation2 + $0x13c] sm:$0x3f] }
 0x33c   : > { %15178 = vmatmul.mubr.msk.f32.gmra.mrb[58].mxu1 %vm4193_vm2, %v6034_v6  ;;  %v12933_v6 = vld [vmem:[%s19775_s3 + $0x110] sm:$0xff] }
 0x33d   : > { %15180 = vmatprep.mubr.msk.f32.mxu1 %vm4193_vm2, %v6035_v48  ;;  %v12934_v48 = vld [vmem:[%s19775_s3 + $0x118] sm:$0xff] }
 0x340   : > { %15181 = vmatmul.mubr.msk.f32.gmra.mrb[60].mxu1 %vm4193_vm2, %v6036_v50  ;;  %v7301_v50 = vld [vmem:[#allocation2 + $0x25] sm:$0xff] }
 0x341   : > { %15183 = vmatprep.mubr.msk.f32.mxu1 %vm4193_vm2, %v6037_v49  ;;  %v16072_v49 = vpack.c.bf16 %v12934_v48, %v12933_v6  ;;  %v7750_v6 = vld [vmem:[#allocation2 + $0xbe] sm:$0xff]  ;;  %v7751_v48 = vld [vmem:[#allocation2 + $0xc6] sm:$0xff] }
 0x344   : > { %15184 = vmatmul.mubr.msk.f32.gmra.mrb[62].mxu1 %vm4193_vm2, %v6038_v52  ;;  %v7302_v52 = vld [vmem:[#allocation2 + $0x2d] sm:$0xff] }
 0x345   : > { %15186 = vmatprep.mubr.msk.f32.mxu1 %vm4193_vm2, %v6039_v54  ;;  %v7303_v54 = vld [vmem:[#allocation2 + $0x35] sm:$0xff] }
 0x348   : > { %15187 = vmatmul.mubr.msk.f32.gmra.mrb[64].mxu1 %vm4193_vm2, %v6040_v56  ;;  %v7304_v56 = vld [vmem:[#allocation2 + $0x3d] sm:$0xff] }
 0x349   : > { %15189 = vmatprep.mubr.msk.f32.mxu1 %vm4193_vm2, %v6041_v45  ;;  %v7305_v45 = vld [vmem:[#allocation2 + $0x45] sm:$0xff] }
 0x34c   : > { %15190 = vmatmul.mubr.msk.f32.gmra.mrb[66].mxu1 %vm4193_vm2, %v6042_v58  ;;  %v7306_v58 = vld [vmem:[#allocation2 + $0x4d] sm:$0xff] }
 0x34d   : > { %15192 = vmatprep.mubr.msk.f32.mxu1 %vm4193_vm2, %v6043_v46  ;;  %v7307_v46 = vld [vmem:[#allocation2 + $0x55] sm:$0xff] }
 0x350   : > { %15193 = vmatmul.mubr.msk.f32.gmra.mrb[68].mxu1 %vm4193_vm2, %v6044_v60  ;;  %v7308_v60 = vld [vmem:[#allocation2 + $0x5d] sm:$0xff] }
 0x351   : > { %15195 = vmatprep.mubr.msk.f32.mxu1 %vm4193_vm2, %v6045_v62  ;;  %v7309_v62 = vld [vmem:[#allocation2 + $0x65] sm:$0xff] }
 0x354   : > { %15196 = vmatmul.mubr.msk.f32.gmra.mrb[70].mxu1 %vm4193_vm2, %v6046_v0  ;;  %v8325_v0 = vld [vmem:[%s19777_s5] sm:$0xff] }
 0x355   : > { %15206 = vmatprep.mubr.msk.f32.mxu1 %vm4193_vm2, %v6441_v7  ;;  %v16076_v7 = vpack.c.bf16 %v8326_v3, %v8325_v0  ;;  %v7762_v0 = vld [vmem:[#allocation2 + $0x11e] sm:$0xff]  ;;  %v7763_v3 = vld [vmem:[#allocation2 + $0x126] sm:$0xff] }
 0x357   : > { %16077 = vmatprep.subr.bf16.mxu0 %v16076_v7 }
 0x358   : > { %15207 = vmatmul.mubr.msk.f32.vlgmr.msra.gmra.mrb[36].mxu1 %vm4193_vm2, %v6442_v51  ;;  %16079 = vmatpush3.bf16.msra.mxu0 %v16076_v7  ;;  %v7764_v7 = vld [vmem:[#allocation2 + $0x12e] sm:$0xff] }
 0x359   : > { %16055 = vmatpush3.bf16.msra.mxu1 %v18690_v32  ;;  %15209 = vmatprep.mubr.msk.f32.mxu1 %vm4193_vm2, %v18740_v53  ;;  %v6465_v32 = vld [vmem:[#allocation2 + $0xd4] sm:$0xff] }
 0x35a   : > { %16057 = vmatprep.subr.bf16.mxu1 %v16056_v1 }
 0x35c   : > { %15210 = vmatmul.mubr.msk.f32.gmra.mrb[38].mxu1 %vm4193_vm2, %v18747_v10 }
 0x35d   : > { %15212 = vmatprep.mubr.msk.f32.mxu1 %vm4193_vm2, %v18751_v12  ;;  %16059 = vmatpush3.bf16.msra.mxu1 %v16056_v1  ;;  %v8328_v1 = vld [vmem:[%s19777_s5 + $0x18] sm:$0xff] }
 0x35e   : > { %16061 = vmatprep.subr.bf16.mxu1 %v18745_v9  ;;  %v16080_v51 = vpack.c.bf16 %v8328_v1, %v8327_v5  ;;  %v7765_v5 = vld [vmem:[#allocation2 + $0x136] sm:$0xff]  ;;  %v7766_v1 = vld [vmem:[#allocation2 + $0x13e] sm:$0x3f] }
 0x360   : > { %15213 = vmatmul.mubr.msk.f32.gmra.mrb[40].mxu1 %vm4193_vm2, %v18756_v13  ;;  %16081 = vmatprep.subr.bf16.mxu0 %v16080_v51 }
 0x361   : > { %15215 = vmatprep.mubr.msk.f32.mxu1 %vm4193_vm2, %v18760_v14  ;;  %16083 = vmatpush3.bf16.msra.mxu0 %v16080_v51  ;;  %v8289_v51 = vld [vmem:[#allocation3] sm:$0xff] }
 0x362   : > { %15454 = vmatprep.mubr.msk.f32.mxu0 %vm4193_vm2, %v8289_v51 }
 0x364   : > { %15216 = vmatmul.mubr.msk.f32.gmra.mrb[42].mxu1 %vm4193_vm2, %v18764_v15 }
 0x365   : > { %15218 = vmatprep.mubr.msk.f32.mxu1 %vm4193_vm2, %v18768_v16 }
 0x368   : > { %15219 = vmatmul.mubr.msk.f32.gmra.mrb[44].mxu1 %vm4193_vm2, %v18772_v17 }
 0x369   : > { %15221 = vmatprep.mubr.msk.f32.mxu1 %vm4193_vm2, %v18776_v18 }
 0x36c   : > { %15222 = vmatmul.mubr.msk.f32.gmra.mrb[46].mxu1 %vm4193_vm2, %v18780_v19 }
 0x36d   : > { %15224 = vmatprep.mubr.msk.f32.mxu1 %vm4193_vm2, %v18784_v20 }
 0x370   : > { %15225 = vmatmul.mubr.msk.f32.gmra.mrb[48].mxu1 %vm4193_vm2, %v18788_v21 }
 0x371   : > { %15227 = vmatprep.mubr.msk.f32.mxu1 %vm4193_vm2, %v18792_v22 }
 0x374   : > { %15228 = vmatmul.mubr.msk.f32.gmra.mrb[50].mxu1 %vm4193_vm2, %v18796_v23 }
 0x375   : > { %15230 = vmatprep.mubr.msk.f32.mxu1 %vm4193_vm2, %v18800_v24 }
 0x378   : > { %15231 = vmatmul.mubr.msk.f32.gmra.mrb[52].mxu1 %vm4193_vm2, %v18804_v25 }
 0x379   : > { %15233 = vmatprep.mubr.msk.f32.mxu1 %vm4193_vm2, %v6459_v26 }
 0x37c   : > { %15234 = vmatmul.mubr.msk.f32.gmra.mrb[54].mxu1 %vm4193_vm2, %v6460_v27 }
 0x37d   : > { %15236 = vmatprep.mubr.msk.f32.mxu1 %vm4193_vm2, %v6461_v11 }
 0x380   : > { %15237 = vmatmul.mubr.msk.f32.gmra.mrb[56].mxu1 %vm4193_vm2, %v6462_v28 }
 0x381   : > { %15239 = vmatprep.mubr.msk.f32.mxu1 %vm4193_vm2, %v6463_v29 }
 0x384   : > { %15240 = vmatmul.mubr.msk.f32.gmra.mrb[58].mxu1 %vm4193_vm2, %v6464_v31 }
 0x385   : > { %15242 = vmatprep.mubr.msk.f32.mxu1 %vm4193_vm2, %v6465_v32 }
 0x388   : > { %15243 = vmatmul.mubr.msk.f32.gmra.mrb[60].mxu1 %vm4193_vm2, %v6466_v33 }
 0x389   : > { %15245 = vmatprep.mubr.msk.f32.mxu1 %vm4193_vm2, %v6467_v34 }
 0x38c   : > { %15246 = vmatmul.mubr.msk.f32.gmra.mrb[62].mxu1 %vm4193_vm2, %v6468_v35 }
 0x38d   : > { %15248 = vmatprep.mubr.msk.f32.mxu1 %vm4193_vm2, %v6469_v36 }
 0x390   : > { %15249 = vmatmul.mubr.msk.f32.gmra.mrb[64].mxu1 %vm4193_vm2, %v6470_v37 }
 0x391   : > { %15251 = vmatprep.mubr.msk.f32.mxu1 %vm4193_vm2, %v6471_v38 }
 0x394   : > { %15252 = vmatmul.mubr.msk.f32.gmra.mrb[66].mxu1 %vm4193_vm2, %v6472_v39 }
 0x395   : > { %15254 = vmatprep.mubr.msk.f32.mxu1 %vm4193_vm2, %v6473_v40 }
 0x398   : > { %15255 = vmatmul.mubr.msk.f32.gmra.mrb[68].mxu1 %vm4193_vm2, %v6474_v41 }
 0x399   : > { %15257 = vmatprep.mubr.msk.f32.mxu1 %vm4193_vm2, %v6475_v42 }
 0x39c   : > { %15258 = vmatmul.mubr.msk.f32.gmra.mrb[70].mxu1 %vm4193_vm2, %v6476_v55  ;;  %v7740_v55 = vld [vmem:[#allocation2 + $0x6e] sm:$0xff] }
 0x39d   : > { %15268 = vmatprep.mubr.msk.f32.mxu1 %vm4193_vm2, %v18740_v53  ;;  %v7312_v53 = vld [vmem:[#allocation2 + $0x7d] sm:$0xff] }
 0x3a0   : > { %15269 = vmatmul.mubr.msk.f32.vlgmr.msra.gmra.mrb[36].mxu1 %vm4193_vm2, %v18747_v10  ;;  %v7314_v10 = vld [vmem:[#allocation2 + $0x8d] sm:$0xff] }
 0x3a1   : > { %16063 = vmatpush3.bf16.msra.mxu1 %v18745_v9  ;;  %15271 = vmatprep.mubr.msk.f32.mxu1 %vm4193_vm2, %v18751_v12  ;;  %v7313_v9 = vld [vmem:[#allocation2 + $0x85] sm:$0xff]  ;;  %v7315_v12 = vld [vmem:[#allocation2 + $0x95] sm:$0xff] }
 0x3a2   : > { %16065 = vmatprep.subr.bf16.mxu1 %v16064_v61 }
 0x3a4   : > { %15272 = vmatmul.mubr.msk.f32.gmra.mrb[38].mxu1 %vm4193_vm2, %v18756_v13  ;;  %v7316_v13 = vld [vmem:[#allocation2 + $0x9d] sm:$0xff] }
 0x3a5   : > { %15274 = vmatprep.mubr.msk.f32.mxu1 %vm4193_vm2, %v18760_v14  ;;  %16067 = vmatpush3.bf16.msra.mxu1 %v16064_v61  ;;  %v7317_v14 = vld [vmem:[#allocation2 + $0xa5] sm:$0xff] }
 0x3a6   : > { %16069 = vmatprep.subr.bf16.mxu1 %v16068_v43  ;;  %v7743_v61 = vld [vmem:[#allocation2 + $0x86] sm:$0xff] }
 0x3a8   : > { %15275 = vmatmul.mubr.msk.f32.gmra.mrb[40].mxu1 %vm4193_vm2, %v18764_v15  ;;  %v7318_v15 = vld [vmem:[#allocation2 + $0xad] sm:$0xff] }
 0x3a9   : > { %15277 = vmatprep.mubr.msk.f32.mxu1 %vm4193_vm2, %v18768_v16  ;;  %v7319_v16 = vld [vmem:[#allocation2 + $0xb5] sm:$0xff] }
 0x3ac   : > { %15278 = vmatmul.mubr.msk.f32.gmra.mrb[42].mxu1 %vm4193_vm2, %v18772_v17  ;;  %v7320_v17 = vld [vmem:[#allocation2 + $0xbd] sm:$0xff] }
 0x3ad   : > { %15280 = vmatprep.mubr.msk.f32.mxu1 %vm4193_vm2, %v18776_v18  ;;  %v7321_v18 = vld [vmem:[#allocation2 + $0xc5] sm:$0xff] }
 0x3b0   : > { %15281 = vmatmul.mubr.msk.f32.gmra.mrb[44].mxu1 %vm4193_vm2, %v18780_v19  ;;  %v7322_v19 = vld [vmem:[#allocation2 + $0xcd] sm:$0xff] }
 0x3b1   : > { %15283 = vmatprep.mubr.msk.f32.mxu1 %vm4193_vm2, %v18784_v20  ;;  %v7323_v20 = vld [vmem:[#allocation2 + $0xd5] sm:$0xff] }
 0x3b4   : > { %15284 = vmatmul.mubr.msk.f32.gmra.mrb[46].mxu1 %vm4193_vm2, %v18788_v21  ;;  %v7324_v21 = vld [vmem:[#allocation2 + $0xdd] sm:$0xff] }
 0x3b5   : > { %15286 = vmatprep.mubr.msk.f32.mxu1 %vm4193_vm2, %v18792_v22  ;;  %v7325_v22 = vld [vmem:[#allocation2 + $0xe5] sm:$0xff] }
 0x3b8   : > { %15287 = vmatmul.mubr.msk.f32.gmra.mrb[48].mxu1 %vm4193_vm2, %v18796_v23  ;;  %v7326_v23 = vld [vmem:[#allocation2 + $0xed] sm:$0xff] }
 0x3b9   : > { %15289 = vmatprep.mubr.msk.f32.mxu1 %vm4193_vm2, %v18800_v24  ;;  %v7327_v24 = vld [vmem:[#allocation2 + $0xf5] sm:$0xff] }
 0x3bc   : > { %15290 = vmatmul.mubr.msk.f32.gmra.mrb[50].mxu1 %vm4193_vm2, %v18804_v25  ;;  %v7328_v25 = vld [vmem:[#allocation2 + $0xfd] sm:$0xff] }
 0x3bd   : > { %15292 = vmatprep.mubr.msk.f32.mxu1 %vm4193_vm2, %v6459_v26  ;;  %v7329_v26 = vld [vmem:[#allocation2 + $0x105] sm:$0xff] }
 0x3c0   : > { %15293 = vmatmul.mubr.msk.f32.gmra.mrb[52].mxu1 %vm4193_vm2, %v6460_v27  ;;  %v7330_v27 = vld [vmem:[#allocation2 + $0x10d] sm:$0xff] }
 0x3c1   : > { %15295 = vmatprep.mubr.msk.f32.mxu1 %vm4193_vm2, %v6461_v11  ;;  %v7331_v11 = vld [vmem:[#allocation2 + $0x115] sm:$0xff] }
 0x3c4   : > { %15296 = vmatmul.mubr.msk.f32.gmra.mrb[54].mxu1 %vm4193_vm2, %v6462_v28  ;;  %v7332_v28 = vld [vmem:[#allocation2 + $0x11d] sm:$0xff] }
 0x3c5   : > { %15298 = vmatprep.mubr.msk.f32.mxu1 %vm4193_vm2, %v6463_v29  ;;  %v7333_v29 = vld [vmem:[#allocation2 + $0x125] sm:$0xff] }
 0x3c8   : > { %15299 = vmatmul.mubr.msk.f32.gmra.mrb[56].mxu1 %vm4193_vm2, %v6464_v31  ;;  %v7335_v31 = vld [vmem:[#allocation2 + $0x135] sm:$0xff] }
 0x3c9   : > { %15301 = vmatprep.mubr.msk.f32.mxu1 %vm4193_vm2, %v6465_v32  ;;  %v7334_v32 = vld [vmem:[#allocation2 + $0x12d] sm:$0xff] }
 0x3cc   : > { %15302 = vmatmul.mubr.msk.f32.gmra.mrb[58].mxu1 %vm4193_vm2, %v6466_v33  ;;  %v7336_v33 = vld [vmem:[#allocation2 + $0x13d] sm:$0x3f] }
 0x3cd   : > { %15304 = vmatprep.mubr.msk.f32.mxu1 %vm4193_vm2, %v6467_v34  ;;  %v7731_v34 = vld [vmem:[#allocation2 + $0x26] sm:$0xff] }
 0x3d0   : > { %15305 = vmatmul.mubr.msk.f32.gmra.mrb[60].mxu1 %vm4193_vm2, %v6468_v35  ;;  %v7732_v35 = vld [vmem:[#allocation2 + $0x2e] sm:$0xff] }
 0x3d1   : > { %15307 = vmatprep.mubr.msk.f32.mxu1 %vm4193_vm2, %v6469_v36  ;;  %v7733_v36 = vld [vmem:[#allocation2 + $0x36] sm:$0xff] }
 0x3d4   : > { %15308 = vmatmul.mubr.msk.f32.gmra.mrb[62].mxu1 %vm4193_vm2, %v6470_v37  ;;  %v7734_v37 = vld [vmem:[#allocation2 + $0x3e] sm:$0xff] }
 0x3d5   : > { %15310 = vmatprep.mubr.msk.f32.mxu1 %vm4193_vm2, %v6471_v38  ;;  %v7735_v38 = vld [vmem:[#allocation2 + $0x46] sm:$0xff] }
 0x3d8   : > { %15311 = vmatmul.mubr.msk.f32.gmra.mrb[64].mxu1 %vm4193_vm2, %v6472_v39  ;;  %v7736_v39 = vld [vmem:[#allocation2 + $0x4e] sm:$0xff] }
 0x3d9   : > { %15313 = vmatprep.mubr.msk.f32.mxu1 %vm4193_vm2, %v6473_v40  ;;  %v7737_v40 = vld [vmem:[#allocation2 + $0x56] sm:$0xff] }
 0x3dc   : > { %15314 = vmatmul.mubr.msk.f32.gmra.mrb[66].mxu1 %vm4193_vm2, %v6474_v41  ;;  %v7738_v41 = vld [vmem:[#allocation2 + $0x5e] sm:$0xff] }
 0x3dd   : > { %15316 = vmatprep.mubr.msk.f32.mxu1 %vm4193_vm2, %v6475_v42  ;;  %v7739_v42 = vld [vmem:[#allocation2 + $0x66] sm:$0xff] }
 0x3e0   : > { %15317 = vmatmul.mubr.msk.f32.gmra.mrb[68].mxu1 %vm4193_vm2, %v6904_v44  ;;  %v7748_v44 = vld [vmem:[#allocation2 + $0xae] sm:$0xff] }
 0x3e1   : > { %15319 = vmatprep.mubr.msk.f32.mxu1 %vm4193_vm2, %v6905_v4  ;;  %v7747_v4 = vld [vmem:[#allocation2 + $0xa6] sm:$0xff] }
 0x3e4   : > { %15320 = vmatmul.mubr.msk.f32.gmra.mrb[70].mxu1 %vm4193_vm2, %v6906_v47  ;;  %v7749_v47 = vld [vmem:[#allocation2 + $0xb6] sm:$0xff] }
 0x3e5   : > { %15330 = vmatprep.mubr.msk.f32.mxu1 %vm4193_vm2, %v7301_v50  ;;  %v7752_v50 = vld [vmem:[#allocation2 + $0xce] sm:$0xff] }
 0x3e8   : > { %15331 = vmatmul.mubr.msk.f32.vlgmr.msra.gmra.mrb[36].mxu1 %vm4193_vm2, %v7302_v52  ;;  %v7754_v52 = vld [vmem:[#allocation2 + $0xde] sm:$0xff] }
 0x3e9   : > { %16071 = vmatpush3.bf16.msra.mxu1 %v16068_v43  ;;  %15333 = vmatprep.mubr.msk.f32.mxu1 %vm4193_vm2, %v7303_v54  ;;  %v7746_v43 = vld [vmem:[#allocation2 + $0x9e] sm:$0xff]  ;;  %v7755_v54 = vld [vmem:[#allocation2 + $0xe6] sm:$0xff] }
 0x3ea   : > { %16073 = vmatprep.subr.bf16.mxu1 %v16072_v49 }
 0x3ec   : > { %15334 = vmatmul.mubr.msk.f32.gmra.mrb[38].mxu1 %vm4193_vm2, %v7304_v56  ;;  %v7756_v56 = vld [vmem:[#allocation2 + $0xee] sm:$0xff] }
 0x3ed   : > { %15336 = vmatprep.mubr.msk.f32.mxu1 %vm4193_vm2, %v7305_v45  ;;  %16075 = vmatpush3.bf16.msra.mxu1 %v16072_v49  ;;  %v7753_v49 = vld [vmem:[#allocation2 + $0xd6] sm:$0xff] }
 0x3ee   : > { %v7757_v45 = vld [vmem:[#allocation2 + $0xf6] sm:$0xff] }
 0x3f0   : > { %15337 = vmatmul.mubr.msk.f32.gmra.mrb[40].mxu1 %vm4193_vm2, %v7306_v58  ;;  %v7758_v58 = vld [vmem:[#allocation2 + $0xfe] sm:$0xff] }
 0x3f1   : > { %15339 = vmatprep.mubr.msk.f32.mxu1 %vm4193_vm2, %v7307_v46  ;;  %v7759_v46 = vld [vmem:[#allocation2 + $0x106] sm:$0xff] }
 0x3f4   : > { %15340 = vmatmul.mubr.msk.f32.gmra.mrb[42].mxu1 %vm4193_vm2, %v7308_v60  ;;  %v7760_v60 = vld [vmem:[#allocation2 + $0x10e] sm:$0xff] }
 0x3f5   : > { %15342 = vmatprep.mubr.msk.f32.mxu1 %vm4193_vm2, %v7309_v62  ;;  %v7761_v62 = vld [vmem:[#allocation2 + $0x116] sm:$0xff] }
 0x3f8   : > { %15343 = vmatmul.mubr.msk.f32.gmra.mrb[44].mxu1 %vm4193_vm2, %v7310_v8  ;;  %v13008_v8 = vld [vmem:[%s19777_s5 + $0x20] sm:$0xff] }
 0x3f9   : > { %15345 = vmatprep.mubr.msk.f32.mxu1 %vm4193_vm2, %v7311_v30  ;;  %v13009_v30 = vld [vmem:[%s19777_s5 + $0x28] sm:$0xff] }
 0x3fc   : > { %15346 = vmatmul.mubr.msk.f32.gmra.mrb[46].mxu1 %vm4193_vm2, %v7312_v53  ;;  %v16084_v53 = vpack.c.bf16 %v13009_v30, %v13008_v8 }
 0x3fd   : > { %15348 = vmatprep.mubr.msk.f32.mxu1 %vm4193_vm2, %v7313_v9  ;;  %v8290_v9 = vld [vmem:[#allocation3 + $0x8] sm:$0xff] }
 0x3fe   : > { %15455 = vmatmul.mubr.msk.f32.vlgmr.msra.gmra.mrb[36].mxu0 %vm4193_vm2, %v8290_v9  ;;  %16085 = vmatprep.subr.bf16.mxu0 %v16084_v53 }
 0x3ff   : > { %16087 = vmatpush3.bf16.msra.mxu0 %v16084_v53 }
 0x400   : > { %15349 = vmatmul.mubr.msk.f32.gmra.mrb[48].mxu1 %vm4193_vm2, %v7314_v10  ;;  %v13010_v10 = vld [vmem:[%s19777_s5 + $0x30] sm:$0xff] }
 0x401   : > { %15351 = vmatprep.mubr.msk.f32.mxu1 %vm4193_vm2, %v7315_v12  ;;  %v13011_v12 = vld [vmem:[%s19777_s5 + $0x38] sm:$0xff] }
 0x404   : > { %15352 = vmatmul.mubr.msk.f32.gmra.mrb[50].mxu1 %vm4193_vm2, %v7316_v13  ;;  %v16088_v13 = vpack.c.bf16 %v13011_v12, %v13010_v10 }
 0x405   : > { %15354 = vmatprep.mubr.msk.f32.mxu1 %vm4193_vm2, %v7317_v14  ;;  %v13048_v14 = vld [vmem:[%s19777_s5 + $0x40] sm:$0xff] }
 0x406   : > { %16089 = vmatprep.subr.bf16.mxu0 %v16088_v13 }
 0x407   : > { %16091 = vmatpush3.bf16.msra.mxu0 %v16088_v13 }
 0x408   : > { %15355 = vmatmul.mubr.msk.f32.gmra.mrb[52].mxu1 %vm4193_vm2, %v7318_v15  ;;  %v13049_v15 = vld [vmem:[%s19777_s5 + $0x48] sm:$0xff] }
 0x409   : > { %15357 = vmatprep.mubr.msk.f32.mxu1 %vm4193_vm2, %v7319_v16  ;;  %v19001_v16 = vpack.c.bf16 %v13049_v15, %v13048_v14 }
 0x40b   : > { %16093 = vmatprep.subr.bf16.mxu0 %v19001_v16 }
 0x40c   : > { %15358 = vmatmul.mubr.msk.f32.gmra.mrb[54].mxu1 %vm4193_vm2, %v7320_v17  ;;  %v19007_v17 = vld [vmem:[%s19776_s4] ss:$0 sm:$0xff] }
 0x40d   : > { %15360 = vmatprep.mubr.msk.f32.mxu1 %vm4193_vm2, %v7321_v18 }
 0x410   : > { %15361 = vmatmul.mubr.msk.f32.gmra.mrb[56].mxu1 %vm4193_vm2, %v7322_v19 }
 0x411   : > { %15363 = vmatprep.mubr.msk.f32.mxu1 %vm4193_vm2, %v7323_v20 }
 0x414   : > { %15364 = vmatmul.mubr.msk.f32.gmra.mrb[58].mxu1 %vm4193_vm2, %v7324_v21 }
 0x415   : > { %15366 = vmatprep.mubr.msk.f32.mxu1 %vm4193_vm2, %v7325_v22 }
 0x418   : > { %15367 = vmatmul.mubr.msk.f32.gmra.mrb[60].mxu1 %vm4193_vm2, %v7326_v23 }
 0x419   : > { %15369 = vmatprep.mubr.msk.f32.mxu1 %vm4193_vm2, %v7327_v24 }
 0x41c   : > { %15370 = vmatmul.mubr.msk.f32.gmra.mrb[62].mxu1 %vm4193_vm2, %v7328_v25 }
 0x41d   : > { %15372 = vmatprep.mubr.msk.f32.mxu1 %vm4193_vm2, %v7329_v26 }
 0x420   : > { %15373 = vmatmul.mubr.msk.f32.gmra.mrb[64].mxu1 %vm4193_vm2, %v7330_v27 }
 0x421   : > { %15375 = vmatprep.mubr.msk.f32.mxu1 %vm4193_vm2, %v7331_v11 }
 0x424   : > { %15376 = vmatmul.mubr.msk.f32.gmra.mrb[66].mxu1 %vm4193_vm2, %v7332_v28 }
 0x425   : > { %15378 = vmatprep.mubr.msk.f32.mxu1 %vm4193_vm2, %v7333_v29 }
 0x428   : > { %15379 = vmatmul.mubr.msk.f32.gmra.mrb[68].mxu1 %vm4193_vm2, %v7334_v32 }
 0x429   : > { %15381 = vmatprep.mubr.msk.f32.mxu1 %vm4193_vm2, %v7335_v31 }
 0x42c   : > { %15382 = vmatmul.mubr.msk.f32.gmra.mrb[70].mxu1 %vm4193_vm2, %v7336_v33 }
 0x42d   : > { %15392 = vmatprep.mubr.msk.f32.mxu1 %vm4193_vm2, %v7731_v34 }
 0x430   : > { %15393 = vmatmul.mubr.msk.f32.vlgmr.msra.gmra.mrb[36].mxu1 %vm4193_vm2, %v7732_v35 }
 0x431   : > { %15395 = vmatprep.mubr.msk.f32.mxu1 %vm4193_vm2, %v7733_v36 }
 0x434   : > { %15396 = vmatmul.mubr.msk.f32.gmra.mrb[38].mxu1 %vm4193_vm2, %v7734_v37 }
 0x435   : > { %15398 = vmatprep.mubr.msk.f32.mxu1 %vm4193_vm2, %v7735_v38 }
 0x438   : > { %15399 = vmatmul.mubr.msk.f32.gmra.mrb[40].mxu1 %vm4193_vm2, %v7736_v39 }
 0x439   : > { %15401 = vmatprep.mubr.msk.f32.mxu1 %vm4193_vm2, %v7737_v40 }
 0x43c   : > { %15402 = vmatmul.mubr.msk.f32.gmra.mrb[42].mxu1 %vm4193_vm2, %v7738_v41 }
 0x43d   : > { %15404 = vmatprep.mubr.msk.f32.mxu1 %vm4193_vm2, %v7739_v42 }
 0x440   : > { %15405 = vmatmul.mubr.msk.f32.gmra.mrb[44].mxu1 %vm4193_vm2, %v7740_v55 }
 0x441   : > { %15407 = vmatprep.mubr.msk.f32.mxu1 %vm4193_vm2, %v7741_v57 }
 0x444   : > { %15408 = vmatmul.mubr.msk.f32.gmra.mrb[46].mxu1 %vm4193_vm2, %v7742_v59 }
 0x445   : > { %15410 = vmatprep.mubr.msk.f32.mxu1 %vm4193_vm2, %v7743_v61 }
 0x448   : > { %15411 = vmatmul.mubr.msk.f32.gmra.mrb[48].mxu1 %vm4193_vm2, %v7744_v63 }
 0x449   : > { %15413 = vmatprep.mubr.msk.f32.mxu1 %vm4193_vm2, %v7745_v2 }
 0x44c   : > { %15414 = vmatmul.mubr.msk.f32.gmra.mrb[50].mxu1 %vm4193_vm2, %v7746_v43 }
 0x44d   : > { %15416 = vmatprep.mubr.msk.f32.mxu1 %vm4193_vm2, %v7747_v4 }
 0x450   : > { %15417 = vmatmul.mubr.msk.f32.gmra.mrb[52].mxu1 %vm4193_vm2, %v7748_v44 }
 0x451   : > { %15419 = vmatprep.mubr.msk.f32.mxu1 %vm4193_vm2, %v7749_v47 }
 0x454   : > { %15420 = vmatmul.mubr.msk.f32.gmra.mrb[54].mxu1 %vm4193_vm2, %v7750_v6 }
 0x455   : > { %15422 = vmatprep.mubr.msk.f32.mxu1 %vm4193_vm2, %v7751_v48 }
 0x458   : > { %15423 = vmatmul.mubr.msk.f32.gmra.mrb[56].mxu1 %vm4193_vm2, %v7752_v50 }
 0x459   : > { %15425 = vmatprep.mubr.msk.f32.mxu1 %vm4193_vm2, %v7753_v49 }
 0x45c   : > { %15426 = vmatmul.mubr.msk.f32.gmra.mrb[58].mxu1 %vm4193_vm2, %v7754_v52 }
 0x45d   : > { %15428 = vmatprep.mubr.msk.f32.mxu1 %vm4193_vm2, %v7755_v54 }
 0x460   : > { %15429 = vmatmul.mubr.msk.f32.gmra.mrb[60].mxu1 %vm4193_vm2, %v7756_v56 }
 0x461   : > { %15431 = vmatprep.mubr.msk.f32.mxu1 %vm4193_vm2, %v7757_v45 }
 0x464   : > { %15432 = vmatmul.mubr.msk.f32.gmra.mrb[62].mxu1 %vm4193_vm2, %v7758_v58 }
 0x465   : > { %15434 = vmatprep.mubr.msk.f32.mxu1 %vm4193_vm2, %v7759_v46 }
 0x468   : > { %15435 = vmatmul.mubr.msk.f32.gmra.mrb[64].mxu1 %vm4193_vm2, %v7760_v60 }
 0x469   : > { %15437 = vmatprep.mubr.msk.f32.mxu1 %vm4193_vm2, %v7761_v62 }
 0x46c   : > { %15438 = vmatmul.mubr.msk.f32.gmra.mrb[66].mxu1 %vm4193_vm2, %v7762_v0 }
 0x46d   : > { %15440 = vmatprep.mubr.msk.f32.mxu1 %vm4193_vm2, %v7763_v3 }
 0x470   : > { %15441 = vmatmul.mubr.msk.f32.gmra.mrb[68].mxu1 %vm4193_vm2, %v7764_v7 }
 0x471   : > { %15443 = vmatprep.mubr.msk.f32.mxu1 %vm4193_vm2, %v7765_v5 }
 0x474   : > { %15444 = vmatmul.mubr.msk.f32.gmra.mrb[70].mxu1 %vm4193_vm2, %v7766_v1 }
 0x503   : > { %v15394_v18 = vpop.f32.mrb[36].mxu1 }
 0x504   : > { %v16222_v19 = vadd.f32 %v15394_v18, %v19007_v17  ;;  %v7946_v20 = vpop.f32.mrb[37].mxu1 }
 0x505   : > { %v16223_v21 = vadd.f32 %v19007_v17, %v7946_v20 }
 0x506   : > { %v8162_v22 = vmax.f32 %v16222_v19, 0.0 }
 0x507   : > { %v8161_v23 = vmax.f32 %v16223_v21, 0.0  ;;  %v15397_v24 = vpop.f32.mrb[38].mxu1 }
 0x508   : > { %8239 = vst.msk [vmem:[#allocation3 + $0x1b] sm:$0xff] %vm4193_vm2, %v8162_v22  ;;  %v16224_v25 = vadd.f32 %v15397_v24, %v19007_v17  ;;  %v7956_v26 = vpop.f32.mrb[39].mxu1 }
 0x509   : > { %8238 = vst.msk [vmem:[#allocation3 + $0x13] sm:$0xff] %vm4193_vm2, %v8161_v23  ;;  %v16225_v27 = vadd.f32 %v19007_v17, %v7956_v26 }
 0x50a   : > { %v8164_v11 = vmax.f32 %v16224_v25, 0.0 }
 0x50b   : > { %v8163_v28 = vmax.f32 %v16225_v27, 0.0  ;;  %v15400_v29 = vpop.f32.mrb[40].mxu1 }
 0x50c   : > { %8241 = vst.msk [vmem:[#allocation3 + $0x2b] sm:$0xff] %vm4193_vm2, %v8164_v11  ;;  %v16226_v31 = vadd.f32 %v15400_v29, %v19007_v17  ;;  %v7966_v32 = vpop.f32.mrb[41].mxu1 }
 0x50d   : > { %8240 = vst.msk [vmem:[#allocation3 + $0x23] sm:$0xfc] %vm4238_vm4, %v8163_v28  ;;  %v16227_v33 = vadd.f32 %v19007_v17, %v7966_v32 }
 0x50e   : > { %v8166_v34 = vmax.f32 %v16226_v31, 0.0 }
 0x50f   : > { %v8165_v35 = vmax.f32 %v16227_v33, 0.0  ;;  %v15403_v36 = vpop.f32.mrb[42].mxu1 }
 0x510   : > { %8244 = vst.msk [vmem:[#allocation3 + $0x3b] sm:$0xff] %vm4193_vm2, %v8166_v34  ;;  %v16228_v37 = vadd.f32 %v15403_v36, %v19007_v17  ;;  %v7976_v38 = vpop.f32.mrb[43].mxu1  ;;  %v8291_v39 = vld [vmem:[#allocation3 + $0x10] sm:$0xff]  ;;  %v8292_v40 = vld [vmem:[#allocation3 + $0x18] sm:$0xff] }
 0x511   : > { %8242 = vst.msk [vmem:[#allocation3 + $0x33] sm:$0x3] %vm4241_vm5, %v8165_v35  ;;  %v16229_v41 = vadd.f32 %v19007_v17, %v7976_v38  ;;  %15457 = vmatprep.mubr.msk.f32.mxu0 %vm4193_vm2, %v8291_v39 }
 0x512   : > { %8243 = vst.msk [vmem:[#allocation3 + $0x33] sm:$0xf0] %vm4243_vm6, %v8165_v35  ;;  %v8168_v42 = vmax.f32 %v16228_v37, 0.0  ;;  %15458 = vmatmul.mubr.msk.f32.gmra.mrb[38].mxu0 %vm4193_vm2, %v8292_v40 }
 0x513   : > { %v8167_v55 = vmax.f32 %v16229_v41, 0.0  ;;  %v15406_v57 = vpop.f32.mrb[44].mxu1 }
 0x514   : > { %8247 = vst.msk [vmem:[#allocation3 + $0x4b] sm:$0xff] %vm4193_vm2, %v8168_v42  ;;  %v16230_v59 = vadd.f32 %v15406_v57, %v19007_v17  ;;  %v7986_v61 = vpop.f32.mrb[45].mxu1  ;;  %v8293_v63 = vld [vmem:[#allocation3 + $0x20] sm:$0xff]  ;;  %v8294_v2 = vld [vmem:[#allocation3 + $0x28] sm:$0xff] }
 0x515   : > { %8245 = vst.msk [vmem:[#allocation3 + $0x43] sm:$0xf] %vm4234_vm3, %v8167_v55  ;;  %v16231_v43 = vadd.f32 %v19007_v17, %v7986_v61  ;;  %15460 = vmatprep.mubr.msk.f32.mxu0 %vm4193_vm2, %v8293_v63 }
 0x516   : > { %8246 = vst.msk [vmem:[#allocation3 + $0x43] sm:$0xc0] %vm4247_vm7, %v8167_v55  ;;  %v8170_v4 = vmax.f32 %v16230_v59, 0.0  ;;  %15461 = vmatmul.mubr.msk.f32.gmra.mrb[40].mxu0 %vm4193_vm2, %v8294_v2 }
 0x517   : > { %v8169_v44 = vmax.f32 %v16231_v43, 0.0  ;;  %v15409_v47 = vpop.f32.mrb[46].mxu1 }
 0x518   : > { %8249 = vst.msk [vmem:[#allocation3 + $0x5b] sm:$0xff] %vm4193_vm2, %v8170_v4  ;;  %v16232_v6 = vadd.f32 %v15409_v47, %v19007_v17  ;;  %v7996_v48 = vpop.f32.mrb[47].mxu1 }
 0x519   : > { %v8295_v50 = vld [vmem:[#allocation3 + $0x30] sm:$0xff]  ;;  %v8296_v49 = vld [vmem:[#allocation3 + $0x38] sm:$0xff]  ;;  %8248 = vst.msk [vmem:[#allocation3 + $0x53] sm:$0x3f] %vm4250_vm8, %v8169_v44  ;;  %v16233_v52 = vadd.f32 %v19007_v17, %v7996_v48 }
 0x51a   : > { %15463 = vmatprep.mubr.msk.f32.mxu0 %vm4193_vm2, %v8295_v50  ;;  %v8172_v54 = vmax.f32 %v16232_v6, 0.0 }
 0x51b   : > { %15464 = vmatmul.mubr.msk.f32.gmra.mrb[42].mxu0 %vm4193_vm2, %v8296_v49  ;;  %v8171_v56 = vmax.f32 %v16233_v52, 0.0  ;;  %v15412_v45 = vpop.f32.mrb[48].mxu1 }
 0x51c   : > { %8251 = vst.msk [vmem:[#allocation3 + $0x6b] sm:$0xfc] %vm4238_vm4, %v8172_v54  ;;  %v16234_v58 = vadd.f32 %v15412_v45, %v19007_v17  ;;  %v8006_v46 = vpop.f32.mrb[49].mxu1  ;;  %v8297_v60 = vld [vmem:[#allocation3 + $0x40] sm:$0xff] }
 0x51d   : > { %v8298_v62 = vld [vmem:[#allocation3 + $0x48] sm:$0xff]  ;;  %8250 = vst.msk [vmem:[#allocation3 + $0x63] sm:$0xff] %vm4193_vm2, %v8171_v56  ;;  %v16235_v0 = vadd.f32 %v19007_v17, %v8006_v46  ;;  %15466 = vmatprep.mubr.msk.f32.mxu0 %vm4193_vm2, %v8297_v60 }
 0x51e   : > { %v8174_v3 = vmax.f32 %v16234_v58, 0.0 }
 0x51f   : > { %15467 = vmatmul.mubr.msk.f32.gmra.mrb[44].mxu0 %vm4193_vm2, %v8298_v62  ;;  %v8173_v5 = vmax.f32 %v16235_v0, 0.0  ;;  %v15415_v7 = vpop.f32.mrb[50].mxu1 }
 0x520   : > { %8253 = vst.msk [vmem:[#allocation3 + $0x7b] sm:$0x3] %vm4241_vm5, %v8174_v3  ;;  %v16236_v1 = vadd.f32 %v15415_v7, %v19007_v17  ;;  %v8016_v51 = vpop.f32.mrb[51].mxu1  ;;  %v8299_v8 = vld [vmem:[#allocation3 + $0x50] sm:$0xff]  ;;  %v8300_v30 = vld [vmem:[#allocation3 + $0x58] sm:$0xff] }
 0x521   : > { %8254 = vst.msk [vmem:[#allocation3 + $0x7b] sm:$0xf0] %vm4243_vm6, %v8174_v3  ;;  %v16237_v53 = vadd.f32 %v19007_v17, %v8016_v51  ;;  %15469 = vmatprep.mubr.msk.f32.mxu0 %vm4193_vm2, %v8299_v8 }
 0x522   : > { %8252 = vst.msk [vmem:[#allocation3 + $0x73] sm:$0xff] %vm4193_vm2, %v8173_v5  ;;  %v8176_v9 = vmax.f32 %v16236_v1, 0.0 }
 0x523   : > { %15470 = vmatmul.mubr.msk.f32.gmra.mrb[46].mxu0 %vm4193_vm2, %v8300_v30  ;;  %v8175_v10 = vmax.f32 %v16237_v53, 0.0  ;;  %v15418_v12 = vpop.f32.mrb[52].mxu1 }
 0x524   : > { %8256 = vst.msk [vmem:[#allocation3 + $0x8b] sm:$0xf] %vm4234_vm3, %v8176_v9  ;;  %v16238_v13 = vadd.f32 %v15418_v12, %v19007_v17  ;;  %v8026_v14 = vpop.f32.mrb[53].mxu1  ;;  %v8301_v15 = vld [vmem:[#allocation3 + $0x60] sm:$0xff]  ;;  %v8302_v18 = vld [vmem:[#allocation3 + $0x68] sm:$0xff] }
 0x525   : > { %8257 = vst.msk [vmem:[#allocation3 + $0x8b] sm:$0xc0] %vm4247_vm7, %v8176_v9  ;;  %v16239_v19 = vadd.f32 %v19007_v17, %v8026_v14  ;;  %15472 = vmatprep.mubr.msk.f32.mxu0 %vm4193_vm2, %v8301_v15 }
 0x526   : > { %8255 = vst.msk [vmem:[#allocation3 + $0x83] sm:$0xff] %vm4193_vm2, %v8175_v10  ;;  %v8178_v20 = vmax.f32 %v16238_v13, 0.0 }
 0x527   : > { %15473 = vmatmul.mubr.msk.f32.gmra.mrb[48].mxu0 %vm4193_vm2, %v8302_v18  ;;  %v8177_v21 = vmax.f32 %v16239_v19, 0.0  ;;  %v15421_v22 = vpop.f32.mrb[54].mxu1 }
 0x528   : > { %8259 = vst.msk [vmem:[#allocation3 + $0x9b] sm:$0x3f] %vm4250_vm8, %v8178_v20  ;;  %v16240_v23 = vadd.f32 %v15421_v22, %v19007_v17  ;;  %v8036_v24 = vpop.f32.mrb[55].mxu1 }
 0x529   : > { %v8303_v25 = vld [vmem:[#allocation3 + $0x70] sm:$0xff]  ;;  %v8304_v26 = vld [vmem:[#allocation3 + $0x78] sm:$0xff]  ;;  %8258 = vst.msk [vmem:[#allocation3 + $0x93] sm:$0xff] %vm4193_vm2, %v8177_v21  ;;  %v16241_v27 = vadd.f32 %v19007_v17, %v8036_v24 }
 0x52a   : > { %15475 = vmatprep.mubr.msk.f32.mxu0 %vm4193_vm2, %v8303_v25  ;;  %v8180_v11 = vmax.f32 %v16240_v23, 0.0 }
 0x52b   : > { %15476 = vmatmul.mubr.msk.f32.gmra.mrb[50].mxu0 %vm4193_vm2, %v8304_v26  ;;  %v8179_v28 = vmax.f32 %v16241_v27, 0.0  ;;  %v15424_v29 = vpop.f32.mrb[56].mxu1 }
 0x52c   : > { %8261 = vst.msk [vmem:[#allocation3 + $0xab] sm:$0xff] %vm4193_vm2, %v8180_v11  ;;  %v16242_v31 = vadd.f32 %v15424_v29, %v19007_v17  ;;  %v8046_v32 = vpop.f32.mrb[57].mxu1 }
 0x52d   : > { %v8305_v33 = vld [vmem:[#allocation3 + $0x80] sm:$0xff]  ;;  %v8306_v34 = vld [vmem:[#allocation3 + $0x88] sm:$0xff]  ;;  %8260 = vst.msk [vmem:[#allocation3 + $0xa3] sm:$0xff] %vm4193_vm2, %v8179_v28  ;;  %v16243_v35 = vadd.f32 %v19007_v17, %v8046_v32 }
 0x52e   : > { %15478 = vmatprep.mubr.msk.f32.mxu0 %vm4193_vm2, %v8305_v33  ;;  %v8182_v36 = vmax.f32 %v16242_v31, 0.0 }
 0x52f   : > { %15479 = vmatmul.mubr.msk.f32.gmra.mrb[52].mxu0 %vm4193_vm2, %v8306_v34  ;;  %v8181_v37 = vmax.f32 %v16243_v35, 0.0  ;;  %v15427_v38 = vpop.f32.mrb[58].mxu1 }
 0x530   : > { %8263 = vst.msk [vmem:[#allocation3 + $0xbb] sm:$0xff] %vm4193_vm2, %v8182_v36  ;;  %v16244_v39 = vadd.f32 %v15427_v38, %v19007_v17  ;;  %v8056_v40 = vpop.f32.mrb[59].mxu1  ;;  %v8307_v41 = vld [vmem:[#allocation3 + $0x90] sm:$0xff]  ;;  %v8308_v42 = vld [vmem:[#allocation3 + $0x98] sm:$0xff]  ;;  %v8718_v36 = vld [vmem:[#allocation3 + $0x1] sm:$0xff] }
 0x531   : > { %8262 = vst.msk [vmem:[#allocation3 + $0xb3] sm:$0xfc] %vm4238_vm4, %v8181_v37  ;;  %v16245_v55 = vadd.f32 %v19007_v17, %v8056_v40  ;;  %15481 = vmatprep.mubr.msk.f32.mxu0 %vm4193_vm2, %v8307_v41  ;;  %v13051_v37 = vld [vmem:[%s19777_s5 + $0x58] sm:$0xff]  ;;  %v13088_v40 = vld [vmem:[%s19777_s5 + $0x60] sm:$0xff]  ;;  %v13089_v41 = vld [vmem:[%s19777_s5 + $0x68] sm:$0xff] }
 0x532   : > { %v8184_v57 = vmax.f32 %v16244_v39, 0.0  ;;  %v8719_v38 = vld [vmem:[#allocation3 + $0x9] sm:$0xff] }
 0x533   : > { %15482 = vmatmul.mubr.msk.f32.gmra.mrb[54].mxu0 %vm4193_vm2, %v8308_v42  ;;  %v8183_v59 = vmax.f32 %v16245_v55, 0.0  ;;  %v15430_v61 = vpop.f32.mrb[60].mxu1  ;;  %v8720_v42 = vld [vmem:[#allocation3 + $0x11] sm:$0xff]  ;;  %v19139_v55 = vpack.c.bf16 %v13089_v41, %v13088_v40 }
 0x534   : > { %8266 = vst.msk [vmem:[#allocation3 + $0xcb] sm:$0xff] %vm4193_vm2, %v8184_v57  ;;  %v16246_v63 = vadd.f32 %v15430_v61, %v19007_v17  ;;  %v8066_v2 = vpop.f32.mrb[61].mxu1  ;;  %v8309_v43 = vld [vmem:[#allocation3 + $0xa0] sm:$0xff]  ;;  %v8310_v4 = vld [vmem:[#allocation3 + $0xa8] sm:$0xff] }
 0x535   : > { %8264 = vst.msk [vmem:[#allocation3 + $0xc3] sm:$0x3] %vm4241_vm5, %v8183_v59  ;;  %v16247_v44 = vadd.f32 %v19007_v17, %v8066_v2  ;;  %15484 = vmatprep.mubr.msk.f32.mxu0 %vm4193_vm2, %v8309_v43  ;;  %v8721_v57 = vld [vmem:[#allocation3 + $0x19] sm:$0xff]  ;;  %v8723_v61 = vld [vmem:[#allocation3 + $0x29] sm:$0xff]  ;;  %v8726_v2 = vld [vmem:[#allocation3 + $0x41] sm:$0xff] }
 0x536   : > { %8265 = vst.msk [vmem:[#allocation3 + $0xc3] sm:$0xf0] %vm4243_vm6, %v8183_v59  ;;  %v8186_v47 = vmax.f32 %v16246_v63, 0.0  ;;  %v8722_v59 = vld [vmem:[#allocation3 + $0x21] sm:$0xff]  ;;  %v8724_v63 = vld [vmem:[#allocation3 + $0x31] sm:$0xff]  ;;  %v8727_v43 = vld [vmem:[#allocation3 + $0x49] sm:$0xff] }
 0x537   : > { %15485 = vmatmul.mubr.msk.f32.gmra.mrb[56].mxu0 %vm4193_vm2, %v8310_v4  ;;  %v8185_v6 = vmax.f32 %v16247_v44, 0.0  ;;  %v15433_v48 = vpop.f32.mrb[62].mxu1  ;;  %v8728_v4 = vld [vmem:[#allocation3 + $0x51] sm:$0xff]  ;;  %v8729_v44 = vld [vmem:[#allocation3 + $0x59] sm:$0xff] }
 0x538   : > { %8269 = vst.msk [vmem:[#allocation3 + $0xdb] sm:$0xff] %vm4193_vm2, %v8186_v47  ;;  %v16248_v50 = vadd.f32 %v15433_v48, %v19007_v17  ;;  %v8076_v49 = vpop.f32.mrb[63].mxu1  ;;  %v8311_v52 = vld [vmem:[#allocation3 + $0xb0] sm:$0xff]  ;;  %v8312_v54 = vld [vmem:[#allocation3 + $0xb8] sm:$0xff]  ;;  %v8730_v47 = vld [vmem:[#allocation3 + $0x61] sm:$0xff] }
 0x539   : > { %8267 = vst.msk [vmem:[#allocation3 + $0xd3] sm:$0xf] %vm4234_vm3, %v8185_v6  ;;  %v16249_v56 = vadd.f32 %v19007_v17, %v8076_v49  ;;  %15487 = vmatprep.mubr.msk.f32.mxu0 %vm4193_vm2, %v8311_v52  ;;  %v8732_v48 = vld [vmem:[#allocation3 + $0x71] sm:$0xff]  ;;  %v8734_v49 = vld [vmem:[#allocation3 + $0x81] sm:$0xff]  ;;  %v8735_v52 = vld [vmem:[#allocation3 + $0x89] sm:$0xff] }
 0x53a   : > { %8268 = vst.msk [vmem:[#allocation3 + $0xd3] sm:$0xc0] %vm4247_vm7, %v8185_v6  ;;  %v8188_v45 = vmax.f32 %v16248_v50, 0.0  ;;  %v8731_v6 = vld [vmem:[#allocation3 + $0x69] sm:$0xff]  ;;  %v8733_v50 = vld [vmem:[#allocation3 + $0x79] sm:$0xff] }
 0x53b   : > { %15488 = vmatmul.mubr.msk.f32.gmra.mrb[58].mxu0 %vm4193_vm2, %v8312_v54  ;;  %v8187_v58 = vmax.f32 %v16249_v56, 0.0  ;;  %v15436_v46 = vpop.f32.mrb[64].mxu1  ;;  %v8736_v54 = vld [vmem:[#allocation3 + $0x91] sm:$0xff]  ;;  %v8737_v56 = vld [vmem:[#allocation3 + $0x99] sm:$0xff] }
 0x53c   : > { %8271 = vst.msk [vmem:[#allocation3 + $0xeb] sm:$0xff] %vm4193_vm2, %v8188_v45  ;;  %v16250_v60 = vadd.f32 %v15436_v46, %v19007_v17  ;;  %v8086_v62 = vpop.f32.mrb[65].mxu1  ;;  %v8738_v45 = vld [vmem:[#allocation3 + $0xa1] sm:$0xff]  ;;  %v8740_v46 = vld [vmem:[#allocation3 + $0xb1] sm:$0xff] }
 0x53d   : > { %v8313_v0 = vld [vmem:[#allocation3 + $0xc0] sm:$0xff]  ;;  %v8314_v3 = vld [vmem:[#allocation3 + $0xc8] sm:$0xff]  ;;  %8270 = vst.msk [vmem:[#allocation3 + $0xe3] sm:$0x3f] %vm4250_vm8, %v8187_v58  ;;  %v16251_v5 = vadd.f32 %v19007_v17, %v8086_v62  ;;  %v9170_v41 = vld [vmem:[#allocation3 + $0xb2] sm:$0xff] }
 0x53e   : > { %15490 = vmatprep.mubr.msk.f32.mxu0 %vm4193_vm2, %v8313_v0  ;;  %v8190_v7 = vmax.f32 %v16250_v60, 0.0  ;;  %v8739_v58 = vld [vmem:[#allocation3 + $0xa9] sm:$0xff]  ;;  %v8741_v60 = vld [vmem:[#allocation3 + $0xb9] sm:$0xff]  ;;  %v8742_v62 = vld [vmem:[#allocation3 + $0xc1] sm:$0xff] }
 0x53f   : > { %15491 = vmatmul.mubr.msk.f32.gmra.mrb[60].mxu0 %vm4193_vm2, %v8314_v3  ;;  %v8189_v1 = vmax.f32 %v16251_v5, 0.0  ;;  %v15439_v51 = vpop.f32.mrb[66].mxu1  ;;  %v8743_v0 = vld [vmem:[#allocation3 + $0xc9] sm:$0xff] }
 0x540   : > { %8273 = vst.msk [vmem:[#allocation3 + $0xfb] sm:$0xfc] %vm4238_vm4, %v8190_v7  ;;  %v16252_v8 = vadd.f32 %v15439_v51, %v19007_v17  ;;  %v8096_v30 = vpop.f32.mrb[67].mxu1  ;;  %v8315_v53 = vld [vmem:[#allocation3 + $0xd0] sm:$0xff] }
 0x541   : > { %v8316_v9 = vld [vmem:[#allocation3 + $0xd8] sm:$0xff]  ;;  %8272 = vst.msk [vmem:[#allocation3 + $0xf3] sm:$0xff] %vm4193_vm2, %v8189_v1  ;;  %v16253_v10 = vadd.f32 %v19007_v17, %v8096_v30  ;;  %15493 = vmatprep.mubr.msk.f32.mxu0 %vm4193_vm2, %v8315_v53  ;;  %v9169_v40 = vld [vmem:[#allocation3 + $0xaa] sm:$0xff] }
 0x542   : > { %v8192_v12 = vmax.f32 %v16252_v8, 0.0  ;;  %v8744_v3 = vld [vmem:[#allocation3 + $0xd1] sm:$0xff]  ;;  %v8745_v5 = vld [vmem:[#allocation3 + $0xd9] sm:$0xff] }
 0x543   : > { %15494 = vmatmul.mubr.msk.f32.gmra.mrb[62].mxu0 %vm4193_vm2, %v8316_v9  ;;  %v8191_v13 = vmax.f32 %v16253_v10, 0.0  ;;  %v15442_v14 = vpop.f32.mrb[68].mxu1  ;;  %v8747_v1 = vld [vmem:[#allocation3 + $0xe9] sm:$0xff] }
 0x544   : > { %8275 = vst.msk [vmem:[#allocation3 + $0x10b] sm:$0x3] %vm4241_vm5, %v8192_v12  ;;  %v16254_v15 = vadd.f32 %v15442_v14, %v19007_v17  ;;  %v8106_v18 = vpop.f32.mrb[69].mxu1  ;;  %v8317_v19 = vld [vmem:[#allocation3 + $0xe0] sm:$0xff]  ;;  %v8318_v20 = vld [vmem:[#allocation3 + $0xe8] sm:$0xff]  ;;  %v13091_v14 = vld [vmem:[%s19777_s5 + $0x78] sm:$0xff] }
 0x545   : > { %8276 = vst.msk [vmem:[#allocation3 + $0x10b] sm:$0xf0] %vm4243_vm6, %v8192_v12  ;;  %v16255_v21 = vadd.f32 %v19007_v17, %v8106_v18  ;;  %15496 = vmatprep.mubr.msk.f32.mxu0 %vm4193_vm2, %v8317_v19  ;;  %v8746_v7 = vld [vmem:[#allocation3 + $0xe1] sm:$0xff]  ;;  %v13128_v19 = vld [vmem:[%s19777_s5 + $0x80] sm:$0xff] }
 0x546   : > { %8274 = vst.msk [vmem:[#allocation3 + $0x103] sm:$0xff] %vm4193_vm2, %v8191_v13  ;;  %v8194_v22 = vmax.f32 %v16254_v15, 0.0  ;;  %v9148_v10 = vld [vmem:[#allocation3 + $0x2] sm:$0xff]  ;;  %v9149_v15 = vld [vmem:[#allocation3 + $0xa] sm:$0xff] }
 0x547   : > { %15497 = vmatmul.mubr.msk.f32.gmra.mrb[64].mxu0 %vm4193_vm2, %v8318_v20  ;;  %v8193_v23 = vmax.f32 %v16255_v21, 0.0  ;;  %v15445_v24 = vpop.f32.mrb[70].mxu1  ;;  %v13090_v13 = vld [vmem:[%s19777_s5 + $0x70] sm:$0xff]  ;;  %v13129_v20 = vld [vmem:[%s19777_s5 + $0x88] sm:$0xff]  ;;  %v19189_v21 = vld [vmem:[#allocation3 + $0x12] sm:$0xff] }
 0x548   : > { %8278 = vst.msk [vmem:[#allocation3 + $0x11b] sm:$0xf] %vm4234_vm3, %v8194_v22  ;;  %v16256_v25 = vadd.f32 %v15445_v24, %v19007_v17  ;;  %v8116_v26 = vpop.f32.mrb[71].mxu1  ;;  %v8319_v27 = vld [vmem:[#allocation3 + $0xf0] sm:$0xff]  ;;  %v8320_v11 = vld [vmem:[#allocation3 + $0xf8] sm:$0xff]  ;;  %v16104_v18 = vpack.c.bf16 %v13091_v14, %v13090_v13  ;;  %v19200_v24 = vld [vmem:[#allocation3 + $0x22] sm:$0xff] }
 0x549   : > { %8279 = vst.msk [vmem:[#allocation3 + $0x11b] sm:$0xc0] %vm4247_vm7, %v8194_v22  ;;  %v16257_v28 = vadd.f32 %v19007_v17, %v8116_v26  ;;  %15499 = vmatprep.mubr.msk.f32.mxu0 %vm4193_vm2, %v8319_v27  ;;  %v13050_v17 = vld [vmem:[%s19777_s5 + $0x50] sm:$0xff]  ;;  %v8748_v51 = vld [vmem:[#allocation3 + $0xf1] sm:$0xff]  ;;  %v8749_v8 = vld [vmem:[#allocation3 + $0xf9] sm:$0xff]  ;;  %v19194_v22 = vpack.c.bf16 %v13129_v20, %v13128_v19 }
 0x54a   : > { %8277 = vst.msk [vmem:[#allocation3 + $0x113] sm:$0xff] %vm4193_vm2, %v8193_v23  ;;  %v8196_v29 = vmax.f32 %v16256_v25, 0.0  ;;  %v16096_v39 = vpack.c.bf16 %v13051_v37, %v13050_v17  ;;  %v19196_v23 = vld [vmem:[#allocation3 + $0x1a] sm:$0xff]  ;;  %v19205_v25 = vld [vmem:[#allocation3 + $0x2a] sm:$0xff]  ;;  %v19209_v26 = vld [vmem:[#allocation3 + $0x32] sm:$0xff] }
 0x54b   : > { %15500 = vmatmul.mubr.msk.f32.gmra.mrb[66].mxu0 %vm4193_vm2, %v8320_v11  ;;  %v8195_v31 = vmax.f32 %v16257_v28, 0.0  ;;  %v19213_v27 = vld [vmem:[#allocation3 + $0x3a] sm:$0xff]  ;;  %v19217_v11 = vld [vmem:[#allocation3 + $0x42] sm:$0xff]  ;;  %v19221_v28 = vld [vmem:[#allocation3 + $0x4a] sm:$0xff] }
 0x54c   : > { %8281 = vst.msk [vmem:[#allocation3 + $0x12b] sm:$0x3f] %vm4250_vm8, %v8196_v29  ;;  %v19225_v29 = vld [vmem:[#allocation3 + $0x52] sm:$0xff]  ;;  %v19253_v17 = vld [vmem:[#allocation3 + $0x8a] sm:$0xff]  ;;  %v10017_v14 = vld [vmem:[#allocation3 + $0x5b] sm:$0xff] }
 0x54d   : > { %v8321_v32 = vld [vmem:[#allocation3 + $0x100] sm:$0xff]  ;;  %v8322_v33 = vld [vmem:[#allocation3 + $0x108] sm:$0xff]  ;;  %8280 = vst.msk [vmem:[#allocation3 + $0x123] sm:$0xff] %vm4193_vm2, %v8195_v31  ;;  %v9166_v37 = vld [vmem:[#allocation3 + $0x92] sm:$0xff] }
 0x54e   : > { %15502 = vmatprep.mubr.msk.f32.mxu0 %vm4193_vm2, %v8321_v32  ;;  %v8750_v30 = vld [vmem:[#allocation3 + $0x101] sm:$0xff]  ;;  %v8751_v53 = vld [vmem:[#allocation3 + $0x109] sm:$0xff]  ;;  %v10016_v13 = vld [vmem:[#allocation3 + $0x53] sm:$0xff] }
 0x54f   : > { %15503 = vmatmul.mubr.msk.f32.gmra.mrb[68].mxu0 %vm4193_vm2, %v8322_v33  ;;  %v19229_v31 = vld [vmem:[#allocation3 + $0x5a] sm:$0xff]  ;;  %v19233_v32 = vld [vmem:[#allocation3 + $0x62] sm:$0xff]  ;;  %v19237_v33 = vld [vmem:[#allocation3 + $0x6a] sm:$0xff] }
 0x550   : > { %v10020_v19 = vld [vmem:[#allocation3 + $0x73] sm:$0xff]  ;;  %v10021_v20 = vld [vmem:[#allocation3 + $0x7b] sm:$0xff] }
 0x551   : > { %v8323_v34 = vld [vmem:[#allocation3 + $0x110] sm:$0xff]  ;;  %v8324_v35 = vld [vmem:[#allocation3 + $0x118] sm:$0x3f] }
 0x552   : > { %15505 = vmatprep.mubr.msk.f32.mxu0 %vm4193_vm2, %v8323_v34  ;;  %v8752_v9 = vld [vmem:[#allocation3 + $0x111] sm:$0xff]  ;;  %v8753_v12 = vld [vmem:[#allocation3 + $0x119] sm:$0x3f] }
 0x553   : > { %15506 = vmatmul.mubr.msk.f32.gmra.mrb[70].mxu0 %vm4193_vm2, %v8324_v35  ;;  %v19241_v34 = vld [vmem:[#allocation3 + $0x72] sm:$0xff]  ;;  %v19245_v35 = vld [vmem:[#allocation3 + $0x7a] sm:$0xff] }
 0x554   : > { %15516 = vmatprep.mubr.msk.f32.mxu0 %vm4193_vm2, %v8718_v36  ;;  %v19249_v36 = vld [vmem:[#allocation3 + $0x82] sm:$0xff] }
 0x557   : > { %15517 = vmatmul.mubr.msk.f32.vlgmr.msra.gmra.mrb[36].mxu0 %vm4193_vm2, %v8719_v38  ;;  %v9167_v38 = vld [vmem:[#allocation3 + $0x9a] sm:$0xff] }
 0x558   : > { %16095 = vmatpush3.bf16.msra.mxu0 %v19001_v16  ;;  %15519 = vmatprep.mubr.msk.f32.mxu0 %vm4193_vm2, %v8720_v42  ;;  %v8725_v16 = vld [vmem:[#allocation3 + $0x39] sm:$0xff] }
 0x559   : > { %16097 = vmatprep.subr.bf16.mxu0 %v16096_v39  ;;  %v9171_v42 = vld [vmem:[#allocation3 + $0xba] sm:$0xff] }
 0x55b   : > { %15520 = vmatmul.mubr.msk.f32.gmra.mrb[38].mxu0 %vm4193_vm2, %v8721_v57  ;;  %v9173_v57 = vld [vmem:[#allocation3 + $0xca] sm:$0xff] }
 0x55c   : > { %15522 = vmatprep.mubr.msk.f32.mxu0 %vm4193_vm2, %v8722_v59  ;;  %16099 = vmatpush3.bf16.msra.mxu0 %v16096_v39  ;;  %v9168_v39 = vld [vmem:[#allocation3 + $0xa2] sm:$0xff]  ;;  %v9174_v59 = vld [vmem:[#allocation3 + $0xd2] sm:$0xff] }
 0x55d   : > { %16101 = vmatprep.subr.bf16.mxu0 %v19139_v55 }
 0x55f   : > { %15523 = vmatmul.mubr.msk.f32.gmra.mrb[40].mxu0 %vm4193_vm2, %v8723_v61  ;;  %v9175_v61 = vld [vmem:[#allocation3 + $0xda] sm:$0xff] }
 0x560   : > { %15525 = vmatprep.mubr.msk.f32.mxu0 %vm4193_vm2, %v8724_v63  ;;  %v9176_v63 = vld [vmem:[#allocation3 + $0xe2] sm:$0xff] }
 0x563   : > { %15526 = vmatmul.mubr.msk.f32.gmra.mrb[42].mxu0 %vm4193_vm2, %v8725_v16  ;;  %v9177_v16 = vld [vmem:[#allocation3 + $0xea] sm:$0xff] }
 0x564   : > { %15528 = vmatprep.mubr.msk.f32.mxu0 %vm4193_vm2, %v8726_v2  ;;  %v9178_v2 = vld [vmem:[#allocation3 + $0xf2] sm:$0xff] }
 0x567   : > { %15529 = vmatmul.mubr.msk.f32.gmra.mrb[44].mxu0 %vm4193_vm2, %v8727_v43  ;;  %v9179_v43 = vld [vmem:[#allocation3 + $0xfa] sm:$0xff] }
 0x568   : > { %15531 = vmatprep.mubr.msk.f32.mxu0 %vm4193_vm2, %v8728_v4  ;;  %v9180_v4 = vld [vmem:[#allocation3 + $0x102] sm:$0xff] }
 0x56b   : > { %15532 = vmatmul.mubr.msk.f32.gmra.mrb[46].mxu0 %vm4193_vm2, %v8729_v44  ;;  %v9181_v44 = vld [vmem:[#allocation3 + $0x10a] sm:$0xff] }
 0x56c   : > { %15534 = vmatprep.mubr.msk.f32.mxu0 %vm4193_vm2, %v8730_v47  ;;  %v9182_v47 = vld [vmem:[#allocation3 + $0x112] sm:$0xff] }
 0x56f   : > { %15535 = vmatmul.mubr.msk.f32.gmra.mrb[48].mxu0 %vm4193_vm2, %v8731_v6  ;;  %v9183_v6 = vld [vmem:[#allocation3 + $0x11a] sm:$0x3f] }
 0x570   : > { %15537 = vmatprep.mubr.msk.f32.mxu0 %vm4193_vm2, %v8732_v48  ;;  %v13130_v48 = vld [vmem:[%s19777_s5 + $0x90] sm:$0xff] }
 0x573   : > { %15538 = vmatmul.mubr.msk.f32.gmra.mrb[50].mxu0 %vm4193_vm2, %v8733_v50  ;;  %v13131_v50 = vld [vmem:[%s19777_s5 + $0x98] sm:$0xff] }
 0x574   : > { %15540 = vmatprep.mubr.msk.f32.mxu0 %vm4193_vm2, %v8734_v49  ;;  %v16112_v49 = vpack.c.bf16 %v13131_v50, %v13130_v48  ;;  %v19429_v48 = vld [vmem:[#allocation3 + $0x4c] sm:$0xff]  ;;  %v19433_v50 = vld [vmem:[#allocation3 + $0x54] sm:$0xff] }
 0x577   : > { %15541 = vmatmul.mubr.msk.f32.gmra.mrb[52].mxu0 %vm4193_vm2, %v8735_v52  ;;  %v13168_v52 = vld [vmem:[%s19777_s5 + $0xa0] sm:$0xff] }
 0x578   : > { %15543 = vmatprep.mubr.msk.f32.mxu0 %vm4193_vm2, %v8736_v54  ;;  %v13169_v54 = vld [vmem:[%s19777_s5 + $0xa8] sm:$0xff] }
 0x57b   : > { %15544 = vmatmul.mubr.msk.f32.gmra.mrb[54].mxu0 %vm4193_vm2, %v8737_v56  ;;  %v16116_v56 = vpack.c.bf16 %v13169_v54, %v13168_v52  ;;  %v19441_v52 = vld [vmem:[#allocation3 + $0x64] sm:$0xff]  ;;  %v19445_v54 = vld [vmem:[#allocation3 + $0x6c] sm:$0xff] }
 0x57c   : > { %15546 = vmatprep.mubr.msk.f32.mxu0 %vm4193_vm2, %v8738_v45  ;;  %v9611_v45 = vld [vmem:[#allocation3 + $0x11a] sm:$0xff] }
 0x57f   : > { %15547 = vmatmul.mubr.msk.f32.gmra.mrb[56].mxu0 %vm4193_vm2, %v8739_v58  ;;  %v9612_v58 = vld [vmem:[#allocation3 + $0x122] sm:$0xff] }
 0x580   : > { %15549 = vmatprep.mubr.msk.f32.mxu0 %vm4193_vm2, %v8740_v46  ;;  %v9613_v46 = vld [vmem:[#allocation3 + $0x12a] sm:$0x3f] }
 0x583   : > { %15550 = vmatmul.mubr.msk.f32.gmra.mrb[58].mxu0 %vm4193_vm2, %v8741_v60  ;;  %v13170_v60 = vld [vmem:[%s19777_s5 + $0xb0] sm:$0xff] }
 0x584   : > { %15552 = vmatprep.mubr.msk.f32.mxu0 %vm4193_vm2, %v8742_v62  ;;  %v13171_v62 = vld [vmem:[%s19777_s5 + $0xb8] sm:$0xff] }
 0x587   : > { %15553 = vmatmul.mubr.msk.f32.gmra.mrb[60].mxu0 %vm4193_vm2, %v8743_v0  ;;  %v10008_v0 = vld [vmem:[#allocation3 + $0x13] sm:$0xff] }
 0x588   : > { %15555 = vmatprep.mubr.msk.f32.mxu0 %vm4193_vm2, %v8744_v3  ;;  %v16120_v3 = vpack.c.bf16 %v13171_v62, %v13170_v60  ;;  %v19465_v60 = vld [vmem:[#allocation3 + $0x94] sm:$0xff]  ;;  %v19469_v62 = vld [vmem:[#allocation3 + $0x9c] sm:$0xff] }
 0x58b   : > { %15556 = vmatmul.mubr.msk.f32.gmra.mrb[62].mxu0 %vm4193_vm2, %v8745_v5  ;;  %v10009_v5 = vld [vmem:[#allocation3 + $0x1b] sm:$0xff] }
 0x58c   : > { %15558 = vmatprep.mubr.msk.f32.mxu0 %vm4193_vm2, %v8746_v7  ;;  %v13208_v7 = vld [vmem:[%s19777_s5 + $0xc0] sm:$0xff] }
 0x58f   : > { %15559 = vmatmul.mubr.msk.f32.gmra.mrb[64].mxu0 %vm4193_vm2, %v8747_v1  ;;  %v13209_v1 = vld [vmem:[%s19777_s5 + $0xc8] sm:$0xff] }
 0x590   : > { %15561 = vmatprep.mubr.msk.f32.mxu0 %vm4193_vm2, %v8748_v51  ;;  %v10010_v51 = vld [vmem:[#allocation3 + $0x23] sm:$0xff] }
 0x593   : > { %15562 = vmatmul.mubr.msk.f32.gmra.mrb[66].mxu0 %vm4193_vm2, %v8749_v8  ;;  %v19355_v8 = vpack.c.bf16 %v13209_v1, %v13208_v7  ;;  %v10459_v7 = vld [vmem:[#allocation3 + $0xbc] sm:$0xff]  ;;  %v10460_v1 = vld [vmem:[#allocation3 + $0xc4] sm:$0xff] }
 0x594   : > { %15564 = vmatprep.mubr.msk.f32.mxu0 %vm4193_vm2, %v8750_v30  ;;  %v10011_v30 = vld [vmem:[#allocation3 + $0x2b] sm:$0xff] }
 0x597   : > { %15565 = vmatmul.mubr.msk.f32.gmra.mrb[68].mxu0 %vm4193_vm2, %v8751_v53  ;;  %v10012_v53 = vld [vmem:[#allocation3 + $0x33] sm:$0xff] }
 0x598   : > { %15567 = vmatprep.mubr.msk.f32.mxu0 %vm4193_vm2, %v8752_v9  ;;  %v10013_v9 = vld [vmem:[#allocation3 + $0x3b] sm:$0xff] }
 0x59b   : > { %15568 = vmatmul.mubr.msk.f32.gmra.mrb[70].mxu0 %vm4193_vm2, %v8753_v12  ;;  %v10015_v12 = vld [vmem:[#allocation3 + $0x4b] sm:$0xff] }
 0x59c   : > { %15578 = vmatprep.mubr.msk.f32.mxu0 %vm4193_vm2, %v9148_v10  ;;  %v10014_v10 = vld [vmem:[#allocation3 + $0x43] sm:$0xff] }
 0x59f   : > { %15579 = vmatmul.mubr.msk.f32.vlgmr.msra.gmra.mrb[36].mxu0 %vm4193_vm2, %v9149_v15  ;;  %v10018_v15 = vld [vmem:[#allocation3 + $0x63] sm:$0xff] }
 0x5a0   : > { %16103 = vmatpush3.bf16.msra.mxu0 %v19139_v55  ;;  %15581 = vmatprep.mubr.msk.f32.mxu0 %vm4193_vm2, %v19189_v21  ;;  %v9172_v55 = vld [vmem:[#allocation3 + $0xc2] sm:$0xff] }
 0x5a1   : > { %16105 = vmatprep.subr.bf16.mxu0 %v16104_v18 }
 0x5a3   : > { %15582 = vmatmul.mubr.msk.f32.gmra.mrb[38].mxu0 %vm4193_vm2, %v19196_v23 }
 0x5a4   : > { %15584 = vmatprep.mubr.msk.f32.mxu0 %vm4193_vm2, %v19200_v24  ;;  %16107 = vmatpush3.bf16.msra.mxu0 %v16104_v18  ;;  %v10019_v18 = vld [vmem:[#allocation3 + $0x6b] sm:$0xff] }
 0x5a5   : > { %16109 = vmatprep.subr.bf16.mxu0 %v19194_v22 }
 0x5a7   : > { %15585 = vmatmul.mubr.msk.f32.gmra.mrb[40].mxu0 %vm4193_vm2, %v19205_v25 }
 0x5a8   : > { %15587 = vmatprep.mubr.msk.f32.mxu0 %vm4193_vm2, %v19209_v26 }
 0x5ab   : > { %15588 = vmatmul.mubr.msk.f32.gmra.mrb[42].mxu0 %vm4193_vm2, %v19213_v27 }
 0x5ac   : > { %15590 = vmatprep.mubr.msk.f32.mxu0 %vm4193_vm2, %v19217_v11 }
 0x5af   : > { %15591 = vmatmul.mubr.msk.f32.gmra.mrb[44].mxu0 %vm4193_vm2, %v19221_v28 }
 0x5b0   : > { %15593 = vmatprep.mubr.msk.f32.mxu0 %vm4193_vm2, %v19225_v29 }
 0x5b3   : > { %15594 = vmatmul.mubr.msk.f32.gmra.mrb[46].mxu0 %vm4193_vm2, %v19229_v31 }
 0x5b4   : > { %15596 = vmatprep.mubr.msk.f32.mxu0 %vm4193_vm2, %v19233_v32 }
 0x5b7   : > { %15597 = vmatmul.mubr.msk.f32.gmra.mrb[48].mxu0 %vm4193_vm2, %v19237_v33 }
 0x5b8   : > { %15599 = vmatprep.mubr.msk.f32.mxu0 %vm4193_vm2, %v19241_v34 }
 0x5bb   : > { %15600 = vmatmul.mubr.msk.f32.gmra.mrb[50].mxu0 %vm4193_vm2, %v19245_v35 }
 0x5bc   : > { %15602 = vmatprep.mubr.msk.f32.mxu0 %vm4193_vm2, %v19249_v36 }
 0x5bf   : > { %15603 = vmatmul.mubr.msk.f32.gmra.mrb[52].mxu0 %vm4193_vm2, %v19253_v17 }
 0x5c0   : > { %15605 = vmatprep.mubr.msk.f32.mxu0 %vm4193_vm2, %v9166_v37 }
 0x5c3   : > { %15606 = vmatmul.mubr.msk.f32.gmra.mrb[54].mxu0 %vm4193_vm2, %v9167_v38 }
 0x5c4   : > { %15608 = vmatprep.mubr.msk.f32.mxu0 %vm4193_vm2, %v9168_v39 }
 0x5c7   : > { %15609 = vmatmul.mubr.msk.f32.gmra.mrb[56].mxu0 %vm4193_vm2, %v9169_v40 }
 0x5c8   : > { %15611 = vmatprep.mubr.msk.f32.mxu0 %vm4193_vm2, %v9170_v41 }
 0x5cb   : > { %15612 = vmatmul.mubr.msk.f32.gmra.mrb[58].mxu0 %vm4193_vm2, %v9171_v42 }
 0x5cc   : > { %15614 = vmatprep.mubr.msk.f32.mxu0 %vm4193_vm2, %v9172_v55 }
 0x5cf   : > { %15615 = vmatmul.mubr.msk.f32.gmra.mrb[60].mxu0 %vm4193_vm2, %v9173_v57 }
 0x5d0   : > { %15617 = vmatprep.mubr.msk.f32.mxu0 %vm4193_vm2, %v9174_v59 }
 0x5d3   : > { %15618 = vmatmul.mubr.msk.f32.gmra.mrb[62].mxu0 %vm4193_vm2, %v9175_v61 }
 0x5d4   : > { %15620 = vmatprep.mubr.msk.f32.mxu0 %vm4193_vm2, %v9176_v63 }
 0x5d7   : > { %15621 = vmatmul.mubr.msk.f32.gmra.mrb[64].mxu0 %vm4193_vm2, %v9177_v16 }
 0x5d8   : > { %15623 = vmatprep.mubr.msk.f32.mxu0 %vm4193_vm2, %v9178_v2 }
 0x5db   : > { %15624 = vmatmul.mubr.msk.f32.gmra.mrb[66].mxu0 %vm4193_vm2, %v9179_v43 }
 0x5dc   : > { %15626 = vmatprep.mubr.msk.f32.mxu0 %vm4193_vm2, %v9180_v4 }
 0x5df   : > { %15627 = vmatmul.mubr.msk.f32.gmra.mrb[68].mxu0 %vm4193_vm2, %v9181_v44 }
 0x5e0   : > { %15629 = vmatprep.mubr.msk.f32.mxu0 %vm4193_vm2, %v9182_v47 }
 0x5e3   : > { %15630 = vmatmul.mubr.msk.f32.gmra.mrb[70].mxu0 %vm4193_vm2, %v9183_v6  ;;  %v19425_v6 = vld [vmem:[#allocation3 + $0x44] sm:$0xff] }
 0x5e4   : > { %15640 = vmatprep.mubr.msk.f32.mxu0 %vm4193_vm2, %v19189_v21  ;;  %v10022_v21 = vld [vmem:[#allocation3 + $0x83] sm:$0xff] }
 0x5e7   : > { %15641 = vmatmul.mubr.msk.f32.vlgmr.msra.gmra.mrb[36].mxu0 %vm4193_vm2, %v19196_v23  ;;  %v10024_v23 = vld [vmem:[#allocation3 + $0x93] sm:$0xff] }
 0x5e8   : > { %16111 = vmatpush3.bf16.msra.mxu0 %v19194_v22  ;;  %15643 = vmatprep.mubr.msk.f32.mxu0 %vm4193_vm2, %v19200_v24  ;;  %v10023_v22 = vld [vmem:[#allocation3 + $0x8b] sm:$0xff]  ;;  %v10025_v24 = vld [vmem:[#allocation3 + $0x9b] sm:$0xff] }
 0x5e9   : > { %16113 = vmatprep.subr.bf16.mxu0 %v16112_v49 }
 0x5eb   : > { %15644 = vmatmul.mubr.msk.f32.gmra.mrb[38].mxu0 %vm4193_vm2, %v19205_v25  ;;  %v10026_v25 = vld [vmem:[#allocation3 + $0xa3] sm:$0xff] }
 0x5ec   : > { %15646 = vmatprep.mubr.msk.f32.mxu0 %vm4193_vm2, %v19209_v26  ;;  %16115 = vmatpush3.bf16.msra.mxu0 %v16112_v49  ;;  %v10027_v26 = vld [vmem:[#allocation3 + $0xab] sm:$0xff]  ;;  %v19437_v49 = vld [vmem:[#allocation3 + $0x5c] sm:$0xff] }
 0x5ed   : > { %16117 = vmatprep.subr.bf16.mxu0 %v16116_v56 }
 0x5ef   : > { %15647 = vmatmul.mubr.msk.f32.gmra.mrb[40].mxu0 %vm4193_vm2, %v19213_v27  ;;  %v10028_v27 = vld [vmem:[#allocation3 + $0xb3] sm:$0xff] }
 0x5f0   : > { %15649 = vmatprep.mubr.msk.f32.mxu0 %vm4193_vm2, %v19217_v11  ;;  %v10029_v11 = vld [vmem:[#allocation3 + $0xbb] sm:$0xff] }
 0x5f3   : > { %15650 = vmatmul.mubr.msk.f32.gmra.mrb[42].mxu0 %vm4193_vm2, %v19221_v28  ;;  %v10030_v28 = vld [vmem:[#allocation3 + $0xc3] sm:$0xff] }
 0x5f4   : > { %15652 = vmatprep.mubr.msk.f32.mxu0 %vm4193_vm2, %v19225_v29  ;;  %v10031_v29 = vld [vmem:[#allocation3 + $0xcb] sm:$0xff] }
 0x5f7   : > { %15653 = vmatmul.mubr.msk.f32.gmra.mrb[44].mxu0 %vm4193_vm2, %v19229_v31  ;;  %v10032_v31 = vld [vmem:[#allocation3 + $0xd3] sm:$0xff] }
 0x5f8   : > { %15655 = vmatprep.mubr.msk.f32.mxu0 %vm4193_vm2, %v19233_v32  ;;  %v10033_v32 = vld [vmem:[#allocation3 + $0xdb] sm:$0xff] }
 0x5fb   : > { %15656 = vmatmul.mubr.msk.f32.gmra.mrb[46].mxu0 %vm4193_vm2, %v19237_v33  ;;  %v10034_v33 = vld [vmem:[#allocation3 + $0xe3] sm:$0xff] }
 0x5fc   : > { %15658 = vmatprep.mubr.msk.f32.mxu0 %vm4193_vm2, %v19241_v34  ;;  %v10035_v34 = vld [vmem:[#allocation3 + $0xeb] sm:$0xff] }
 0x5ff   : > { %15659 = vmatmul.mubr.msk.f32.gmra.mrb[48].mxu0 %vm4193_vm2, %v19245_v35  ;;  %v10036_v35 = vld [vmem:[#allocation3 + $0xf3] sm:$0xff] }
 0x600   : > { %15661 = vmatprep.mubr.msk.f32.mxu0 %vm4193_vm2, %v19249_v36  ;;  %v10037_v36 = vld [vmem:[#allocation3 + $0xfb] sm:$0xff] }
 0x603   : > { %15662 = vmatmul.mubr.msk.f32.gmra.mrb[50].mxu0 %vm4193_vm2, %v19253_v17  ;;  %v10038_v17 = vld [vmem:[#allocation3 + $0x103] sm:$0xff] }
 0x604   : > { %15664 = vmatprep.mubr.msk.f32.mxu0 %vm4193_vm2, %v9166_v37  ;;  %v10039_v37 = vld [vmem:[#allocation3 + $0x10b] sm:$0xff] }
 0x607   : > { %15665 = vmatmul.mubr.msk.f32.gmra.mrb[52].mxu0 %vm4193_vm2, %v9167_v38  ;;  %v10040_v38 = vld [vmem:[#allocation3 + $0x113] sm:$0xff] }
 0x608   : > { %15667 = vmatprep.mubr.msk.f32.mxu0 %vm4193_vm2, %v9168_v39  ;;  %v10041_v39 = vld [vmem:[#allocation3 + $0x11b] sm:$0xff] }
 0x60b   : > { %15668 = vmatmul.mubr.msk.f32.gmra.mrb[54].mxu0 %vm4193_vm2, %v9169_v40  ;;  %v10042_v40 = vld [vmem:[#allocation3 + $0x123] sm:$0xff] }
 0x60c   : > { %15670 = vmatprep.mubr.msk.f32.mxu0 %vm4193_vm2, %v9170_v41  ;;  %v10043_v41 = vld [vmem:[#allocation3 + $0x12b] sm:$0x3f] }
 0x60f   : > { %15671 = vmatmul.mubr.msk.f32.gmra.mrb[56].mxu0 %vm4193_vm2, %v9171_v42  ;;  %v13210_v42 = vld [vmem:[%s19777_s5 + $0xd0] sm:$0xff] }
 0x610   : > { %15673 = vmatprep.mubr.msk.f32.mxu0 %vm4193_vm2, %v9172_v55  ;;  %v13211_v55 = vld [vmem:[%s19777_s5 + $0xd8] sm:$0xff] }
 0x613   : > { %15674 = vmatmul.mubr.msk.f32.gmra.mrb[58].mxu0 %vm4193_vm2, %v9173_v57  ;;  %v10438_v57 = vld [vmem:[#allocation3 + $0x14] sm:$0xff] }
 0x614   : > { %15676 = vmatprep.mubr.msk.f32.mxu0 %vm4193_vm2, %v9174_v59  ;;  %v16128_v59 = vpack.c.bf16 %v13211_v55, %v13210_v42  ;;  %v11308_v42 = vld [vmem:[#allocation3 + $0x75] sm:$0xff]  ;;  %v11309_v55 = vld [vmem:[#allocation3 + $0x7d] sm:$0xff] }
 0x617   : > { %15677 = vmatmul.mubr.msk.f32.gmra.mrb[60].mxu0 %vm4193_vm2, %v9175_v61  ;;  %v10439_v61 = vld [vmem:[#allocation3 + $0x1c] sm:$0xff] }
 0x618   : > { %15679 = vmatprep.mubr.msk.f32.mxu0 %vm4193_vm2, %v9176_v63  ;;  %v13248_v63 = vld [vmem:[%s19777_s5 + $0xe0] sm:$0xff] }
 0x61b   : > { %15680 = vmatmul.mubr.msk.f32.gmra.mrb[62].mxu0 %vm4193_vm2, %v9177_v16  ;;  %v13249_v16 = vld [vmem:[%s19777_s5 + $0xe8] sm:$0xff] }
 0x61c   : > { %15682 = vmatprep.mubr.msk.f32.mxu0 %vm4193_vm2, %v9178_v2  ;;  %v19405_v2 = vld [vmem:[#allocation3 + $0x24] sm:$0xff] }
 0x61f   : > { %15683 = vmatmul.mubr.msk.f32.gmra.mrb[64].mxu0 %vm4193_vm2, %v9179_v43  ;;  %v19410_v43 = vpack.c.bf16 %v13249_v16, %v13248_v63  ;;  %v11313_v63 = vld [vmem:[#allocation3 + $0x9d] sm:$0xff]  ;;  %v11314_v16 = vld [vmem:[#allocation3 + $0xa5] sm:$0xff] }
 0x620   : > { %15685 = vmatprep.mubr.msk.f32.mxu0 %vm4193_vm2, %v9180_v4  ;;  %v19412_v4 = vld [vmem:[#allocation3 + $0x2c] sm:$0xff] }
 0x623   : > { %15686 = vmatmul.mubr.msk.f32.gmra.mrb[66].mxu0 %vm4193_vm2, %v9181_v44  ;;  %v19416_v44 = vld [vmem:[#allocation3 + $0x34] sm:$0xff] }
 0x624   : > { %15688 = vmatprep.mubr.msk.f32.mxu0 %vm4193_vm2, %v9182_v47  ;;  %v19421_v47 = vld [vmem:[#allocation3 + $0x3c] sm:$0xff] }
 0x627   : > { %15689 = vmatmul.mubr.msk.f32.gmra.mrb[68].mxu0 %vm4193_vm2, %v9611_v45  ;;  %v19453_v45 = vld [vmem:[#allocation3 + $0x7c] sm:$0xff] }
 0x628   : > { %15691 = vmatprep.mubr.msk.f32.mxu0 %vm4193_vm2, %v9612_v58  ;;  %v19457_v58 = vld [vmem:[#allocation3 + $0x84] sm:$0xff] }
 0x62b   : > { %15692 = vmatmul.mubr.msk.f32.gmra.mrb[70].mxu0 %vm4193_vm2, %v9613_v46  ;;  %v19461_v46 = vld [vmem:[#allocation3 + $0x8c] sm:$0xff] }
 0x62c   : > { %15702 = vmatprep.mubr.msk.f32.mxu0 %vm4193_vm2, %v10008_v0  ;;  %v10456_v0 = vld [vmem:[#allocation3 + $0xa4] sm:$0xff] }
 0x62f   : > { %15703 = vmatmul.mubr.msk.f32.vlgmr.msra.gmra.mrb[36].mxu0 %vm4193_vm2, %v10009_v5  ;;  %v10458_v5 = vld [vmem:[#allocation3 + $0xb4] sm:$0xff] }
 0x630   : > { %16119 = vmatpush3.bf16.msra.mxu0 %v16116_v56  ;;  %15705 = vmatprep.mubr.msk.f32.mxu0 %vm4193_vm2, %v10010_v51  ;;  %v19449_v56 = vld [vmem:[#allocation3 + $0x74] sm:$0xff]  ;;  %v10461_v51 = vld [vmem:[#allocation3 + $0xcc] sm:$0xff] }
 0x631   : > { %16121 = vmatprep.subr.bf16.mxu0 %v16120_v3 }
 0x633   : > { %15706 = vmatmul.mubr.msk.f32.gmra.mrb[38].mxu0 %vm4193_vm2, %v10011_v30  ;;  %v10463_v30 = vld [vmem:[#allocation3 + $0xdc] sm:$0xff] }
 0x634   : > { %15708 = vmatprep.mubr.msk.f32.mxu0 %vm4193_vm2, %v10012_v53  ;;  %16123 = vmatpush3.bf16.msra.mxu0 %v16120_v3  ;;  %v10457_v3 = vld [vmem:[#allocation3 + $0xac] sm:$0xff]  ;;  %v10464_v53 = vld [vmem:[#allocation3 + $0xe4] sm:$0xff] }
 0x635   : > { %16125 = vmatprep.subr.bf16.mxu0 %v19355_v8 }
 0x637   : > { %15709 = vmatmul.mubr.msk.f32.gmra.mrb[40].mxu0 %vm4193_vm2, %v10013_v9  ;;  %v10465_v9 = vld [vmem:[#allocation3 + $0xec] sm:$0xff] }
 0x638   : > { %15711 = vmatprep.mubr.msk.f32.mxu0 %vm4193_vm2, %v10014_v10  ;;  %v10466_v10 = vld [vmem:[#allocation3 + $0xf4] sm:$0xff] }
 0x63b   : > { %15712 = vmatmul.mubr.msk.f32.gmra.mrb[42].mxu0 %vm4193_vm2, %v10015_v12  ;;  %v10467_v12 = vld [vmem:[#allocation3 + $0xfc] sm:$0xff] }
 0x63c   : > { %15714 = vmatprep.mubr.msk.f32.mxu0 %vm4193_vm2, %v10016_v13  ;;  %v10468_v13 = vld [vmem:[#allocation3 + $0x104] sm:$0xff] }
 0x63f   : > { %15715 = vmatmul.mubr.msk.f32.gmra.mrb[44].mxu0 %vm4193_vm2, %v10017_v14  ;;  %v10469_v14 = vld [vmem:[#allocation3 + $0x10c] sm:$0xff] }
 0x640   : > { %15717 = vmatprep.mubr.msk.f32.mxu0 %vm4193_vm2, %v10018_v15  ;;  %v10470_v15 = vld [vmem:[#allocation3 + $0x114] sm:$0xff] }
 0x643   : > { %15718 = vmatmul.mubr.msk.f32.gmra.mrb[46].mxu0 %vm4193_vm2, %v10019_v18  ;;  %v10471_v18 = vld [vmem:[#allocation3 + $0x11c] sm:$0xff] }
 0x644   : > { %15720 = vmatprep.mubr.msk.f32.mxu0 %vm4193_vm2, %v10020_v19  ;;  %v10472_v19 = vld [vmem:[#allocation3 + $0x124] sm:$0xff] }
 0x647   : > { %15721 = vmatmul.mubr.msk.f32.gmra.mrb[48].mxu0 %vm4193_vm2, %v10021_v20  ;;  %v10473_v20 = vld [vmem:[#allocation3 + $0x12c] sm:$0x3f] }
 0x648   : > { %15723 = vmatprep.mubr.msk.f32.mxu0 %vm4193_vm2, %v10022_v21  ;;  %v13250_v21 = vld [vmem:[%s19777_s5 + $0xf0] sm:$0xff] }
 0x64b   : > { %15724 = vmatmul.mubr.msk.f32.gmra.mrb[50].mxu0 %vm4193_vm2, %v10023_v22  ;;  %v13251_v22 = vld [vmem:[%s19777_s5 + $0xf8] sm:$0xff] }
 0x64c   : > { %15726 = vmatprep.mubr.msk.f32.mxu0 %vm4193_vm2, %v10024_v23  ;;  %v16136_v23 = vpack.c.bf16 %v13251_v22, %v13250_v21  ;;  %v11744_v21 = vld [vmem:[#allocation3 + $0xa6] sm:$0xff]  ;;  %v11745_v22 = vld [vmem:[#allocation3 + $0xae] sm:$0xff] }
 0x64f   : > { %15727 = vmatmul.mubr.msk.f32.gmra.mrb[52].mxu0 %vm4193_vm2, %v10025_v24  ;;  %v13288_v24 = vld [vmem:[%s19777_s5 + $0x100] sm:$0xff] }
 0x650   : > { %15729 = vmatprep.mubr.msk.f32.mxu0 %vm4193_vm2, %v10026_v25  ;;  %v13289_v25 = vld [vmem:[%s19777_s5 + $0x108] sm:$0xff] }
 0x653   : > { %15730 = vmatmul.mubr.msk.f32.gmra.mrb[54].mxu0 %vm4193_vm2, %v10027_v26  ;;  %v16140_v26 = vpack.c.bf16 %v13289_v25, %v13288_v24  ;;  %v11747_v24 = vld [vmem:[#allocation3 + $0xbe] sm:$0xff]  ;;  %v11748_v25 = vld [vmem:[#allocation3 + $0xc6] sm:$0xff] }
 0x654   : > { %15732 = vmatprep.mubr.msk.f32.mxu0 %vm4193_vm2, %v10028_v27  ;;  %v10902_v27 = vld [vmem:[#allocation3 + $0x134] sm:$0xff] }
 0x657   : > { %15733 = vmatmul.mubr.msk.f32.gmra.mrb[56].mxu0 %vm4193_vm2, %v10029_v11  ;;  %v10901_v11 = vld [vmem:[#allocation3 + $0x12c] sm:$0xff] }
 0x658   : > { %15735 = vmatprep.mubr.msk.f32.mxu0 %vm4193_vm2, %v10030_v28  ;;  %v10903_v28 = vld [vmem:[#allocation3 + $0x13c] sm:$0x3f] }
 0x65b   : > { %15736 = vmatmul.mubr.msk.f32.gmra.mrb[58].mxu0 %vm4193_vm2, %v10031_v29  ;;  %v13290_v29 = vld [vmem:[%s19777_s5 + $0x110] sm:$0xff] }
 0x65c   : > { %15738 = vmatprep.mubr.msk.f32.mxu0 %vm4193_vm2, %v10032_v31  ;;  %v13291_v31 = vld [vmem:[%s19777_s5 + $0x118] sm:$0xff] }
 0x65f   : > { %15739 = vmatmul.mubr.msk.f32.gmra.mrb[60].mxu0 %vm4193_vm2, %v10033_v32  ;;  %v11298_v32 = vld [vmem:[#allocation3 + $0x25] sm:$0xff] }
 0x660   : > { %15741 = vmatprep.mubr.msk.f32.mxu0 %vm4193_vm2, %v10034_v33  ;;  %v16144_v33 = vpack.c.bf16 %v13291_v31, %v13290_v29  ;;  %v11753_v29 = vld [vmem:[#allocation3 + $0xee] sm:$0xff]  ;;  %v11754_v31 = vld [vmem:[#allocation3 + $0xf6] sm:$0xff] }
 0x663   : > { %15742 = vmatmul.mubr.msk.f32.gmra.mrb[62].mxu0 %vm4193_vm2, %v10035_v34  ;;  %v11299_v34 = vld [vmem:[#allocation3 + $0x2d] sm:$0xff] }
 0x664   : > { %15744 = vmatprep.mubr.msk.f32.mxu0 %vm4193_vm2, %v10036_v35  ;;  %v11300_v35 = vld [vmem:[#allocation3 + $0x35] sm:$0xff] }
 0x667   : > { %15745 = vmatmul.mubr.msk.f32.gmra.mrb[64].mxu0 %vm4193_vm2, %v10037_v36  ;;  %v11301_v36 = vld [vmem:[#allocation3 + $0x3d] sm:$0xff] }
 0x668   : > { %15747 = vmatprep.mubr.msk.f32.mxu0 %vm4193_vm2, %v10038_v17  ;;  %v11302_v17 = vld [vmem:[#allocation3 + $0x45] sm:$0xff] }
 0x66b   : > { %15748 = vmatmul.mubr.msk.f32.gmra.mrb[66].mxu0 %vm4193_vm2, %v10039_v37  ;;  %v11303_v37 = vld [vmem:[#allocation3 + $0x4d] sm:$0xff] }
 0x66c   : > { %15750 = vmatprep.mubr.msk.f32.mxu0 %vm4193_vm2, %v10040_v38  ;;  %v11304_v38 = vld [vmem:[#allocation3 + $0x55] sm:$0xff] }
 0x66f   : > { %15751 = vmatmul.mubr.msk.f32.gmra.mrb[68].mxu0 %vm4193_vm2, %v10041_v39  ;;  %v11305_v39 = vld [vmem:[#allocation3 + $0x5d] sm:$0xff] }
 0x670   : > { %15753 = vmatprep.mubr.msk.f32.mxu0 %vm4193_vm2, %v10042_v40  ;;  %v11306_v40 = vld [vmem:[#allocation3 + $0x65] sm:$0xff] }
 0x673   : > { %15754 = vmatmul.mubr.msk.f32.gmra.mrb[70].mxu0 %vm4193_vm2, %v10043_v41  ;;  %v11307_v41 = vld [vmem:[#allocation3 + $0x6d] sm:$0xff] }
 0x674   : > { %15764 = vmatprep.mubr.msk.f32.mxu0 %vm4193_vm2, %v10438_v57  ;;  %v11310_v57 = vld [vmem:[#allocation3 + $0x85] sm:$0xff] }
 0x677   : > { %15765 = vmatmul.mubr.msk.f32.vlgmr.msra.gmra.mrb[36].mxu0 %vm4193_vm2, %v10439_v61  ;;  %v11312_v61 = vld [vmem:[#allocation3 + $0x95] sm:$0xff] }
 0x678   : > { %16127 = vmatpush3.bf16.msra.mxu0 %v19355_v8  ;;  %15767 = vmatprep.mubr.msk.f32.mxu0 %vm4193_vm2, %v19405_v2  ;;  %v10462_v8 = vld [vmem:[#allocation3 + $0xd4] sm:$0xff] }
 0x679   : > { %16129 = vmatprep.subr.bf16.mxu0 %v16128_v59 }
 0x67b   : > { %15768 = vmatmul.mubr.msk.f32.gmra.mrb[38].mxu0 %vm4193_vm2, %v19412_v4 }
 0x67c   : > { %15770 = vmatprep.mubr.msk.f32.mxu0 %vm4193_vm2, %v19416_v44  ;;  %16131 = vmatpush3.bf16.msra.mxu0 %v16128_v59  ;;  %v11311_v59 = vld [vmem:[#allocation3 + $0x8d] sm:$0xff] }
 0x67d   : > { %16133 = vmatprep.subr.bf16.mxu0 %v19410_v43 }
 0x67f   : > { %15771 = vmatmul.mubr.msk.f32.gmra.mrb[40].mxu0 %vm4193_vm2, %v19421_v47 }
 0x680   : > { %15773 = vmatprep.mubr.msk.f32.mxu0 %vm4193_vm2, %v19425_v6 }
 0x683   : > { %15774 = vmatmul.mubr.msk.f32.gmra.mrb[42].mxu0 %vm4193_vm2, %v19429_v48 }
 0x684   : > { %15776 = vmatprep.mubr.msk.f32.mxu0 %vm4193_vm2, %v19433_v50 }
 0x687   : > { %15777 = vmatmul.mubr.msk.f32.gmra.mrb[44].mxu0 %vm4193_vm2, %v19437_v49 }
 0x688   : > { %15779 = vmatprep.mubr.msk.f32.mxu0 %vm4193_vm2, %v19441_v52 }
 0x68b   : > { %15780 = vmatmul.mubr.msk.f32.gmra.mrb[46].mxu0 %vm4193_vm2, %v19445_v54 }
 0x68c   : > { %15782 = vmatprep.mubr.msk.f32.mxu0 %vm4193_vm2, %v19449_v56 }
 0x68f   : > { %15783 = vmatmul.mubr.msk.f32.gmra.mrb[48].mxu0 %vm4193_vm2, %v19453_v45 }
 0x690   : > { %15785 = vmatprep.mubr.msk.f32.mxu0 %vm4193_vm2, %v19457_v58 }
 0x693   : > { %15786 = vmatmul.mubr.msk.f32.gmra.mrb[50].mxu0 %vm4193_vm2, %v19461_v46 }
 0x694   : > { %15788 = vmatprep.mubr.msk.f32.mxu0 %vm4193_vm2, %v19465_v60 }
 0x697   : > { %15789 = vmatmul.mubr.msk.f32.gmra.mrb[52].mxu0 %vm4193_vm2, %v19469_v62 }
 0x698   : > { %15791 = vmatprep.mubr.msk.f32.mxu0 %vm4193_vm2, %v10456_v0 }
 0x69b   : > { %15792 = vmatmul.mubr.msk.f32.gmra.mrb[54].mxu0 %vm4193_vm2, %v10457_v3 }
 0x69c   : > { %15794 = vmatprep.mubr.msk.f32.mxu0 %vm4193_vm2, %v10458_v5 }
 0x69f   : > { %15795 = vmatmul.mubr.msk.f32.gmra.mrb[56].mxu0 %vm4193_vm2, %v10459_v7 }
 0x6a0   : > { %15797 = vmatprep.mubr.msk.f32.mxu0 %vm4193_vm2, %v10460_v1 }
 0x6a3   : > { %15798 = vmatmul.mubr.msk.f32.gmra.mrb[58].mxu0 %vm4193_vm2, %v10461_v51 }
 0x6a4   : > { %15800 = vmatprep.mubr.msk.f32.mxu0 %vm4193_vm2, %v10462_v8 }
 0x6a7   : > { %15801 = vmatmul.mubr.msk.f32.gmra.mrb[60].mxu0 %vm4193_vm2, %v10463_v30 }
 0x6a8   : > { %15803 = vmatprep.mubr.msk.f32.mxu0 %vm4193_vm2, %v10464_v53 }
 0x6ab   : > { %15804 = vmatmul.mubr.msk.f32.gmra.mrb[62].mxu0 %vm4193_vm2, %v10465_v9 }
 0x6ac   : > { %15806 = vmatprep.mubr.msk.f32.mxu0 %vm4193_vm2, %v10466_v10 }
 0x6af   : > { %15807 = vmatmul.mubr.msk.f32.gmra.mrb[64].mxu0 %vm4193_vm2, %v10467_v12 }
 0x6b0   : > { %15809 = vmatprep.mubr.msk.f32.mxu0 %vm4193_vm2, %v10468_v13 }
 0x6b3   : > { %15810 = vmatmul.mubr.msk.f32.gmra.mrb[66].mxu0 %vm4193_vm2, %v10469_v14 }
 0x6b4   : > { %15812 = vmatprep.mubr.msk.f32.mxu0 %vm4193_vm2, %v10470_v15 }
 0x6b7   : > { %15813 = vmatmul.mubr.msk.f32.gmra.mrb[68].mxu0 %vm4193_vm2, %v10471_v18 }
 0x6b8   : > { %15815 = vmatprep.mubr.msk.f32.mxu0 %vm4193_vm2, %v10472_v19 }
 0x6bb   : > { %15816 = vmatmul.mubr.msk.f32.gmra.mrb[70].mxu0 %vm4193_vm2, %v10473_v20  ;;  %v11743_v20 = vld [vmem:[#allocation3 + $0x9e] sm:$0xff] }
 0x6bc   : > { %15826 = vmatprep.mubr.msk.f32.mxu0 %vm4193_vm2, %v19405_v2  ;;  %v11315_v2 = vld [vmem:[#allocation3 + $0xad] sm:$0xff] }
 0x6bf   : > { %15827 = vmatmul.mubr.msk.f32.vlgmr.msra.gmra.mrb[36].mxu0 %vm4193_vm2, %v19412_v4  ;;  %v11317_v4 = vld [vmem:[#allocation3 + $0xbd] sm:$0xff] }
 0x6c0   : > { %16135 = vmatpush3.bf16.msra.mxu0 %v19410_v43  ;;  %15829 = vmatprep.mubr.msk.f32.mxu0 %vm4193_vm2, %v19416_v44  ;;  %v11316_v43 = vld [vmem:[#allocation3 + $0xb5] sm:$0xff]  ;;  %v11318_v44 = vld [vmem:[#allocation3 + $0xc5] sm:$0xff] }
 0x6c1   : > { %16137 = vmatprep.subr.bf16.mxu0 %v16136_v23 }
 0x6c3   : > { %15830 = vmatmul.mubr.msk.f32.gmra.mrb[38].mxu0 %vm4193_vm2, %v19421_v47  ;;  %v11319_v47 = vld [vmem:[#allocation3 + $0xcd] sm:$0xff] }
 0x6c4   : > { %15832 = vmatprep.mubr.msk.f32.mxu0 %vm4193_vm2, %v19425_v6  ;;  %16139 = vmatpush3.bf16.msra.mxu0 %v16136_v23  ;;  %v11320_v6 = vld [vmem:[#allocation3 + $0xd5] sm:$0xff] }
 0x6c5   : > { %16141 = vmatprep.subr.bf16.mxu0 %v16140_v26  ;;  %v11746_v23 = vld [vmem:[#allocation3 + $0xb6] sm:$0xff] }
 0x6c7   : > { %15833 = vmatmul.mubr.msk.f32.gmra.mrb[40].mxu0 %vm4193_vm2, %v19429_v48  ;;  %v11321_v48 = vld [vmem:[#allocation3 + $0xdd] sm:$0xff] }
 0x6c8   : > { %15835 = vmatprep.mubr.msk.f32.mxu0 %vm4193_vm2, %v19433_v50  ;;  %v11322_v50 = vld [vmem:[#allocation3 + $0xe5] sm:$0xff] }
 0x6cb   : > { %15836 = vmatmul.mubr.msk.f32.gmra.mrb[42].mxu0 %vm4193_vm2, %v19437_v49  ;;  %v11323_v49 = vld [vmem:[#allocation3 + $0xed] sm:$0xff] }
 0x6cc   : > { %15838 = vmatprep.mubr.msk.f32.mxu0 %vm4193_vm2, %v19441_v52  ;;  %v11324_v52 = vld [vmem:[#allocation3 + $0xf5] sm:$0xff] }
 0x6cf   : > { %15839 = vmatmul.mubr.msk.f32.gmra.mrb[44].mxu0 %vm4193_vm2, %v19445_v54  ;;  %v11325_v54 = vld [vmem:[#allocation3 + $0xfd] sm:$0xff] }
 0x6d0   : > { %15841 = vmatprep.mubr.msk.f32.mxu0 %vm4193_vm2, %v19449_v56  ;;  %v11326_v56 = vld [vmem:[#allocation3 + $0x105] sm:$0xff] }
 0x6d3   : > { %15842 = vmatmul.mubr.msk.f32.gmra.mrb[46].mxu0 %vm4193_vm2, %v19453_v45  ;;  %v11327_v45 = vld [vmem:[#allocation3 + $0x10d] sm:$0xff] }
 0x6d4   : > { %15844 = vmatprep.mubr.msk.f32.mxu0 %vm4193_vm2, %v19457_v58  ;;  %v11328_v58 = vld [vmem:[#allocation3 + $0x115] sm:$0xff] }
 0x6d7   : > { %15845 = vmatmul.mubr.msk.f32.gmra.mrb[48].mxu0 %vm4193_vm2, %v19461_v46  ;;  %v11329_v46 = vld [vmem:[#allocation3 + $0x11d] sm:$0xff] }
 0x6d8   : > { %15847 = vmatprep.mubr.msk.f32.mxu0 %vm4193_vm2, %v19465_v60  ;;  %v11330_v60 = vld [vmem:[#allocation3 + $0x125] sm:$0xff] }
 0x6db   : > { %15848 = vmatmul.mubr.msk.f32.gmra.mrb[50].mxu0 %vm4193_vm2, %v19469_v62  ;;  %v11332_v62 = vld [vmem:[#allocation3 + $0x135] sm:$0xff] }
 0x6dc   : > { %15850 = vmatprep.mubr.msk.f32.mxu0 %vm4193_vm2, %v10456_v0  ;;  %v11331_v0 = vld [vmem:[#allocation3 + $0x12d] sm:$0xff] }
 0x6df   : > { %15851 = vmatmul.mubr.msk.f32.gmra.mrb[52].mxu0 %vm4193_vm2, %v10457_v3  ;;  %v11333_v3 = vld [vmem:[#allocation3 + $0x13d] sm:$0x3f] }
 0x6e0   : > { %15853 = vmatprep.mubr.msk.f32.mxu0 %vm4193_vm2, %v10458_v5  ;;  %v11728_v5 = vld [vmem:[#allocation3 + $0x26] sm:$0xff] }
 0x6e3   : > { %15854 = vmatmul.mubr.msk.f32.gmra.mrb[54].mxu0 %vm4193_vm2, %v10459_v7  ;;  %v11729_v7 = vld [vmem:[#allocation3 + $0x2e] sm:$0xff] }
 0x6e4   : > { %15856 = vmatprep.mubr.msk.f32.mxu0 %vm4193_vm2, %v10460_v1  ;;  %v11730_v1 = vld [vmem:[#allocation3 + $0x36] sm:$0xff] }
 0x6e7   : > { %15857 = vmatmul.mubr.msk.f32.gmra.mrb[56].mxu0 %vm4193_vm2, %v10461_v51  ;;  %v11731_v51 = vld [vmem:[#allocation3 + $0x3e] sm:$0xff] }
 0x6e8   : > { %15859 = vmatprep.mubr.msk.f32.mxu0 %vm4193_vm2, %v10462_v8  ;;  %v11732_v8 = vld [vmem:[#allocation3 + $0x46] sm:$0xff] }
 0x6eb   : > { %15860 = vmatmul.mubr.msk.f32.gmra.mrb[58].mxu0 %vm4193_vm2, %v10463_v30  ;;  %v11733_v30 = vld [vmem:[#allocation3 + $0x4e] sm:$0xff] }
 0x6ec   : > { %15862 = vmatprep.mubr.msk.f32.mxu0 %vm4193_vm2, %v10464_v53  ;;  %v11734_v53 = vld [vmem:[#allocation3 + $0x56] sm:$0xff] }
 0x6ef   : > { %15863 = vmatmul.mubr.msk.f32.gmra.mrb[60].mxu0 %vm4193_vm2, %v10465_v9  ;;  %v11735_v9 = vld [vmem:[#allocation3 + $0x5e] sm:$0xff] }
 0x6f0   : > { %15865 = vmatprep.mubr.msk.f32.mxu0 %vm4193_vm2, %v10466_v10  ;;  %v11736_v10 = vld [vmem:[#allocation3 + $0x66] sm:$0xff] }
 0x6f3   : > { %15866 = vmatmul.mubr.msk.f32.gmra.mrb[62].mxu0 %vm4193_vm2, %v10467_v12  ;;  %v11737_v12 = vld [vmem:[#allocation3 + $0x6e] sm:$0xff] }
 0x6f4   : > { %15868 = vmatprep.mubr.msk.f32.mxu0 %vm4193_vm2, %v10468_v13  ;;  %v11738_v13 = vld [vmem:[#allocation3 + $0x76] sm:$0xff] }
 0x6f7   : > { %15869 = vmatmul.mubr.msk.f32.gmra.mrb[64].mxu0 %vm4193_vm2, %v10469_v14  ;;  %v11739_v14 = vld [vmem:[#allocation3 + $0x7e] sm:$0xff] }
 0x6f8   : > { %15871 = vmatprep.mubr.msk.f32.mxu0 %vm4193_vm2, %v10470_v15  ;;  %v11740_v15 = vld [vmem:[#allocation3 + $0x86] sm:$0xff] }
 0x6fb   : > { %15872 = vmatmul.mubr.msk.f32.gmra.mrb[66].mxu0 %vm4193_vm2, %v10471_v18  ;;  %v11741_v18 = vld [vmem:[#allocation3 + $0x8e] sm:$0xff] }
 0x6fc   : > { %15874 = vmatprep.mubr.msk.f32.mxu0 %vm4193_vm2, %v10472_v19  ;;  %v11742_v19 = vld [vmem:[#allocation3 + $0x96] sm:$0xff] }
 0x6ff   : > { %15875 = vmatmul.mubr.msk.f32.gmra.mrb[68].mxu0 %vm4193_vm2, %v10901_v11  ;;  %v11751_v11 = vld [vmem:[#allocation3 + $0xde] sm:$0xff] }
 0x700   : > { %15877 = vmatprep.mubr.msk.f32.mxu0 %vm4193_vm2, %v10902_v27  ;;  %v11750_v27 = vld [vmem:[#allocation3 + $0xd6] sm:$0xff] }
 0x703   : > { %15878 = vmatmul.mubr.msk.f32.gmra.mrb[70].mxu0 %vm4193_vm2, %v10903_v28  ;;  %v11752_v28 = vld [vmem:[#allocation3 + $0xe6] sm:$0xff] }
 0x704   : > { %15888 = vmatprep.mubr.msk.f32.mxu0 %vm4193_vm2, %v11298_v32  ;;  %v11755_v32 = vld [vmem:[#allocation3 + $0xfe] sm:$0xff] }
 0x707   : > { %15889 = vmatmul.mubr.msk.f32.vlgmr.msra.gmra.mrb[36].mxu0 %vm4193_vm2, %v11299_v34  ;;  %v11757_v34 = vld [vmem:[#allocation3 + $0x10e] sm:$0xff] }
 0x708   : > { %16143 = vmatpush3.bf16.msra.mxu0 %v16140_v26  ;;  %15891 = vmatprep.mubr.msk.f32.mxu0 %vm4193_vm2, %v11300_v35  ;;  %v11749_v26 = vld [vmem:[#allocation3 + $0xce] sm:$0xff]  ;;  %v11758_v35 = vld [vmem:[#allocation3 + $0x116] sm:$0xff] }
 0x709   : > { %16145 = vmatprep.subr.bf16.mxu0 %v16144_v33 }
 0x70b   : > { %15892 = vmatmul.mubr.msk.f32.gmra.mrb[38].mxu0 %vm4193_vm2, %v11301_v36  ;;  %v11759_v36 = vld [vmem:[#allocation3 + $0x11e] sm:$0xff] }
 0x70c   : > { %15894 = vmatprep.mubr.msk.f32.mxu0 %vm4193_vm2, %v11302_v17  ;;  %16147 = vmatpush3.bf16.msra.mxu0 %v16144_v33  ;;  %v11756_v33 = vld [vmem:[#allocation3 + $0x106] sm:$0xff] }
 0x70d   : > { %v11760_v17 = vld [vmem:[#allocation3 + $0x126] sm:$0xff] }
 0x70f   : > { %15895 = vmatmul.mubr.msk.f32.gmra.mrb[40].mxu0 %vm4193_vm2, %v11303_v37  ;;  %v11762_v37 = vld [vmem:[#allocation3 + $0x136] sm:$0xff] }
 0x710   : > { %15897 = vmatprep.mubr.msk.f32.mxu0 %vm4193_vm2, %v11304_v38  ;;  %v11761_v38 = vld [vmem:[#allocation3 + $0x12e] sm:$0xff] }
 0x713   : > { %15898 = vmatmul.mubr.msk.f32.gmra.mrb[42].mxu0 %vm4193_vm2, %v11305_v39  ;;  %v11763_v39 = vld [vmem:[#allocation3 + $0x13e] sm:$0x3f] }
 0x714   : > { %15900 = vmatprep.mubr.msk.f32.mxu0 %vm4193_vm2, %v11306_v40  ;;  %v19638_v40 = vld [vmem:[%s19778_s6] ss:$0 sm:$0xff] }
 0x717   : > { %15901 = vmatmul.mubr.msk.f32.gmra.mrb[44].mxu0 %vm4193_vm2, %v11307_v41 }
 0x718   : > { %15903 = vmatprep.mubr.msk.f32.mxu0 %vm4193_vm2, %v11308_v42 }
 0x71b   : > { %15904 = vmatmul.mubr.msk.f32.gmra.mrb[46].mxu0 %vm4193_vm2, %v11309_v55 }
 0x71c   : > { %15906 = vmatprep.mubr.msk.f32.mxu0 %vm4193_vm2, %v11310_v57 }
 0x71f   : > { %15907 = vmatmul.mubr.msk.f32.gmra.mrb[48].mxu0 %vm4193_vm2, %v11311_v59 }
 0x720   : > { %15909 = vmatprep.mubr.msk.f32.mxu0 %vm4193_vm2, %v11312_v61 }
 0x723   : > { %15910 = vmatmul.mubr.msk.f32.gmra.mrb[50].mxu0 %vm4193_vm2, %v11313_v63 }
 0x724   : > { %15912 = vmatprep.mubr.msk.f32.mxu0 %vm4193_vm2, %v11314_v16 }
 0x727   : > { %15913 = vmatmul.mubr.msk.f32.gmra.mrb[52].mxu0 %vm4193_vm2, %v11315_v2 }
 0x728   : > { %15915 = vmatprep.mubr.msk.f32.mxu0 %vm4193_vm2, %v11316_v43 }
 0x72b   : > { %15916 = vmatmul.mubr.msk.f32.gmra.mrb[54].mxu0 %vm4193_vm2, %v11317_v4 }
 0x72c   : > { %15918 = vmatprep.mubr.msk.f32.mxu0 %vm4193_vm2, %v11318_v44 }
 0x72f   : > { %15919 = vmatmul.mubr.msk.f32.gmra.mrb[56].mxu0 %vm4193_vm2, %v11319_v47 }
 0x730   : > { %15921 = vmatprep.mubr.msk.f32.mxu0 %vm4193_vm2, %v11320_v6 }
 0x733   : > { %15922 = vmatmul.mubr.msk.f32.gmra.mrb[58].mxu0 %vm4193_vm2, %v11321_v48 }
 0x734   : > { %15924 = vmatprep.mubr.msk.f32.mxu0 %vm4193_vm2, %v11322_v50 }
 0x737   : > { %15925 = vmatmul.mubr.msk.f32.gmra.mrb[60].mxu0 %vm4193_vm2, %v11323_v49 }
 0x738   : > { %15927 = vmatprep.mubr.msk.f32.mxu0 %vm4193_vm2, %v11324_v52 }
 0x73b   : > { %15928 = vmatmul.mubr.msk.f32.gmra.mrb[62].mxu0 %vm4193_vm2, %v11325_v54 }
 0x73c   : > { %15930 = vmatprep.mubr.msk.f32.mxu0 %vm4193_vm2, %v11326_v56 }
 0x73f   : > { %15931 = vmatmul.mubr.msk.f32.gmra.mrb[64].mxu0 %vm4193_vm2, %v11327_v45 }
 0x740   : > { %15933 = vmatprep.mubr.msk.f32.mxu0 %vm4193_vm2, %v11328_v58 }
 0x743   : > { %15934 = vmatmul.mubr.msk.f32.gmra.mrb[66].mxu0 %vm4193_vm2, %v11329_v46 }
 0x744   : > { %15936 = vmatprep.mubr.msk.f32.mxu0 %vm4193_vm2, %v11330_v60 }
 0x747   : > { %15937 = vmatmul.mubr.msk.f32.gmra.mrb[68].mxu0 %vm4193_vm2, %v11331_v0 }
 0x748   : > { %15939 = vmatprep.mubr.msk.f32.mxu0 %vm4193_vm2, %v11332_v62 }
 0x74b   : > { %15940 = vmatmul.mubr.msk.f32.gmra.mrb[70].mxu0 %vm4193_vm2, %v11333_v3 }
 0x74c   : > { %15950 = vmatprep.mubr.msk.f32.mxu0 %vm4193_vm2, %v11728_v5 }
 0x74f   : > { %15951 = vmatmul.mubr.msk.f32.vlgmr.msra.gmra.mrb[36].mxu0 %vm4193_vm2, %v11729_v7 }
 0x750   : > { %15953 = vmatprep.mubr.msk.f32.mxu0 %vm4193_vm2, %v11730_v1 }
 0x753   : > { %15954 = vmatmul.mubr.msk.f32.gmra.mrb[38].mxu0 %vm4193_vm2, %v11731_v51 }
 0x754   : > { %15956 = vmatprep.mubr.msk.f32.mxu0 %vm4193_vm2, %v11732_v8 }
 0x757   : > { %15957 = vmatmul.mubr.msk.f32.gmra.mrb[40].mxu0 %vm4193_vm2, %v11733_v30 }
 0x758   : > { %15959 = vmatprep.mubr.msk.f32.mxu0 %vm4193_vm2, %v11734_v53 }
 0x75b   : > { %15960 = vmatmul.mubr.msk.f32.gmra.mrb[42].mxu0 %vm4193_vm2, %v11735_v9 }
 0x75c   : > { %15962 = vmatprep.mubr.msk.f32.mxu0 %vm4193_vm2, %v11736_v10 }
 0x75f   : > { %15963 = vmatmul.mubr.msk.f32.gmra.mrb[44].mxu0 %vm4193_vm2, %v11737_v12 }
 0x760   : > { %15965 = vmatprep.mubr.msk.f32.mxu0 %vm4193_vm2, %v11738_v13 }
 0x763   : > { %15966 = vmatmul.mubr.msk.f32.gmra.mrb[46].mxu0 %vm4193_vm2, %v11739_v14 }
 0x764   : > { %15968 = vmatprep.mubr.msk.f32.mxu0 %vm4193_vm2, %v11740_v15 }
 0x767   : > { %15969 = vmatmul.mubr.msk.f32.gmra.mrb[48].mxu0 %vm4193_vm2, %v11741_v18 }
 0x768   : > { %15971 = vmatprep.mubr.msk.f32.mxu0 %vm4193_vm2, %v11742_v19 }
 0x76b   : > { %15972 = vmatmul.mubr.msk.f32.gmra.mrb[50].mxu0 %vm4193_vm2, %v11743_v20 }
 0x76c   : > { %15974 = vmatprep.mubr.msk.f32.mxu0 %vm4193_vm2, %v11744_v21 }
 0x76f   : > { %15975 = vmatmul.mubr.msk.f32.gmra.mrb[52].mxu0 %vm4193_vm2, %v11745_v22 }
 0x770   : > { %15977 = vmatprep.mubr.msk.f32.mxu0 %vm4193_vm2, %v11746_v23 }
 0x773   : > { %15978 = vmatmul.mubr.msk.f32.gmra.mrb[54].mxu0 %vm4193_vm2, %v11747_v24 }
 0x774   : > { %15980 = vmatprep.mubr.msk.f32.mxu0 %vm4193_vm2, %v11748_v25 }
 0x777   : > { %15981 = vmatmul.mubr.msk.f32.gmra.mrb[56].mxu0 %vm4193_vm2, %v11749_v26 }
 0x778   : > { %15983 = vmatprep.mubr.msk.f32.mxu0 %vm4193_vm2, %v11750_v27 }
 0x77b   : > { %15984 = vmatmul.mubr.msk.f32.gmra.mrb[58].mxu0 %vm4193_vm2, %v11751_v11 }
 0x77c   : > { %15986 = vmatprep.mubr.msk.f32.mxu0 %vm4193_vm2, %v11752_v28 }
 0x77f   : > { %15987 = vmatmul.mubr.msk.f32.gmra.mrb[60].mxu0 %vm4193_vm2, %v11753_v29 }
 0x780   : > { %15989 = vmatprep.mubr.msk.f32.mxu0 %vm4193_vm2, %v11754_v31 }
 0x783   : > { %15990 = vmatmul.mubr.msk.f32.gmra.mrb[62].mxu0 %vm4193_vm2, %v11755_v32 }
 0x784   : > { %15992 = vmatprep.mubr.msk.f32.mxu0 %vm4193_vm2, %v11756_v33 }
 0x787   : > { %15993 = vmatmul.mubr.msk.f32.gmra.mrb[64].mxu0 %vm4193_vm2, %v11757_v34 }
 0x788   : > { %15995 = vmatprep.mubr.msk.f32.mxu0 %vm4193_vm2, %v11758_v35 }
 0x78b   : > { %15996 = vmatmul.mubr.msk.f32.gmra.mrb[66].mxu0 %vm4193_vm2, %v11759_v36 }
 0x78c   : > { %15998 = vmatprep.mubr.msk.f32.mxu0 %vm4193_vm2, %v11760_v17 }
 0x78f   : > { %15999 = vmatmul.mubr.msk.f32.gmra.mrb[68].mxu0 %vm4193_vm2, %v11761_v38 }
 0x790   : > { %16001 = vmatprep.mubr.msk.f32.mxu0 %vm4193_vm2, %v11762_v37 }
 0x793   : > { %16002 = vmatmul.mubr.msk.f32.gmra.mrb[70].mxu0 %vm4193_vm2, %v11763_v39 }
 0x822   : > { %v15952_v41 = vpop.f32.mrb[36].mxu0 }
 0x823   : > { %v16258_v42 = vadd.f32 %v15952_v41, %v19638_v40  ;;  %v11943_v55 = vpop.f32.mrb[37].mxu0 }
 0x824   : > { %v16259_v57 = vadd.f32 %v19638_v40, %v11943_v55 }
 0x825   : > { %12160 = vst.msk [vmem:[%s19643_s10 + $0x8] sm:$0xff] %vm12158_vm9, %v16258_v42 }
 0x826   : > { %12159 = vst.msk [vmem:[%s19643_s10] sm:$0xff] %vm12158_vm9, %v16259_v57  ;;  %v15955_v59 = vpop.f32.mrb[38].mxu0 }
 0x827   : > { %v16260_v61 = vadd.f32 %v15955_v59, %v19638_v40  ;;  %v11953_v63 = vpop.f32.mrb[39].mxu0 }
 0x828   : > { %v16261_v16 = vadd.f32 %v19638_v40, %v11953_v63 }
 0x829   : > { %12163 = vst.msk [vmem:[%s19643_s10 + $0x16] sm:$0xff] %vm12158_vm9, %v16260_v61 }
 0x82a   : > { %12162 = vst.msk [vmem:[%s19643_s10 + $0xe] sm:$0xfc] %vm12161_vm10, %v16261_v16  ;;  %v15958_v2 = vpop.f32.mrb[40].mxu0 }
 0x82b   : > { %v16262_v43 = vadd.f32 %v15958_v2, %v19638_v40  ;;  %v11963_v4 = vpop.f32.mrb[41].mxu0 }
 0x82c   : > { %v16263_v44 = vadd.f32 %v19638_v40, %v11963_v4 }
 0x82d   : > { %12168 = vst.msk [vmem:[%s19643_s10 + $0x24] sm:$0xff] %vm12158_vm9, %v16262_v43 }
 0x82e   : > { %12165 = vst.msk [vmem:[%s19643_s10 + $0x1e] sm:$0x3] %vm12164_vm11, %v16263_v44  ;;  %v15961_v47 = vpop.f32.mrb[42].mxu0 }
 0x82f   : > { %12167 = vst.msk [vmem:[%s19643_s10 + $0x1c] sm:$0xf0] %vm12166_vm12, %v16263_v44  ;;  %v16264_v6 = vadd.f32 %v15961_v47, %v19638_v40  ;;  %v11973_v48 = vpop.f32.mrb[43].mxu0 }
 0x830   : > { %v16265_v50 = vadd.f32 %v19638_v40, %v11973_v48 }
 0x831   : > { %12173 = vst.msk [vmem:[%s19643_s10 + $0x32] sm:$0xff] %vm12158_vm9, %v16264_v6 }
 0x832   : > { %12170 = vst.msk [vmem:[%s19643_s10 + $0x2c] sm:$0xf] %vm12169_vm13, %v16265_v50  ;;  %v15964_v49 = vpop.f32.mrb[44].mxu0 }
 0x833   : > { %12172 = vst.msk [vmem:[%s19643_s10 + $0x2a] sm:$0xc0] %vm12171_vm14, %v16265_v50  ;;  %v16266_v52 = vadd.f32 %v15964_v49, %v19638_v40  ;;  %v11983_v54 = vpop.f32.mrb[45].mxu0 }
 0x834   : > { %v16267_v56 = vadd.f32 %v19638_v40, %v11983_v54 }
 0x835   : > { %12176 = vst.msk [vmem:[%s19643_s10 + $0x40] sm:$0xff] %vm12158_vm9, %v16266_v52 }
 0x836   : > { %12175 = vst.msk [vmem:[%s19643_s10 + $0x3a] sm:$0x3f] %vm12174_vm15, %v16267_v56  ;;  %v15967_v45 = vpop.f32.mrb[46].mxu0 }
 0x837   : > { %v16268_v58 = vadd.f32 %v15967_v45, %v19638_v40  ;;  %v11993_v46 = vpop.f32.mrb[47].mxu0 }
 0x838   : > { %v16269_v60 = vadd.f32 %v19638_v40, %v11993_v46 }
 0x839   : > { %12178 = vst.msk [vmem:[%s19643_s10 + $0x4e] sm:$0xfc] %vm12161_vm10, %v16268_v58 }
 0x83a   : > { %12177 = vst.msk [vmem:[%s19643_s10 + $0x48] sm:$0xff] %vm12158_vm9, %v16269_v60  ;;  %v15970_v62 = vpop.f32.mrb[48].mxu0 }
 0x83b   : > { %v16270_v0 = vadd.f32 %v15970_v62, %v19638_v40  ;;  %v12003_v3 = vpop.f32.mrb[49].mxu0 }
 0x83c   : > { %v16271_v5 = vadd.f32 %v19638_v40, %v12003_v3 }
 0x83d   : > { %12180 = vst.msk [vmem:[%s19643_s10 + $0x5e] sm:$0x3] %vm12164_vm11, %v16270_v0 }
 0x83e   : > { %12181 = vst.msk [vmem:[%s19643_s10 + $0x5c] sm:$0xf0] %vm12166_vm12, %v16270_v0  ;;  %v15973_v7 = vpop.f32.mrb[50].mxu0 }
 0x83f   : > { %12179 = vst.msk [vmem:[%s19643_s10 + $0x56] sm:$0xff] %vm12158_vm9, %v16271_v5  ;;  %v16272_v1 = vadd.f32 %v15973_v7, %v19638_v40  ;;  %v12013_v51 = vpop.f32.mrb[51].mxu0 }
 0x840   : > { %v16273_v8 = vadd.f32 %v19638_v40, %v12013_v51 }
 0x841   : > { %12183 = vst.msk [vmem:[%s19643_s10 + $0x6c] sm:$0xf] %vm12169_vm13, %v16272_v1 }
 0x842   : > { %12184 = vst.msk [vmem:[%s19643_s10 + $0x6a] sm:$0xc0] %vm12171_vm14, %v16272_v1  ;;  %v15976_v30 = vpop.f32.mrb[52].mxu0 }
 0x843   : > { %12182 = vst.msk [vmem:[%s19643_s10 + $0x64] sm:$0xff] %vm12158_vm9, %v16273_v8  ;;  %v16274_v53 = vadd.f32 %v15976_v30, %v19638_v40  ;;  %v12023_v9 = vpop.f32.mrb[53].mxu0 }
 0x844   : > { %v16275_v10 = vadd.f32 %v19638_v40, %v12023_v9 }
 0x845   : > { %12186 = vst.msk [vmem:[%s19643_s10 + $0x7a] sm:$0x3f] %vm12174_vm15, %v16274_v53 }
 0x846   : > { %12185 = vst.msk [vmem:[%s19643_s10 + $0x72] sm:$0xff] %vm12158_vm9, %v16275_v10  ;;  %v15979_v12 = vpop.f32.mrb[54].mxu0 }
 0x847   : > { %v16276_v13 = vadd.f32 %v15979_v12, %v19638_v40  ;;  %v12033_v14 = vpop.f32.mrb[55].mxu0 }
 0x848   : > { %v16277_v15 = vadd.f32 %v19638_v40, %v12033_v14 }
 0x849   : > { %12188 = vst.msk [vmem:[%s19643_s10 + $0x88] sm:$0xff] %vm12158_vm9, %v16276_v13 }
 0x84a   : > { %12187 = vst.msk [vmem:[%s19643_s10 + $0x80] sm:$0xff] %vm12158_vm9, %v16277_v15  ;;  %v15982_v18 = vpop.f32.mrb[56].mxu0 }
 0x84b   : > { %v16278_v19 = vadd.f32 %v15982_v18, %v19638_v40  ;;  %v12043_v20 = vpop.f32.mrb[57].mxu0 }
 0x84c   : > { %v16279_v21 = vadd.f32 %v19638_v40, %v12043_v20 }
 0x84d   : > { %12190 = vst.msk [vmem:[%s19643_s10 + $0x96] sm:$0xff] %vm12158_vm9, %v16278_v19 }
 0x84e   : > { %12189 = vst.msk [vmem:[%s19643_s10 + $0x8e] sm:$0xfc] %vm12161_vm10, %v16279_v21  ;;  %v15985_v22 = vpop.f32.mrb[58].mxu0 }
 0x84f   : > { %v16280_v23 = vadd.f32 %v15985_v22, %v19638_v40  ;;  %v12053_v24 = vpop.f32.mrb[59].mxu0 }
 0x850   : > { %v16281_v25 = vadd.f32 %v19638_v40, %v12053_v24 }
 0x851   : > { %12193 = vst.msk [vmem:[%s19643_s10 + $0xa4] sm:$0xff] %vm12158_vm9, %v16280_v23 }
 0x852   : > { %12191 = vst.msk [vmem:[%s19643_s10 + $0x9e] sm:$0x3] %vm12164_vm11, %v16281_v25  ;;  %v15988_v26 = vpop.f32.mrb[60].mxu0 }
 0x853   : > { %12192 = vst.msk [vmem:[%s19643_s10 + $0x9c] sm:$0xf0] %vm12166_vm12, %v16281_v25  ;;  %v16282_v27 = vadd.f32 %v15988_v26, %v19638_v40  ;;  %v12063_v11 = vpop.f32.mrb[61].mxu0 }
 0x854   : > { %v16283_v28 = vadd.f32 %v19638_v40, %v12063_v11 }
 0x855   : > { %12196 = vst.msk [vmem:[%s19643_s10 + $0xb2] sm:$0xff] %vm12158_vm9, %v16282_v27 }
 0x856   : > { %12194 = vst.msk [vmem:[%s19643_s10 + $0xac] sm:$0xf] %vm12169_vm13, %v16283_v28  ;;  %v15991_v29 = vpop.f32.mrb[62].mxu0 }
 0x857   : > { %12195 = vst.msk [vmem:[%s19643_s10 + $0xaa] sm:$0xc0] %vm12171_vm14, %v16283_v28  ;;  %v16284_v31 = vadd.f32 %v15991_v29, %v19638_v40  ;;  %v12073_v32 = vpop.f32.mrb[63].mxu0 }
 0x858   : > { %v16285_v33 = vadd.f32 %v19638_v40, %v12073_v32 }
 0x859   : > { %12198 = vst.msk [vmem:[%s19643_s10 + $0xc0] sm:$0xff] %vm12158_vm9, %v16284_v31 }
 0x85a   : > { %12197 = vst.msk [vmem:[%s19643_s10 + $0xba] sm:$0x3f] %vm12174_vm15, %v16285_v33  ;;  %v15994_v34 = vpop.f32.mrb[64].mxu0 }
 0x85b   : > { %v16286_v35 = vadd.f32 %v15994_v34, %v19638_v40  ;;  %v12083_v36 = vpop.f32.mrb[65].mxu0 }
 0x85c   : > { %v16287_v17 = vadd.f32 %v19638_v40, %v12083_v36 }
 0x85d   : > { %12200 = vst.msk [vmem:[%s19643_s10 + $0xce] sm:$0xfc] %vm12161_vm10, %v16286_v35 }
 0x85e   : > { %12199 = vst.msk [vmem:[%s19643_s10 + $0xc8] sm:$0xff] %vm12158_vm9, %v16287_v17  ;;  %v15997_v37 = vpop.f32.mrb[66].mxu0 }
 0x85f   : > { %v16288_v38 = vadd.f32 %v15997_v37, %v19638_v40  ;;  %v12093_v39 = vpop.f32.mrb[67].mxu0 }
 0x860   : > { %v16289_v41 = vadd.f32 %v19638_v40, %v12093_v39 }
 0x861   : > { %12202 = vst.msk [vmem:[%s19643_s10 + $0xde] sm:$0x3] %vm12164_vm11, %v16288_v38 }
 0x862   : > { %12203 = vst.msk [vmem:[%s19643_s10 + $0xdc] sm:$0xf0] %vm12166_vm12, %v16288_v38  ;;  %v16000_v42 = vpop.f32.mrb[68].mxu0 }
 0x863   : > { %12201 = vst.msk [vmem:[%s19643_s10 + $0xd6] sm:$0xff] %vm12158_vm9, %v16289_v41  ;;  %v16290_v55 = vadd.f32 %v16000_v42, %v19638_v40  ;;  %v12103_v57 = vpop.f32.mrb[69].mxu0 }
 0x864   : > { %v16291_v59 = vadd.f32 %v19638_v40, %v12103_v57 }
 0x865   : > { %12205 = vst.msk [vmem:[%s19643_s10 + $0xec] sm:$0xf] %vm12169_vm13, %v16290_v55 }
 0x866   : > { %12206 = vst.msk [vmem:[%s19643_s10 + $0xea] sm:$0xc0] %vm12171_vm14, %v16290_v55  ;;  %v16003_v61 = vpop.f32.mrb[70].mxu0 }
 0x867   : > { %12204 = vst.msk [vmem:[%s19643_s10 + $0xe4] sm:$0xff] %vm12158_vm9, %v16291_v59  ;;  %v16292_v63 = vadd.f32 %v16003_v61, %v19638_v40  ;;  %v12113_v16 = vpop.f32.mrb[71].mxu0 }
 0x868   : > { %v16293_v2 = vadd.f32 %v19638_v40, %v12113_v16 }
 0x869   : > { %12208 = vst.msk [vmem:[%s19643_s10 + $0xfa] sm:$0x3f] %vm12174_vm15, %v16292_v63 }
 0x86a   : > { %12207 = vst.msk [vmem:[%s19643_s10 + $0xf2] sm:$0xff] %vm12158_vm9, %v16293_v2 }
 0x86b PF: > { %s17_s24 = sadd.s32 1, %s17138_s24  }
 0x86c   : > { %p14_p4 = scmp.ge.s32.totalorder %s17_s24, 4  }
 0x86e   :  { %16 = sbr.rel (!%p14_p4) target bundleno = 1 (0x1), region = 102 }

</bundles_post_ra>
